<compile_context>
chip_gen: v5e
topology: v5e:2x2
jax: 0.10.0
libtpu: 0.0.40
codegen_flags: <defaults>
</compile_context>

<pallas_src>
import functools

import jax
import jax.numpy as jnp
from jax import lax
from jax.experimental import pallas as pl
from jax.experimental.pallas import tpu as pltpu


# ----------------------------- Pallas kernel --------------------------------
def _fused_lstm_kernel(n_layers, block_t, seq_len, hidden_size, compute_dtype,
                       *refs):
    """All LSTM layers, one block of `block_t` time steps per grid iteration.

    refs = [x_ref,
            w_ih_0, w_hh_0, b_0, ..., w_ih_{L-1}, w_hh_{L-1}, b_{L-1},
            h0_ref, c0_ref,                       # inputs
            out_ref, hn_ref, cn_ref,              # outputs
            h_sc, c_sc, gx_sc, y_sc]              # VMEM scratch

    x_ref   : (T, B, E)    time-major input tile for this (batch, time) block
    w_ih_l  : (E_l, 4H)    input->gates weights (pre-transposed), compute_dtype
    w_hh_l  : (H, 4H)      hidden->gates weights (pre-transposed), compute_dtype
    b_l     : (1, 4H)      combined bias b_ih + b_hh, f32
    out_ref : (T, B, H)    last-layer hidden states for this block (time-major)
    hn/cn   : (L, B, H)    final states, written once on the last time block
    h_sc/c_sc : (L, B, H)  f32 recurrent state carry
    gx_sc   : (T, B, 4H)   f32 input-projection for the whole block (per layer)
    y_sc    : (T, B, H)    f32 inter-layer activations for this block
    """
    L, T, H = n_layers, block_t, hidden_size
    n_in = 1 + 3 * L + 2
    x_ref = refs[0]
    layer_refs = refs[1:1 + 3 * L]
    h0_ref, c0_ref = refs[1 + 3 * L], refs[2 + 3 * L]
    out_ref, hn_ref, cn_ref = refs[n_in:n_in + 3]
    h_sc, c_sc, gx_sc, y_sc = refs[n_in + 3:n_in + 7]

    tb = pl.program_id(1)                     # time-block index (serial axis)
    n_tb = pl.num_programs(1)
    B = x_ref.shape[1]

    @pl.when(tb == 0)
    def _():
        h_sc[...] = h0_ref[...]
        c_sc[...] = c0_ref[...]

    def run_block(masked):
        for l in range(L):
            w_ih_ref = layer_refs[3 * l + 0]            # (E_l, 4H)
            w_hh_ref = layer_refs[3 * l + 1]            # (H, 4H)
            b_ref = layer_refs[3 * l + 2]               # (1, 4H) f32
            in_dim = w_ih_ref.shape[0]

            if l == 0:
                src = x_ref[...]                        # (T, B, E) compute_dtype
            else:
                src = y_sc[...].astype(compute_dtype)   # (T, B, H)

            # Input projection for the whole time block: ONE MXU matmul with
            # M = T*B time-major rows; result staged in VMEM so the per-step
            # read is a contiguous (B, 4H) slab.
            gx = jnp.dot(src.reshape(T * B, in_dim), w_ih_ref[...],
                         preferred_element_type=jnp.float32)
            gx_sc[...] = gx.reshape(T, B, 4 * H) + b_ref[...]

            w_hh = w_hh_ref[...]                        # hoisted out of t loop
            h = h_sc[l]                                 # (B, H) f32
            c = c_sc[l]
            last_layer = (l == L - 1)
            # Short static trip count -> fully unrolled straight-line code.
            for t in range(T):
                gates = gx_sc[t] + jnp.dot(
                    h.astype(compute_dtype), w_hh,
                    preferred_element_type=jnp.float32)  # (B, 4H) f32
                i_g = jax.nn.sigmoid(gates[:, 0 * H:1 * H])
                f_g = jax.nn.sigmoid(gates[:, 1 * H:2 * H])
                g_g = jnp.tanh(gates[:, 2 * H:3 * H])
                o_g = jax.nn.sigmoid(gates[:, 3 * H:4 * H])
                c_new = f_g * c + i_g * g_g
                h_new = o_g * jnp.tanh(c_new)
                if masked:
                    # Padded tail steps freeze the recurrent state.
                    valid = (tb * T + t) < seq_len
                    h = jnp.where(valid, h_new, h)
                    c = jnp.where(valid, c_new, c)
                else:
                    h, c = h_new, c_new
                if last_layer:
                    out_ref[t] = h.astype(out_ref.dtype)   # contiguous (B,H) store
                else:
                    y_sc[t] = h
            h_sc[l] = h
            c_sc[l] = c

    if seq_len % T != 0:
        # Only the last time block can contain padded steps.
        @pl.when(tb == n_tb - 1)
        def _():
            run_block(True)

        @pl.when(tb != n_tb - 1)
        def _():
            run_block(False)
    else:
        run_block(False)

    @pl.when(tb == n_tb - 1)
    def _():
        hn_ref[...] = h_sc[...].astype(hn_ref.dtype)
        cn_ref[...] = c_sc[...].astype(cn_ref.dtype)


# ------------------------------ module glue ---------------------------------
def encoder_lstm_forward(params, x_tokens, hidden, *, block_t=None,
                         compute_dtype=jnp.float32):
    """Matches EncoderLSTM.forward: returns (out (B,S,H), (h_n, c_n))."""
    h0_all, c0_all = hidden                                # (L, B, H) each
    L, B, H = h0_all.shape
    S = x_tokens.shape[1]

    # Embedding gather, produced directly time-major (S, B, E) at matmul dtype.
    emb_tm = jnp.take(params["embedding"], x_tokens.T, axis=0).astype(compute_dtype)
    E = emb_tm.shape[-1]
    cd = jnp.dtype(compute_dtype).itemsize

    # ---- hardware-dependent sizing -----------------------------------------
    try:
        vmem_cap = int(getattr(pltpu.get_tpu_info(), "vmem_capacity_bytes",
                               64 << 20))
    except Exception:
        vmem_cap = 64 << 20                                # conservative (v7x)
    vmem_budget = (vmem_cap * 3) // 4                      # ~96 MiB v5e/v6e, 48 MiB v7x

    # Pad batch to the 8-sublane f32 tile; optionally split into 2 batch blocks
    # so v7x's two TensorCores each run the recurrence on half the batch.
    B_pad = max(8, ((B + 7) // 8) * 8)
    if B_pad >= 16 and B_pad % 16 == 0:
        nb = 2
    else:
        nb = 1
    B_blk = B_pad // nb

    if block_t is None:
        block_t = 64 if vmem_cap > (96 << 20) else 32      # v5e/v6e vs v7x

    def vmem_need(T):
        w = 0
        for l in range(L):
            in_dim = E if l == 0 else H
            w += (in_dim * 4 * H + H * 4 * H) * cd + 4 * H * 4
        w *= 2                                             # assume double-buffered
        xblk = 2 * T * B_blk * E * cd                      # double-buffered x block
        oblk = 2 * T * B_blk * H * 4                       # double-buffered out block
        states = 2 * 2 * L * B_blk * H * 4                 # h0/c0 (2x buffered)
        states += 2 * 2 * L * B_blk * H * 4                # hn/cn (2x buffered)
        scr = 2 * L * B_blk * H * 4                        # h_sc/c_sc
        scr += T * B_blk * 4 * H * 4 + T * B_blk * H * 4   # gx_sc + y_sc
        return w + xblk + oblk + states + scr

    T = S if S <= block_t else max(8, (block_t // 8) * 8)
    while T > 8 and vmem_need(T) > vmem_budget:
        T = max(8, (T // 2 // 8) * 8)

    n_tb = pl.cdiv(S, T)
    S_pad = n_tb * T
    vmem_limit = int(min(max(vmem_need(T) + (4 << 20), 16 << 20), vmem_budget))

    # ---- padding ------------------------------------------------------------
    pad_s, pad_b = S_pad - S, B_pad - B
    if pad_s or pad_b:
        emb_tm = jnp.pad(emb_tm, ((0, pad_s), (0, pad_b), (0, 0)))
    h0 = h0_all.astype(jnp.float32)
    c0 = c0_all.astype(jnp.float32)
    if pad_b:
        h0 = jnp.pad(h0, ((0, 0), (0, pad_b), (0, 0)))
        c0 = jnp.pad(c0, ((0, 0), (0, pad_b), (0, 0)))

    wihs = [lp["w_ih"].astype(compute_dtype) for lp in params["layers"]]
    whhs = [lp["w_hh"].astype(compute_dtype) for lp in params["layers"]]
    biases = [lp["bias"] for lp in params["layers"]]       # (1, 4H) f32

    def _const_spec(shape, mode):
        zeros = (0,) * len(shape)
        if mode is None:
            return pl.BlockSpec(shape, lambda bb, tb, z=zeros: z)
        return pl.BlockSpec(shape, lambda bb, tb, z=zeros: z, pipeline_mode=mode)

    def _run(weight_mode):
        in_specs = [pl.BlockSpec((T, B_blk, E), lambda bb, tb: (tb, bb, 0))]
        weight_args = []
        for l in range(L):
            in_dim = E if l == 0 else H
            in_specs += [
                _const_spec((in_dim, 4 * H), weight_mode),   # W_ih^T (resident)
                _const_spec((H, 4 * H), weight_mode),        # W_hh^T (resident)
                _const_spec((1, 4 * H), weight_mode),        # bias   (resident)
            ]
            weight_args += [wihs[l], whhs[l], biases[l]]
        in_specs += [
            pl.BlockSpec((L, B_blk, H), lambda bb, tb: (0, bb, 0)),   # h0
            pl.BlockSpec((L, B_blk, H), lambda bb, tb: (0, bb, 0)),   # c0
        ]
        out_specs = [
            pl.BlockSpec((T, B_blk, H), lambda bb, tb: (tb, bb, 0)),  # out
            pl.BlockSpec((L, B_blk, H), lambda bb, tb: (0, bb, 0)),   # h_n
            pl.BlockSpec((L, B_blk, H), lambda bb, tb: (0, bb, 0)),   # c_n
        ]
        grid_spec = pltpu.PrefetchScalarGridSpec(
            num_scalar_prefetch=0,
            grid=(nb, n_tb),
            in_specs=in_specs,
            out_specs=out_specs,
            scratch_shapes=[
                pltpu.VMEM((L, B_blk, H), jnp.float32),       # h carry
                pltpu.VMEM((L, B_blk, H), jnp.float32),       # c carry
                pltpu.VMEM((T, B_blk, 4 * H), jnp.float32),   # gx block
                pltpu.VMEM((T, B_blk, H), jnp.float32),       # inter-layer y
            ],
        )
        res = pl.pallas_call(
            functools.partial(_fused_lstm_kernel, L, T, S, H, compute_dtype),
            out_shape=(
                jax.ShapeDtypeStruct((S_pad, B_pad, H), jnp.float32),
                jax.ShapeDtypeStruct((L, B_pad, H), jnp.float32),
                jax.ShapeDtypeStruct((L, B_pad, H), jnp.float32),
            ),
            grid_spec=grid_spec,
            compiler_params=pltpu.CompilerParams(
                dimension_semantics=("parallel", "arbitrary"),
                vmem_limit_bytes=vmem_limit,
            ),
        )(emb_tm, *weight_args, h0, c0)
        return jax.block_until_ready(res)

    try:
        out_tm, h_n, c_n = _run(pl.Buffered(1))    # single-buffered resident weights
    except Exception:
        # Pallas build without single-buffer pipeline_mode support -> default
        # (double-buffered) weight blocks; kernel itself is unchanged.
        out_tm, h_n, c_n = _run(None)

    out = jnp.transpose(out_tm[:S, :B, :], (1, 0, 2))      # back to (B, S, H)
    return out, (h_n[:, :B, :], c_n[:, :B, :])


def init_encoder_params(key, vocab_size, embedding_size, hidden_size, n_layers):
    """Deterministic parameter init (uniform(-k, k), k = 1/sqrt(hidden))."""
    k = 1.0 / jnp.sqrt(jnp.float32(hidden_size))
    keys = jax.random.split(key, 1 + 4 * n_layers)
    params = {
        "embedding": jax.random.normal(
            keys[0], (vocab_size, embedding_size), jnp.float32),
        "layers": [],
    }
    for l in range(n_layers):
        in_sz = embedding_size if l == 0 else hidden_size
        kw = keys[1 + 4 * l: 1 + 4 * (l + 1)]
        w_ih = jax.random.uniform(kw[0], (in_sz, 4 * hidden_size),
                                  jnp.float32, -k, k)            # pre-transposed
        w_hh = jax.random.uniform(kw[1], (hidden_size, 4 * hidden_size),
                                  jnp.float32, -k, k)
        b_ih = jax.random.uniform(kw[2], (4 * hidden_size,), jnp.float32, -k, k)
        b_hh = jax.random.uniform(kw[3], (4 * hidden_size,), jnp.float32, -k, k)
        params["layers"].append(
            {"w_ih": w_ih, "w_hh": w_hh,
             "bias": (b_ih + b_hh).reshape(1, 4 * hidden_size)})
    return params


def init_hidden(n_layers, batch_size, hidden_size):
    z = jnp.zeros((n_layers, batch_size, hidden_size), jnp.float32)
    return (z, z)


# --------------------------- pure-JAX reference ------------------------------
def _reference_forward(params, x_tokens, hidden):
    h0_all, c0_all = hidden
    emb = jnp.take(params["embedding"], x_tokens, axis=0)
    x_seq = jnp.transpose(emb, (1, 0, 2)).astype(jnp.float32)    # (S, B, E)
    h_fin, c_fin = [], []
    for l, lp in enumerate(params["layers"]):
        H = lp["w_hh"].shape[0]

        def step(carry, x_t, lp=lp, H=H):
            h, c = carry
            gates = x_t @ lp["w_ih"] + h @ lp["w_hh"] + lp["bias"]
            i = jax.nn.sigmoid(gates[:, 0 * H:1 * H])
            f = jax.nn.sigmoid(gates[:, 1 * H:2 * H])
            g = jnp.tanh(gates[:, 2 * H:3 * H])
            o = jax.nn.sigmoid(gates[:, 3 * H:4 * H])
            c = f * c + i * g
            h = o * jnp.tanh(c)
            return (h, c), h

        (h_n, c_n), out_seq = lax.scan(step, (h0_all[l], c0_all[l]), x_seq)
        h_fin.append(h_n)
        c_fin.append(c_n)
        x_seq = out_seq
    return jnp.transpose(x_seq, (1, 0, 2)), (jnp.stack(h_fin), jnp.stack(c_fin))


# ----------------------------------- main ------------------------------------
if __name__ == "__main__":
    VOCAB, EMB, HIDDEN, LAYERS = 50, 16, 32, 2
    BATCH, SEQ = 2, 8

    key = jax.random.PRNGKey(0)
    kp, kx, kh, kc, kx2 = jax.random.split(key, 5)
    params = init_encoder_params(kp, VOCAB, EMB, HIDDEN, LAYERS)

    x = jax.random.randint(kx, (BATCH, SEQ), 0, VOCAB, dtype=jnp.int32)
    hidden = (0.1 * jax.random.normal(kh, (LAYERS, BATCH, HIDDEN), jnp.float32),
              0.1 * jax.random.normal(kc, (LAYERS, BATCH, HIDDEN), jnp.float32))

    # --- f32 path: exact LSTM semantics check vs pure-JAX reference ----------
    out, (h_n, c_n) = encoder_lstm_forward(params, x, hidden,
                                           compute_dtype=jnp.float32)
    out = jax.block_until_ready(out)
    out_ref, (h_ref, c_ref) = _reference_forward(params, x, hidden)
    assert out.shape == (BATCH, SEQ, HIDDEN)
    assert h_n.shape == (LAYERS, BATCH, HIDDEN)
    assert c_n.shape == (LAYERS, BATCH, HIDDEN)
    assert jnp.allclose(out, out_ref, atol=1e-5), "out mismatch (f32)"
    assert jnp.allclose(h_n, h_ref, atol=1e-5), "h_n mismatch (f32)"
    assert jnp.allclose(c_n, c_ref, atol=1e-5), "c_n mismatch (f32)"

    # --- masked-tail path (S not a multiple of T) -----------------------------
    x2 = jax.random.randint(kx2, (BATCH, 11), 0, VOCAB, dtype=jnp.int32)
    out2, (h2, c2) = encoder_lstm_forward(params, x2, hidden, block_t=8)
    out2 = jax.block_until_ready(out2)
    out2_ref, (h2_ref, c2_ref) = _reference_forward(params, x2, hidden)
    assert jnp.allclose(out2, out2_ref, atol=1e-5), "out mismatch (tail)"
    assert jnp.allclose(h2, h2_ref, atol=1e-5), "h_n mismatch (tail)"
    assert jnp.allclose(c2, c2_ref, atol=1e-5), "c_n mismatch (tail)"

    # --- batch-parallel path (2 batch blocks -> v7x dual-TC sharding) ---------
    B3 = 16
    x3 = jax.random.randint(kx2, (B3, SEQ), 0, VOCAB, dtype=jnp.int32)
    hidden3 = init_hidden(LAYERS, B3, HIDDEN)
    out3, (h3, c3) = encoder_lstm_forward(params, x3, hidden3)
    out3 = jax.block_until_ready(out3)
    out3_ref, (h3_ref, c3_ref) = _reference_forward(params, x3, hidden3)
    assert jnp.allclose(out3, out3_ref, atol=1e-5), "out mismatch (batch-par)"
    assert jnp.allclose(h3, h3_ref, atol=1e-5), "h_n mismatch (batch-par)"

    # --- bf16 matmul-operand path (MXU rate; gate math stays f32) -------------
    out_bf, (h_bf, c_bf) = encoder_lstm_forward(params, x, hidden,
                                                compute_dtype=jnp.bfloat16)
    out_bf = jax.block_until_ready(out_bf)
    assert jnp.allclose(out_bf, out_ref, atol=1e-1), "out mismatch (bf16)"
    assert jnp.allclose(h_bf, h_ref, atol=1e-1), "h_n mismatch (bf16)"

    print("KERNEL_OK")
</pallas_src>

<mosaic_0001>
module attributes {stable_mosaic.version = 11 : i64} {
  func.func @_fused_lstm_kernel(%arg0: i32, %arg1: i32, %arg2: memref<8x8x16xf32, #tpu.memory_space<vmem>>, %arg3: memref<16x128xf32, #tpu.memory_space<vmem>>, %arg4: memref<32x128xf32, #tpu.memory_space<vmem>>, %arg5: memref<1x128xf32, #tpu.memory_space<vmem>>, %arg6: memref<32x128xf32, #tpu.memory_space<vmem>>, %arg7: memref<32x128xf32, #tpu.memory_space<vmem>>, %arg8: memref<1x128xf32, #tpu.memory_space<vmem>>, %arg9: memref<2x8x32xf32, #tpu.memory_space<vmem>>, %arg10: memref<2x8x32xf32, #tpu.memory_space<vmem>>, %arg11: memref<8x8x32xf32, #tpu.memory_space<vmem>>, %arg12: memref<2x8x32xf32, #tpu.memory_space<vmem>>, %arg13: memref<2x8x32xf32, #tpu.memory_space<vmem>>, %arg14: memref<2x8x32xf32, #tpu.memory_space<vmem>>, %arg15: memref<2x8x32xf32, #tpu.memory_space<vmem>>, %arg16: memref<8x8x128xf32, #tpu.memory_space<vmem>>, %arg17: memref<8x8x32xf32, #tpu.memory_space<vmem>>) attributes {dimension_semantics = [#tpu.dimension_semantics<parallel>, #tpu.dimension_semantics<arbitrary>], iteration_bounds = array<i64: 1, 1>, scalar_prefetch = 0 : i64, scratch_operands = 4 : i64, tpu.core_type = #tpu.core_type<tc>, window_params = [{transform_indices = @transform_0, window_bounds = array<i64: 8, 8, 16>}, {pipeline_mode = #tpu.pipeline_mode<synchronous>, transform_indices = @transform_1, window_bounds = array<i64: 16, 128>}, {pipeline_mode = #tpu.pipeline_mode<synchronous>, transform_indices = @transform_2, window_bounds = array<i64: 32, 128>}, {pipeline_mode = #tpu.pipeline_mode<synchronous>, transform_indices = @transform_3, window_bounds = array<i64: 1, 128>}, {pipeline_mode = #tpu.pipeline_mode<synchronous>, transform_indices = @transform_4, window_bounds = array<i64: 32, 128>}, {pipeline_mode = #tpu.pipeline_mode<synchronous>, transform_indices = @transform_5, window_bounds = array<i64: 32, 128>}, {pipeline_mode = #tpu.pipeline_mode<synchronous>, transform_indices = @transform_6, window_bounds = array<i64: 1, 128>}, {transform_indices = @transform_7, window_bounds = array<i64: 2, 8, 32>}, {transform_indices = @transform_8, window_bounds = array<i64: 2, 8, 32>}, {transform_indices = @transform_9, window_bounds = array<i64: 8, 8, 32>}, {transform_indices = @transform_10, window_bounds = array<i64: 2, 8, 32>}, {transform_indices = @transform_11, window_bounds = array<i64: 2, 8, 32>}]} {
    %c0_i32 = arith.constant 0 : i32
    %0 = arith.cmpi eq, %arg1, %c0_i32 : i32
    %1 = arith.extui %0 : i1 to i32
    %c0_i32_0 = arith.constant 0 : i32
    %2 = arith.cmpi ne, %1, %c0_i32_0 : i32
    scf.if %2 {
      %c0_204 = arith.constant 0 : index
      %c0_205 = arith.constant 0 : index
      %c0_206 = arith.constant 0 : index
      %560 = vector.load %arg9[%c0_204, %c0_205, %c0_206] : memref<2x8x32xf32, #tpu.memory_space<vmem>>, vector<2x8x32xf32>
      %c0_207 = arith.constant 0 : index
      %c0_208 = arith.constant 0 : index
      %c0_209 = arith.constant 0 : index
      %561 = vector.load %arg14[%c0_207, %c0_208, %c0_209] : memref<2x8x32xf32, #tpu.memory_space<vmem>>, vector<2x8x32xf32>
      tpu.vector_store %arg14[%c0_207, %c0_208, %c0_209], %560 {strides = array<i32>} : memref<2x8x32xf32, #tpu.memory_space<vmem>>, vector<2x8x32xf32>,
      %c0_210 = arith.constant 0 : index
      %c0_211 = arith.constant 0 : index
      %c0_212 = arith.constant 0 : index
      %562 = vector.load %arg10[%c0_210, %c0_211, %c0_212] : memref<2x8x32xf32, #tpu.memory_space<vmem>>, vector<2x8x32xf32>
      %c0_213 = arith.constant 0 : index
      %c0_214 = arith.constant 0 : index
      %c0_215 = arith.constant 0 : index
      %563 = vector.load %arg15[%c0_213, %c0_214, %c0_215] : memref<2x8x32xf32, #tpu.memory_space<vmem>>, vector<2x8x32xf32>
      tpu.vector_store %arg15[%c0_213, %c0_214, %c0_215], %562 {strides = array<i32>} : memref<2x8x32xf32, #tpu.memory_space<vmem>>, vector<2x8x32xf32>,
    } else {
    }
    %c0 = arith.constant 0 : index
    %c0_1 = arith.constant 0 : index
    %c0_2 = arith.constant 0 : index
    %3 = vector.load %arg2[%c0, %c0_1, %c0_2] : memref<8x8x16xf32, #tpu.memory_space<vmem>>, vector<8x8x16xf32>
    %4 = vector.shape_cast %3 : vector<8x8x16xf32> to vector<64x16xf32>
    %c0_3 = arith.constant 0 : index
    %c0_4 = arith.constant 0 : index
    %5 = vector.load %arg3[%c0_3, %c0_4] : memref<16x128xf32, #tpu.memory_space<vmem>>, vector<16x128xf32>
    %cst = arith.constant dense<0.000000e+00> : vector<64x128xf32>
    %6 = tpu.matmul %4, %5, %cst {dimension_numbers = #tpu.dot_dimension_numbers<[1], [0], [0], [1], [0, 0, 1, 1], [], []>} : vector<64x16xf32>, vector<16x128xf32>, vector<64x128xf32> -> vector<64x128xf32>
    %7 = vector.shape_cast %6 : vector<64x128xf32> to vector<8x8x128xf32>
    %c0_5 = arith.constant 0 : index
    %c0_6 = arith.constant 0 : index
    %8 = vector.load %arg5[%c0_5, %c0_6] : memref<1x128xf32, #tpu.memory_space<vmem>>, vector<1x128xf32>
    %9 = vector.shape_cast %8 : vector<1x128xf32> to vector<1x1x128xf32>
    %10 = vector.broadcast %9 : vector<1x1x128xf32> to vector<8x8x128xf32>
    %11 = arith.addf %7, %10 : vector<8x8x128xf32>
    %c0_7 = arith.constant 0 : index
    %c0_8 = arith.constant 0 : index
    %c0_9 = arith.constant 0 : index
    %12 = vector.load %arg16[%c0_7, %c0_8, %c0_9] : memref<8x8x128xf32, #tpu.memory_space<vmem>>, vector<8x8x128xf32>
    tpu.vector_store %arg16[%c0_7, %c0_8, %c0_9], %11 {strides = array<i32>} : memref<8x8x128xf32, #tpu.memory_space<vmem>>, vector<8x8x128xf32>,
    %c0_10 = arith.constant 0 : index
    %c0_11 = arith.constant 0 : index
    %13 = vector.load %arg4[%c0_10, %c0_11] : memref<32x128xf32, #tpu.memory_space<vmem>>, vector<32x128xf32>
    %c0_12 = arith.constant 0 : index
    %c0_13 = arith.constant 0 : index
    %c0_14 = arith.constant 0 : index
    %14 = vector.load %arg14[%c0_12, %c0_13, %c0_14] : memref<2x8x32xf32, #tpu.memory_space<vmem>>, vector<1x8x32xf32>
    %15 = vector.shape_cast %14 : vector<1x8x32xf32> to vector<8x32xf32>
    %c0_15 = arith.constant 0 : index
    %c0_16 = arith.constant 0 : index
    %c0_17 = arith.constant 0 : index
    %16 = vector.load %arg15[%c0_15, %c0_16, %c0_17] : memref<2x8x32xf32, #tpu.memory_space<vmem>>, vector<1x8x32xf32>
    %17 = vector.shape_cast %16 : vector<1x8x32xf32> to vector<8x32xf32>
    %c0_18 = arith.constant 0 : index
    %c0_19 = arith.constant 0 : index
    %c0_20 = arith.constant 0 : index
    %18 = vector.load %arg16[%c0_18, %c0_19, %c0_20] : memref<8x8x128xf32, #tpu.memory_space<vmem>>, vector<1x8x128xf32>
    %19 = vector.shape_cast %18 : vector<1x8x128xf32> to vector<8x128xf32>
    %cst_21 = arith.constant dense<0.000000e+00> : vector<8x128xf32>
    %20 = tpu.matmul %15, %13, %cst_21 {dimension_numbers = #tpu.dot_dimension_numbers<[1], [0], [0], [1], [0, 0, 1, 1], [], []>} : vector<8x32xf32>, vector<32x128xf32>, vector<8x128xf32> -> vector<8x128xf32>
    %21 = arith.addf %19, %20 : vector<8x128xf32>
    %22 = vector.extract_strided_slice %21 {offsets = [0, 0], sizes = [8, 32], strides = [1, 1]} : vector<8x128xf32> to vector<8x32xf32>
    %23 = arith.negf %22 : vector<8x32xf32>
    %24 = math.exp %23 : vector<8x32xf32>
    %cst_22 = arith.constant 1.000000e+00 : f32
    %25 = vector.broadcast %cst_22 : f32 to vector<8x32xf32>
    %26 = arith.addf %25, %24 : vector<8x32xf32>
    %27 = arith.divf %25, %26 : vector<8x32xf32>
    %28 = vector.extract_strided_slice %21 {offsets = [0, 32], sizes = [8, 32], strides = [1, 1]} : vector<8x128xf32> to vector<8x32xf32>
    %29 = arith.negf %28 : vector<8x32xf32>
    %30 = math.exp %29 : vector<8x32xf32>
    %cst_23 = arith.constant 1.000000e+00 : f32
    %31 = vector.broadcast %cst_23 : f32 to vector<8x32xf32>
    %32 = arith.addf %31, %30 : vector<8x32xf32>
    %33 = arith.divf %31, %32 : vector<8x32xf32>
    %34 = vector.extract_strided_slice %21 {offsets = [0, 64], sizes = [8, 32], strides = [1, 1]} : vector<8x128xf32> to vector<8x32xf32>
    %35 = math.tanh %34 : vector<8x32xf32>
    %36 = vector.extract_strided_slice %21 {offsets = [0, 96], sizes = [8, 32], strides = [1, 1]} : vector<8x128xf32> to vector<8x32xf32>
    %37 = arith.negf %36 : vector<8x32xf32>
    %38 = math.exp %37 : vector<8x32xf32>
    %cst_24 = arith.constant 1.000000e+00 : f32
    %39 = vector.broadcast %cst_24 : f32 to vector<8x32xf32>
    %40 = arith.addf %39, %38 : vector<8x32xf32>
    %41 = arith.divf %39, %40 : vector<8x32xf32>
    %42 = arith.mulf %33, %17 : vector<8x32xf32>
    %43 = arith.mulf %27, %35 : vector<8x32xf32>
    %44 = arith.addf %42, %43 : vector<8x32xf32>
    %45 = math.tanh %44 : vector<8x32xf32>
    %46 = arith.mulf %41, %45 : vector<8x32xf32>
    %c0_25 = arith.constant 0 : index
    %c0_26 = arith.constant 0 : index
    %c0_27 = arith.constant 0 : index
    %47 = vector.load %arg17[%c0_25, %c0_26, %c0_27] : memref<8x8x32xf32, #tpu.memory_space<vmem>>, vector<1x8x32xf32>
    %48 = vector.shape_cast %47 : vector<1x8x32xf32> to vector<8x32xf32>
    %49 = vector.shape_cast %46 : vector<8x32xf32> to vector<1x8x32xf32>
    tpu.vector_store %arg17[%c0_25, %c0_26, %c0_27], %49 {strides = array<i32>} : memref<8x8x32xf32, #tpu.memory_space<vmem>>, vector<1x8x32xf32>,
    %c1 = arith.constant 1 : index
    %c0_28 = arith.constant 0 : index
    %c0_29 = arith.constant 0 : index
    %50 = vector.load %arg16[%c1, %c0_28, %c0_29] : memref<8x8x128xf32, #tpu.memory_space<vmem>>, vector<1x8x128xf32>
    %51 = vector.shape_cast %50 : vector<1x8x128xf32> to vector<8x128xf32>
    %cst_30 = arith.constant dense<0.000000e+00> : vector<8x128xf32>
    %52 = tpu.matmul %46, %13, %cst_30 {dimension_numbers = #tpu.dot_dimension_numbers<[1], [0], [0], [1], [0, 0, 1, 1], [], []>} : vector<8x32xf32>, vector<32x128xf32>, vector<8x128xf32> -> vector<8x128xf32>
    %53 = arith.addf %51, %52 : vector<8x128xf32>
    %54 = vector.extract_strided_slice %53 {offsets = [0, 0], sizes = [8, 32], strides = [1, 1]} : vector<8x128xf32> to vector<8x32xf32>
    %55 = arith.negf %54 : vector<8x32xf32>
    %56 = math.exp %55 : vector<8x32xf32>
    %cst_31 = arith.constant 1.000000e+00 : f32
    %57 = vector.broadcast %cst_31 : f32 to vector<8x32xf32>
    %58 = arith.addf %57, %56 : vector<8x32xf32>
    %59 = arith.divf %57, %58 : vector<8x32xf32>
    %60 = vector.extract_strided_slice %53 {offsets = [0, 32], sizes = [8, 32], strides = [1, 1]} : vector<8x128xf32> to vector<8x32xf32>
    %61 = arith.negf %60 : vector<8x32xf32>
    %62 = math.exp %61 : vector<8x32xf32>
    %cst_32 = arith.constant 1.000000e+00 : f32
    %63 = vector.broadcast %cst_32 : f32 to vector<8x32xf32>
    %64 = arith.addf %63, %62 : vector<8x32xf32>
    %65 = arith.divf %63, %64 : vector<8x32xf32>
    %66 = vector.extract_strided_slice %53 {offsets = [0, 64], sizes = [8, 32], strides = [1, 1]} : vector<8x128xf32> to vector<8x32xf32>
    %67 = math.tanh %66 : vector<8x32xf32>
    %68 = vector.extract_strided_slice %53 {offsets = [0, 96], sizes = [8, 32], strides = [1, 1]} : vector<8x128xf32> to vector<8x32xf32>
    %69 = arith.negf %68 : vector<8x32xf32>
    %70 = math.exp %69 : vector<8x32xf32>
    %cst_33 = arith.constant 1.000000e+00 : f32
    %71 = vector.broadcast %cst_33 : f32 to vector<8x32xf32>
    %72 = arith.addf %71, %70 : vector<8x32xf32>
    %73 = arith.divf %71, %72 : vector<8x32xf32>
    %74 = arith.mulf %65, %44 : vector<8x32xf32>
    %75 = arith.mulf %59, %67 : vector<8x32xf32>
    %76 = arith.addf %74, %75 : vector<8x32xf32>
    %77 = math.tanh %76 : vector<8x32xf32>
    %78 = arith.mulf %73, %77 : vector<8x32xf32>
    %c1_34 = arith.constant 1 : index
    %c0_35 = arith.constant 0 : index
    %c0_36 = arith.constant 0 : index
    %79 = vector.load %arg17[%c1_34, %c0_35, %c0_36] : memref<8x8x32xf32, #tpu.memory_space<vmem>>, vector<1x8x32xf32>
    %80 = vector.shape_cast %79 : vector<1x8x32xf32> to vector<8x32xf32>
    %81 = vector.shape_cast %78 : vector<8x32xf32> to vector<1x8x32xf32>
    tpu.vector_store %arg17[%c1_34, %c0_35, %c0_36], %81 {strides = array<i32>} : memref<8x8x32xf32, #tpu.memory_space<vmem>>, vector<1x8x32xf32>,
    %c2 = arith.constant 2 : index
    %c0_37 = arith.constant 0 : index
    %c0_38 = arith.constant 0 : index
    %82 = vector.load %arg16[%c2, %c0_37, %c0_38] : memref<8x8x128xf32, #tpu.memory_space<vmem>>, vector<1x8x128xf32>
    %83 = vector.shape_cast %82 : vector<1x8x128xf32> to vector<8x128xf32>
    %cst_39 = arith.constant dense<0.000000e+00> : vector<8x128xf32>
    %84 = tpu.matmul %78, %13, %cst_39 {dimension_numbers = #tpu.dot_dimension_numbers<[1], [0], [0], [1], [0, 0, 1, 1], [], []>} : vector<8x32xf32>, vector<32x128xf32>, vector<8x128xf32> -> vector<8x128xf32>
    %85 = arith.addf %83, %84 : vector<8x128xf32>
    %86 = vector.extract_strided_slice %85 {offsets = [0, 0], sizes = [8, 32], strides = [1, 1]} : vector<8x128xf32> to vector<8x32xf32>
    %87 = arith.negf %86 : vector<8x32xf32>
    %88 = math.exp %87 : vector<8x32xf32>
    %cst_40 = arith.constant 1.000000e+00 : f32
    %89 = vector.broadcast %cst_40 : f32 to vector<8x32xf32>
    %90 = arith.addf %89, %88 : vector<8x32xf32>
    %91 = arith.divf %89, %90 : vector<8x32xf32>
    %92 = vector.extract_strided_slice %85 {offsets = [0, 32], sizes = [8, 32], strides = [1, 1]} : vector<8x128xf32> to vector<8x32xf32>
    %93 = arith.negf %92 : vector<8x32xf32>
    %94 = math.exp %93 : vector<8x32xf32>
    %cst_41 = arith.constant 1.000000e+00 : f32
    %95 = vector.broadcast %cst_41 : f32 to vector<8x32xf32>
    %96 = arith.addf %95, %94 : vector<8x32xf32>
    %97 = arith.divf %95, %96 : vector<8x32xf32>
    %98 = vector.extract_strided_slice %85 {offsets = [0, 64], sizes = [8, 32], strides = [1, 1]} : vector<8x128xf32> to vector<8x32xf32>
    %99 = math.tanh %98 : vector<8x32xf32>
    %100 = vector.extract_strided_slice %85 {offsets = [0, 96], sizes = [8, 32], strides = [1, 1]} : vector<8x128xf32> to vector<8x32xf32>
    %101 = arith.negf %100 : vector<8x32xf32>
    %102 = math.exp %101 : vector<8x32xf32>
    %cst_42 = arith.constant 1.000000e+00 : f32
    %103 = vector.broadcast %cst_42 : f32 to vector<8x32xf32>
    %104 = arith.addf %103, %102 : vector<8x32xf32>
    %105 = arith.divf %103, %104 : vector<8x32xf32>
    %106 = arith.mulf %97, %76 : vector<8x32xf32>
    %107 = arith.mulf %91, %99 : vector<8x32xf32>
    %108 = arith.addf %106, %107 : vector<8x32xf32>
    %109 = math.tanh %108 : vector<8x32xf32>
    %110 = arith.mulf %105, %109 : vector<8x32xf32>
    %c2_43 = arith.constant 2 : index
    %c0_44 = arith.constant 0 : index
    %c0_45 = arith.constant 0 : index
    %111 = vector.load %arg17[%c2_43, %c0_44, %c0_45] : memref<8x8x32xf32, #tpu.memory_space<vmem>>, vector<1x8x32xf32>
    %112 = vector.shape_cast %111 : vector<1x8x32xf32> to vector<8x32xf32>
    %113 = vector.shape_cast %110 : vector<8x32xf32> to vector<1x8x32xf32>
    tpu.vector_store %arg17[%c2_43, %c0_44, %c0_45], %113 {strides = array<i32>} : memref<8x8x32xf32, #tpu.memory_space<vmem>>, vector<1x8x32xf32>,
    %c3 = arith.constant 3 : index
    %c0_46 = arith.constant 0 : index
    %c0_47 = arith.constant 0 : index
    %114 = vector.load %arg16[%c3, %c0_46, %c0_47] : memref<8x8x128xf32, #tpu.memory_space<vmem>>, vector<1x8x128xf32>
    %115 = vector.shape_cast %114 : vector<1x8x128xf32> to vector<8x128xf32>
    %cst_48 = arith.constant dense<0.000000e+00> : vector<8x128xf32>
    %116 = tpu.matmul %110, %13, %cst_48 {dimension_numbers = #tpu.dot_dimension_numbers<[1], [0], [0], [1], [0, 0, 1, 1], [], []>} : vector<8x32xf32>, vector<32x128xf32>, vector<8x128xf32> -> vector<8x128xf32>
    %117 = arith.addf %115, %116 : vector<8x128xf32>
    %118 = vector.extract_strided_slice %117 {offsets = [0, 0], sizes = [8, 32], strides = [1, 1]} : vector<8x128xf32> to vector<8x32xf32>
    %119 = arith.negf %118 : vector<8x32xf32>
    %120 = math.exp %119 : vector<8x32xf32>
    %cst_49 = arith.constant 1.000000e+00 : f32
    %121 = vector.broadcast %cst_49 : f32 to vector<8x32xf32>
    %122 = arith.addf %121, %120 : vector<8x32xf32>
    %123 = arith.divf %121, %122 : vector<8x32xf32>
    %124 = vector.extract_strided_slice %117 {offsets = [0, 32], sizes = [8, 32], strides = [1, 1]} : vector<8x128xf32> to vector<8x32xf32>
    %125 = arith.negf %124 : vector<8x32xf32>
    %126 = math.exp %125 : vector<8x32xf32>
    %cst_50 = arith.constant 1.000000e+00 : f32
    %127 = vector.broadcast %cst_50 : f32 to vector<8x32xf32>
    %128 = arith.addf %127, %126 : vector<8x32xf32>
    %129 = arith.divf %127, %128 : vector<8x32xf32>
    %130 = vector.extract_strided_slice %117 {offsets = [0, 64], sizes = [8, 32], strides = [1, 1]} : vector<8x128xf32> to vector<8x32xf32>
    %131 = math.tanh %130 : vector<8x32xf32>
    %132 = vector.extract_strided_slice %117 {offsets = [0, 96], sizes = [8, 32], strides = [1, 1]} : vector<8x128xf32> to vector<8x32xf32>
    %133 = arith.negf %132 : vector<8x32xf32>
    %134 = math.exp %133 : vector<8x32xf32>
    %cst_51 = arith.constant 1.000000e+00 : f32
    %135 = vector.broadcast %cst_51 : f32 to vector<8x32xf32>
    %136 = arith.addf %135, %134 : vector<8x32xf32>
    %137 = arith.divf %135, %136 : vector<8x32xf32>
    %138 = arith.mulf %129, %108 : vector<8x32xf32>
    %139 = arith.mulf %123, %131 : vector<8x32xf32>
    %140 = arith.addf %138, %139 : vector<8x32xf32>
    %141 = math.tanh %140 : vector<8x32xf32>
    %142 = arith.mulf %137, %141 : vector<8x32xf32>
    %c3_52 = arith.constant 3 : index
    %c0_53 = arith.constant 0 : index
    %c0_54 = arith.constant 0 : index
    %143 = vector.load %arg17[%c3_52, %c0_53, %c0_54] : memref<8x8x32xf32, #tpu.memory_space<vmem>>, vector<1x8x32xf32>
    %144 = vector.shape_cast %143 : vector<1x8x32xf32> to vector<8x32xf32>
    %145 = vector.shape_cast %142 : vector<8x32xf32> to vector<1x8x32xf32>
    tpu.vector_store %arg17[%c3_52, %c0_53, %c0_54], %145 {strides = array<i32>} : memref<8x8x32xf32, #tpu.memory_space<vmem>>, vector<1x8x32xf32>,
    %c4 = arith.constant 4 : index
    %c0_55 = arith.constant 0 : index
    %c0_56 = arith.constant 0 : index
    %146 = vector.load %arg16[%c4, %c0_55, %c0_56] : memref<8x8x128xf32, #tpu.memory_space<vmem>>, vector<1x8x128xf32>
    %147 = vector.shape_cast %146 : vector<1x8x128xf32> to vector<8x128xf32>
    %cst_57 = arith.constant dense<0.000000e+00> : vector<8x128xf32>
    %148 = tpu.matmul %142, %13, %cst_57 {dimension_numbers = #tpu.dot_dimension_numbers<[1], [0], [0], [1], [0, 0, 1, 1], [], []>} : vector<8x32xf32>, vector<32x128xf32>, vector<8x128xf32> -> vector<8x128xf32>
    %149 = arith.addf %147, %148 : vector<8x128xf32>
    %150 = vector.extract_strided_slice %149 {offsets = [0, 0], sizes = [8, 32], strides = [1, 1]} : vector<8x128xf32> to vector<8x32xf32>
    %151 = arith.negf %150 : vector<8x32xf32>
    %152 = math.exp %151 : vector<8x32xf32>
    %cst_58 = arith.constant 1.000000e+00 : f32
    %153 = vector.broadcast %cst_58 : f32 to vector<8x32xf32>
    %154 = arith.addf %153, %152 : vector<8x32xf32>
    %155 = arith.divf %153, %154 : vector<8x32xf32>
    %156 = vector.extract_strided_slice %149 {offsets = [0, 32], sizes = [8, 32], strides = [1, 1]} : vector<8x128xf32> to vector<8x32xf32>
    %157 = arith.negf %156 : vector<8x32xf32>
    %158 = math.exp %157 : vector<8x32xf32>
    %cst_59 = arith.constant 1.000000e+00 : f32
    %159 = vector.broadcast %cst_59 : f32 to vector<8x32xf32>
    %160 = arith.addf %159, %158 : vector<8x32xf32>
    %161 = arith.divf %159, %160 : vector<8x32xf32>
    %162 = vector.extract_strided_slice %149 {offsets = [0, 64], sizes = [8, 32], strides = [1, 1]} : vector<8x128xf32> to vector<8x32xf32>
    %163 = math.tanh %162 : vector<8x32xf32>
    %164 = vector.extract_strided_slice %149 {offsets = [0, 96], sizes = [8, 32], strides = [1, 1]} : vector<8x128xf32> to vector<8x32xf32>
    %165 = arith.negf %164 : vector<8x32xf32>
    %166 = math.exp %165 : vector<8x32xf32>
    %cst_60 = arith.constant 1.000000e+00 : f32
    %167 = vector.broadcast %cst_60 : f32 to vector<8x32xf32>
    %168 = arith.addf %167, %166 : vector<8x32xf32>
    %169 = arith.divf %167, %168 : vector<8x32xf32>
    %170 = arith.mulf %161, %140 : vector<8x32xf32>
    %171 = arith.mulf %155, %163 : vector<8x32xf32>
    %172 = arith.addf %170, %171 : vector<8x32xf32>
    %173 = math.tanh %172 : vector<8x32xf32>
    %174 = arith.mulf %169, %173 : vector<8x32xf32>
    %c4_61 = arith.constant 4 : index
    %c0_62 = arith.constant 0 : index
    %c0_63 = arith.constant 0 : index
    %175 = vector.load %arg17[%c4_61, %c0_62, %c0_63] : memref<8x8x32xf32, #tpu.memory_space<vmem>>, vector<1x8x32xf32>
    %176 = vector.shape_cast %175 : vector<1x8x32xf32> to vector<8x32xf32>
    %177 = vector.shape_cast %174 : vector<8x32xf32> to vector<1x8x32xf32>
    tpu.vector_store %arg17[%c4_61, %c0_62, %c0_63], %177 {strides = array<i32>} : memref<8x8x32xf32, #tpu.memory_space<vmem>>, vector<1x8x32xf32>,
    %c5 = arith.constant 5 : index
    %c0_64 = arith.constant 0 : index
    %c0_65 = arith.constant 0 : index
    %178 = vector.load %arg16[%c5, %c0_64, %c0_65] : memref<8x8x128xf32, #tpu.memory_space<vmem>>, vector<1x8x128xf32>
    %179 = vector.shape_cast %178 : vector<1x8x128xf32> to vector<8x128xf32>
    %cst_66 = arith.constant dense<0.000000e+00> : vector<8x128xf32>
    %180 = tpu.matmul %174, %13, %cst_66 {dimension_numbers = #tpu.dot_dimension_numbers<[1], [0], [0], [1], [0, 0, 1, 1], [], []>} : vector<8x32xf32>, vector<32x128xf32>, vector<8x128xf32> -> vector<8x128xf32>
    %181 = arith.addf %179, %180 : vector<8x128xf32>
    %182 = vector.extract_strided_slice %181 {offsets = [0, 0], sizes = [8, 32], strides = [1, 1]} : vector<8x128xf32> to vector<8x32xf32>
    %183 = arith.negf %182 : vector<8x32xf32>
    %184 = math.exp %183 : vector<8x32xf32>
    %cst_67 = arith.constant 1.000000e+00 : f32
    %185 = vector.broadcast %cst_67 : f32 to vector<8x32xf32>
    %186 = arith.addf %185, %184 : vector<8x32xf32>
    %187 = arith.divf %185, %186 : vector<8x32xf32>
    %188 = vector.extract_strided_slice %181 {offsets = [0, 32], sizes = [8, 32], strides = [1, 1]} : vector<8x128xf32> to vector<8x32xf32>
    %189 = arith.negf %188 : vector<8x32xf32>
    %190 = math.exp %189 : vector<8x32xf32>
    %cst_68 = arith.constant 1.000000e+00 : f32
    %191 = vector.broadcast %cst_68 : f32 to vector<8x32xf32>
    %192 = arith.addf %191, %190 : vector<8x32xf32>
    %193 = arith.divf %191, %192 : vector<8x32xf32>
    %194 = vector.extract_strided_slice %181 {offsets = [0, 64], sizes = [8, 32], strides = [1, 1]} : vector<8x128xf32> to vector<8x32xf32>
    %195 = math.tanh %194 : vector<8x32xf32>
    %196 = vector.extract_strided_slice %181 {offsets = [0, 96], sizes = [8, 32], strides = [1, 1]} : vector<8x128xf32> to vector<8x32xf32>
    %197 = arith.negf %196 : vector<8x32xf32>
    %198 = math.exp %197 : vector<8x32xf32>
    %cst_69 = arith.constant 1.000000e+00 : f32
    %199 = vector.broadcast %cst_69 : f32 to vector<8x32xf32>
    %200 = arith.addf %199, %198 : vector<8x32xf32>
    %201 = arith.divf %199, %200 : vector<8x32xf32>
    %202 = arith.mulf %193, %172 : vector<8x32xf32>
    %203 = arith.mulf %187, %195 : vector<8x32xf32>
    %204 = arith.addf %202, %203 : vector<8x32xf32>
    %205 = math.tanh %204 : vector<8x32xf32>
    %206 = arith.mulf %201, %205 : vector<8x32xf32>
    %c5_70 = arith.constant 5 : index
    %c0_71 = arith.constant 0 : index
    %c0_72 = arith.constant 0 : index
    %207 = vector.load %arg17[%c5_70, %c0_71, %c0_72] : memref<8x8x32xf32, #tpu.memory_space<vmem>>, vector<1x8x32xf32>
    %208 = vector.shape_cast %207 : vector<1x8x32xf32> to vector<8x32xf32>
    %209 = vector.shape_cast %206 : vector<8x32xf32> to vector<1x8x32xf32>
    tpu.vector_store %arg17[%c5_70, %c0_71, %c0_72], %209 {strides = array<i32>} : memref<8x8x32xf32, #tpu.memory_space<vmem>>, vector<1x8x32xf32>,
    %c6 = arith.constant 6 : index
    %c0_73 = arith.constant 0 : index
    %c0_74 = arith.constant 0 : index
    %210 = vector.load %arg16[%c6, %c0_73, %c0_74] : memref<8x8x128xf32, #tpu.memory_space<vmem>>, vector<1x8x128xf32>
    %211 = vector.shape_cast %210 : vector<1x8x128xf32> to vector<8x128xf32>
    %cst_75 = arith.constant dense<0.000000e+00> : vector<8x128xf32>
    %212 = tpu.matmul %206, %13, %cst_75 {dimension_numbers = #tpu.dot_dimension_numbers<[1], [0], [0], [1], [0, 0, 1, 1], [], []>} : vector<8x32xf32>, vector<32x128xf32>, vector<8x128xf32> -> vector<8x128xf32>
    %213 = arith.addf %211, %212 : vector<8x128xf32>
    %214 = vector.extract_strided_slice %213 {offsets = [0, 0], sizes = [8, 32], strides = [1, 1]} : vector<8x128xf32> to vector<8x32xf32>
    %215 = arith.negf %214 : vector<8x32xf32>
    %216 = math.exp %215 : vector<8x32xf32>
    %cst_76 = arith.constant 1.000000e+00 : f32
    %217 = vector.broadcast %cst_76 : f32 to vector<8x32xf32>
    %218 = arith.addf %217, %216 : vector<8x32xf32>
    %219 = arith.divf %217, %218 : vector<8x32xf32>
    %220 = vector.extract_strided_slice %213 {offsets = [0, 32], sizes = [8, 32], strides = [1, 1]} : vector<8x128xf32> to vector<8x32xf32>
    %221 = arith.negf %220 : vector<8x32xf32>
    %222 = math.exp %221 : vector<8x32xf32>
    %cst_77 = arith.constant 1.000000e+00 : f32
    %223 = vector.broadcast %cst_77 : f32 to vector<8x32xf32>
    %224 = arith.addf %223, %222 : vector<8x32xf32>
    %225 = arith.divf %223, %224 : vector<8x32xf32>
    %226 = vector.extract_strided_slice %213 {offsets = [0, 64], sizes = [8, 32], strides = [1, 1]} : vector<8x128xf32> to vector<8x32xf32>
    %227 = math.tanh %226 : vector<8x32xf32>
    %228 = vector.extract_strided_slice %213 {offsets = [0, 96], sizes = [8, 32], strides = [1, 1]} : vector<8x128xf32> to vector<8x32xf32>
    %229 = arith.negf %228 : vector<8x32xf32>
    %230 = math.exp %229 : vector<8x32xf32>
    %cst_78 = arith.constant 1.000000e+00 : f32
    %231 = vector.broadcast %cst_78 : f32 to vector<8x32xf32>
    %232 = arith.addf %231, %230 : vector<8x32xf32>
    %233 = arith.divf %231, %232 : vector<8x32xf32>
    %234 = arith.mulf %225, %204 : vector<8x32xf32>
    %235 = arith.mulf %219, %227 : vector<8x32xf32>
    %236 = arith.addf %234, %235 : vector<8x32xf32>
    %237 = math.tanh %236 : vector<8x32xf32>
    %238 = arith.mulf %233, %237 : vector<8x32xf32>
    %c6_79 = arith.constant 6 : index
    %c0_80 = arith.constant 0 : index
    %c0_81 = arith.constant 0 : index
    %239 = vector.load %arg17[%c6_79, %c0_80, %c0_81] : memref<8x8x32xf32, #tpu.memory_space<vmem>>, vector<1x8x32xf32>
    %240 = vector.shape_cast %239 : vector<1x8x32xf32> to vector<8x32xf32>
    %241 = vector.shape_cast %238 : vector<8x32xf32> to vector<1x8x32xf32>
    tpu.vector_store %arg17[%c6_79, %c0_80, %c0_81], %241 {strides = array<i32>} : memref<8x8x32xf32, #tpu.memory_space<vmem>>, vector<1x8x32xf32>,
    %c7 = arith.constant 7 : index
    %c0_82 = arith.constant 0 : index
    %c0_83 = arith.constant 0 : index
    %242 = vector.load %arg16[%c7, %c0_82, %c0_83] : memref<8x8x128xf32, #tpu.memory_space<vmem>>, vector<1x8x128xf32>
    %243 = vector.shape_cast %242 : vector<1x8x128xf32> to vector<8x128xf32>
    %cst_84 = arith.constant dense<0.000000e+00> : vector<8x128xf32>
    %244 = tpu.matmul %238, %13, %cst_84 {dimension_numbers = #tpu.dot_dimension_numbers<[1], [0], [0], [1], [0, 0, 1, 1], [], []>} : vector<8x32xf32>, vector<32x128xf32>, vector<8x128xf32> -> vector<8x128xf32>
    %245 = arith.addf %243, %244 : vector<8x128xf32>
    %246 = vector.extract_strided_slice %245 {offsets = [0, 0], sizes = [8, 32], strides = [1, 1]} : vector<8x128xf32> to vector<8x32xf32>
    %247 = arith.negf %246 : vector<8x32xf32>
    %248 = math.exp %247 : vector<8x32xf32>
    %cst_85 = arith.constant 1.000000e+00 : f32
    %249 = vector.broadcast %cst_85 : f32 to vector<8x32xf32>
    %250 = arith.addf %249, %248 : vector<8x32xf32>
    %251 = arith.divf %249, %250 : vector<8x32xf32>
    %252 = vector.extract_strided_slice %245 {offsets = [0, 32], sizes = [8, 32], strides = [1, 1]} : vector<8x128xf32> to vector<8x32xf32>
    %253 = arith.negf %252 : vector<8x32xf32>
    %254 = math.exp %253 : vector<8x32xf32>
    %cst_86 = arith.constant 1.000000e+00 : f32
    %255 = vector.broadcast %cst_86 : f32 to vector<8x32xf32>
    %256 = arith.addf %255, %254 : vector<8x32xf32>
    %257 = arith.divf %255, %256 : vector<8x32xf32>
    %258 = vector.extract_strided_slice %245 {offsets = [0, 64], sizes = [8, 32], strides = [1, 1]} : vector<8x128xf32> to vector<8x32xf32>
    %259 = math.tanh %258 : vector<8x32xf32>
    %260 = vector.extract_strided_slice %245 {offsets = [0, 96], sizes = [8, 32], strides = [1, 1]} : vector<8x128xf32> to vector<8x32xf32>
    %261 = arith.negf %260 : vector<8x32xf32>
    %262 = math.exp %261 : vector<8x32xf32>
    %cst_87 = arith.constant 1.000000e+00 : f32
    %263 = vector.broadcast %cst_87 : f32 to vector<8x32xf32>
    %264 = arith.addf %263, %262 : vector<8x32xf32>
    %265 = arith.divf %263, %264 : vector<8x32xf32>
    %266 = arith.mulf %257, %236 : vector<8x32xf32>
    %267 = arith.mulf %251, %259 : vector<8x32xf32>
    %268 = arith.addf %266, %267 : vector<8x32xf32>
    %269 = math.tanh %268 : vector<8x32xf32>
    %270 = arith.mulf %265, %269 : vector<8x32xf32>
    %c7_88 = arith.constant 7 : index
    %c0_89 = arith.constant 0 : index
    %c0_90 = arith.constant 0 : index
    %271 = vector.load %arg17[%c7_88, %c0_89, %c0_90] : memref<8x8x32xf32, #tpu.memory_space<vmem>>, vector<1x8x32xf32>
    %272 = vector.shape_cast %271 : vector<1x8x32xf32> to vector<8x32xf32>
    %273 = vector.shape_cast %270 : vector<8x32xf32> to vector<1x8x32xf32>
    tpu.vector_store %arg17[%c7_88, %c0_89, %c0_90], %273 {strides = array<i32>} : memref<8x8x32xf32, #tpu.memory_space<vmem>>, vector<1x8x32xf32>,
    %c0_91 = arith.constant 0 : index
    %c0_92 = arith.constant 0 : index
    %c0_93 = arith.constant 0 : index
    %274 = vector.load %arg14[%c0_91, %c0_92, %c0_93] : memref<2x8x32xf32, #tpu.memory_space<vmem>>, vector<1x8x32xf32>
    %275 = vector.shape_cast %274 : vector<1x8x32xf32> to vector<8x32xf32>
    %276 = vector.shape_cast %270 : vector<8x32xf32> to vector<1x8x32xf32>
    tpu.vector_store %arg14[%c0_91, %c0_92, %c0_93], %276 {strides = array<i32>} : memref<2x8x32xf32, #tpu.memory_space<vmem>>, vector<1x8x32xf32>,
    %c0_94 = arith.constant 0 : index
    %c0_95 = arith.constant 0 : index
    %c0_96 = arith.constant 0 : index
    %277 = vector.load %arg15[%c0_94, %c0_95, %c0_96] : memref<2x8x32xf32, #tpu.memory_space<vmem>>, vector<1x8x32xf32>
    %278 = vector.shape_cast %277 : vector<1x8x32xf32> to vector<8x32xf32>
    %279 = vector.shape_cast %268 : vector<8x32xf32> to vector<1x8x32xf32>
    tpu.vector_store %arg15[%c0_94, %c0_95, %c0_96], %279 {strides = array<i32>} : memref<2x8x32xf32, #tpu.memory_space<vmem>>, vector<1x8x32xf32>,
    %c0_97 = arith.constant 0 : index
    %c0_98 = arith.constant 0 : index
    %c0_99 = arith.constant 0 : index
    %280 = vector.load %arg17[%c0_97, %c0_98, %c0_99] : memref<8x8x32xf32, #tpu.memory_space<vmem>>, vector<8x8x32xf32>
    %281 = vector.shape_cast %280 : vector<8x8x32xf32> to vector<64x32xf32>
    %c0_100 = arith.constant 0 : index
    %c0_101 = arith.constant 0 : index
    %282 = vector.load %arg6[%c0_100, %c0_101] : memref<32x128xf32, #tpu.memory_space<vmem>>, vector<32x128xf32>
    %cst_102 = arith.constant dense<0.000000e+00> : vector<64x128xf32>
    %283 = tpu.matmul %281, %282, %cst_102 {dimension_numbers = #tpu.dot_dimension_numbers<[1], [0], [0], [1], [0, 0, 1, 1], [], []>} : vector<64x32xf32>, vector<32x128xf32>, vector<64x128xf32> -> vector<64x128xf32>
    %284 = vector.shape_cast %283 : vector<64x128xf32> to vector<8x8x128xf32>
    %c0_103 = arith.constant 0 : index
    %c0_104 = arith.constant 0 : index
    %285 = vector.load %arg8[%c0_103, %c0_104] : memref<1x128xf32, #tpu.memory_space<vmem>>, vector<1x128xf32>
    %286 = vector.shape_cast %285 : vector<1x128xf32> to vector<1x1x128xf32>
    %287 = vector.broadcast %286 : vector<1x1x128xf32> to vector<8x8x128xf32>
    %288 = arith.addf %284, %287 : vector<8x8x128xf32>
    %c0_105 = arith.constant 0 : index
    %c0_106 = arith.constant 0 : index
    %c0_107 = arith.constant 0 : index
    %289 = vector.load %arg16[%c0_105, %c0_106, %c0_107] : memref<8x8x128xf32, #tpu.memory_space<vmem>>, vector<8x8x128xf32>
    tpu.vector_store %arg16[%c0_105, %c0_106, %c0_107], %288 {strides = array<i32>} : memref<8x8x128xf32, #tpu.memory_space<vmem>>, vector<8x8x128xf32>,
    %c0_108 = arith.constant 0 : index
    %c0_109 = arith.constant 0 : index
    %290 = vector.load %arg7[%c0_108, %c0_109] : memref<32x128xf32, #tpu.memory_space<vmem>>, vector<32x128xf32>
    %c1_110 = arith.constant 1 : index
    %c0_111 = arith.constant 0 : index
    %c0_112 = arith.constant 0 : index
    %291 = vector.load %arg14[%c1_110, %c0_111, %c0_112] : memref<2x8x32xf32, #tpu.memory_space<vmem>>, vector<1x8x32xf32>
    %292 = vector.shape_cast %291 : vector<1x8x32xf32> to vector<8x32xf32>
    %c1_113 = arith.constant 1 : index
    %c0_114 = arith.constant 0 : index
    %c0_115 = arith.constant 0 : index
    %293 = vector.load %arg15[%c1_113, %c0_114, %c0_115] : memref<2x8x32xf32, #tpu.memory_space<vmem>>, vector<1x8x32xf32>
    %294 = vector.shape_cast %293 : vector<1x8x32xf32> to vector<8x32xf32>
    %c0_116 = arith.constant 0 : index
    %c0_117 = arith.constant 0 : index
    %c0_118 = arith.constant 0 : index
    %295 = vector.load %arg16[%c0_116, %c0_117, %c0_118] : memref<8x8x128xf32, #tpu.memory_space<vmem>>, vector<1x8x128xf32>
    %296 = vector.shape_cast %295 : vector<1x8x128xf32> to vector<8x128xf32>
    %cst_119 = arith.constant dense<0.000000e+00> : vector<8x128xf32>
    %297 = tpu.matmul %292, %290, %cst_119 {dimension_numbers = #tpu.dot_dimension_numbers<[1], [0], [0], [1], [0, 0, 1, 1], [], []>} : vector<8x32xf32>, vector<32x128xf32>, vector<8x128xf32> -> vector<8x128xf32>
    %298 = arith.addf %296, %297 : vector<8x128xf32>
    %299 = vector.extract_strided_slice %298 {offsets = [0, 0], sizes = [8, 32], strides = [1, 1]} : vector<8x128xf32> to vector<8x32xf32>
    %300 = arith.negf %299 : vector<8x32xf32>
    %301 = math.exp %300 : vector<8x32xf32>
    %cst_120 = arith.constant 1.000000e+00 : f32
    %302 = vector.broadcast %cst_120 : f32 to vector<8x32xf32>
    %303 = arith.addf %302, %301 : vector<8x32xf32>
    %304 = arith.divf %302, %303 : vector<8x32xf32>
    %305 = vector.extract_strided_slice %298 {offsets = [0, 32], sizes = [8, 32], strides = [1, 1]} : vector<8x128xf32> to vector<8x32xf32>
    %306 = arith.negf %305 : vector<8x32xf32>
    %307 = math.exp %306 : vector<8x32xf32>
    %cst_121 = arith.constant 1.000000e+00 : f32
    %308 = vector.broadcast %cst_121 : f32 to vector<8x32xf32>
    %309 = arith.addf %308, %307 : vector<8x32xf32>
    %310 = arith.divf %308, %309 : vector<8x32xf32>
    %311 = vector.extract_strided_slice %298 {offsets = [0, 64], sizes = [8, 32], strides = [1, 1]} : vector<8x128xf32> to vector<8x32xf32>
    %312 = math.tanh %311 : vector<8x32xf32>
    %313 = vector.extract_strided_slice %298 {offsets = [0, 96], sizes = [8, 32], strides = [1, 1]} : vector<8x128xf32> to vector<8x32xf32>
    %314 = arith.negf %313 : vector<8x32xf32>
    %315 = math.exp %314 : vector<8x32xf32>
    %cst_122 = arith.constant 1.000000e+00 : f32
    %316 = vector.broadcast %cst_122 : f32 to vector<8x32xf32>
    %317 = arith.addf %316, %315 : vector<8x32xf32>
    %318 = arith.divf %316, %317 : vector<8x32xf32>
    %319 = arith.mulf %310, %294 : vector<8x32xf32>
    %320 = arith.mulf %304, %312 : vector<8x32xf32>
    %321 = arith.addf %319, %320 : vector<8x32xf32>
    %322 = math.tanh %321 : vector<8x32xf32>
    %323 = arith.mulf %318, %322 : vector<8x32xf32>
    %c0_123 = arith.constant 0 : index
    %c0_124 = arith.constant 0 : index
    %c0_125 = arith.constant 0 : index
    %324 = vector.load %arg11[%c0_123, %c0_124, %c0_125] : memref<8x8x32xf32, #tpu.memory_space<vmem>>, vector<1x8x32xf32>
    %325 = vector.shape_cast %324 : vector<1x8x32xf32> to vector<8x32xf32>
    %326 = vector.shape_cast %323 : vector<8x32xf32> to vector<1x8x32xf32>
    tpu.vector_store %arg11[%c0_123, %c0_124, %c0_125], %326 {strides = array<i32>} : memref<8x8x32xf32, #tpu.memory_space<vmem>>, vector<1x8x32xf32>,
    %c1_126 = arith.constant 1 : index
    %c0_127 = arith.constant 0 : index
    %c0_128 = arith.constant 0 : index
    %327 = vector.load %arg16[%c1_126, %c0_127, %c0_128] : memref<8x8x128xf32, #tpu.memory_space<vmem>>, vector<1x8x128xf32>
    %328 = vector.shape_cast %327 : vector<1x8x128xf32> to vector<8x128xf32>
    %cst_129 = arith.constant dense<0.000000e+00> : vector<8x128xf32>
    %329 = tpu.matmul %323, %290, %cst_129 {dimension_numbers = #tpu.dot_dimension_numbers<[1], [0], [0], [1], [0, 0, 1, 1], [], []>} : vector<8x32xf32>, vector<32x128xf32>, vector<8x128xf32> -> vector<8x128xf32>
    %330 = arith.addf %328, %329 : vector<8x128xf32>
    %331 = vector.extract_strided_slice %330 {offsets = [0, 0], sizes = [8, 32], strides = [1, 1]} : vector<8x128xf32> to vector<8x32xf32>
    %332 = arith.negf %331 : vector<8x32xf32>
    %333 = math.exp %332 : vector<8x32xf32>
    %cst_130 = arith.constant 1.000000e+00 : f32
    %334 = vector.broadcast %cst_130 : f32 to vector<8x32xf32>
    %335 = arith.addf %334, %333 : vector<8x32xf32>
    %336 = arith.divf %334, %335 : vector<8x32xf32>
    %337 = vector.extract_strided_slice %330 {offsets = [0, 32], sizes = [8, 32], strides = [1, 1]} : vector<8x128xf32> to vector<8x32xf32>
    %338 = arith.negf %337 : vector<8x32xf32>
    %339 = math.exp %338 : vector<8x32xf32>
    %cst_131 = arith.constant 1.000000e+00 : f32
    %340 = vector.broadcast %cst_131 : f32 to vector<8x32xf32>
    %341 = arith.addf %340, %339 : vector<8x32xf32>
    %342 = arith.divf %340, %341 : vector<8x32xf32>
    %343 = vector.extract_strided_slice %330 {offsets = [0, 64], sizes = [8, 32], strides = [1, 1]} : vector<8x128xf32> to vector<8x32xf32>
    %344 = math.tanh %343 : vector<8x32xf32>
    %345 = vector.extract_strided_slice %330 {offsets = [0, 96], sizes = [8, 32], strides = [1, 1]} : vector<8x128xf32> to vector<8x32xf32>
    %346 = arith.negf %345 : vector<8x32xf32>
    %347 = math.exp %346 : vector<8x32xf32>
    %cst_132 = arith.constant 1.000000e+00 : f32
    %348 = vector.broadcast %cst_132 : f32 to vector<8x32xf32>
    %349 = arith.addf %348, %347 : vector<8x32xf32>
    %350 = arith.divf %348, %349 : vector<8x32xf32>
    %351 = arith.mulf %342, %321 : vector<8x32xf32>
    %352 = arith.mulf %336, %344 : vector<8x32xf32>
    %353 = arith.addf %351, %352 : vector<8x32xf32>
    %354 = math.tanh %353 : vector<8x32xf32>
    %355 = arith.mulf %350, %354 : vector<8x32xf32>
    %c1_133 = arith.constant 1 : index
    %c0_134 = arith.constant 0 : index
    %c0_135 = arith.constant 0 : index
    %356 = vector.load %arg11[%c1_133, %c0_134, %c0_135] : memref<8x8x32xf32, #tpu.memory_space<vmem>>, vector<1x8x32xf32>
    %357 = vector.shape_cast %356 : vector<1x8x32xf32> to vector<8x32xf32>
    %358 = vector.shape_cast %355 : vector<8x32xf32> to vector<1x8x32xf32>
    tpu.vector_store %arg11[%c1_133, %c0_134, %c0_135], %358 {strides = array<i32>} : memref<8x8x32xf32, #tpu.memory_space<vmem>>, vector<1x8x32xf32>,
    %c2_136 = arith.constant 2 : index
    %c0_137 = arith.constant 0 : index
    %c0_138 = arith.constant 0 : index
    %359 = vector.load %arg16[%c2_136, %c0_137, %c0_138] : memref<8x8x128xf32, #tpu.memory_space<vmem>>, vector<1x8x128xf32>
    %360 = vector.shape_cast %359 : vector<1x8x128xf32> to vector<8x128xf32>
    %cst_139 = arith.constant dense<0.000000e+00> : vector<8x128xf32>
    %361 = tpu.matmul %355, %290, %cst_139 {dimension_numbers = #tpu.dot_dimension_numbers<[1], [0], [0], [1], [0, 0, 1, 1], [], []>} : vector<8x32xf32>, vector<32x128xf32>, vector<8x128xf32> -> vector<8x128xf32>
    %362 = arith.addf %360, %361 : vector<8x128xf32>
    %363 = vector.extract_strided_slice %362 {offsets = [0, 0], sizes = [8, 32], strides = [1, 1]} : vector<8x128xf32> to vector<8x32xf32>
    %364 = arith.negf %363 : vector<8x32xf32>
    %365 = math.exp %364 : vector<8x32xf32>
    %cst_140 = arith.constant 1.000000e+00 : f32
    %366 = vector.broadcast %cst_140 : f32 to vector<8x32xf32>
    %367 = arith.addf %366, %365 : vector<8x32xf32>
    %368 = arith.divf %366, %367 : vector<8x32xf32>
    %369 = vector.extract_strided_slice %362 {offsets = [0, 32], sizes = [8, 32], strides = [1, 1]} : vector<8x128xf32> to vector<8x32xf32>
    %370 = arith.negf %369 : vector<8x32xf32>
    %371 = math.exp %370 : vector<8x32xf32>
    %cst_141 = arith.constant 1.000000e+00 : f32
    %372 = vector.broadcast %cst_141 : f32 to vector<8x32xf32>
    %373 = arith.addf %372, %371 : vector<8x32xf32>
    %374 = arith.divf %372, %373 : vector<8x32xf32>
    %375 = vector.extract_strided_slice %362 {offsets = [0, 64], sizes = [8, 32], strides = [1, 1]} : vector<8x128xf32> to vector<8x32xf32>
    %376 = math.tanh %375 : vector<8x32xf32>
    %377 = vector.extract_strided_slice %362 {offsets = [0, 96], sizes = [8, 32], strides = [1, 1]} : vector<8x128xf32> to vector<8x32xf32>
    %378 = arith.negf %377 : vector<8x32xf32>
    %379 = math.exp %378 : vector<8x32xf32>
    %cst_142 = arith.constant 1.000000e+00 : f32
    %380 = vector.broadcast %cst_142 : f32 to vector<8x32xf32>
    %381 = arith.addf %380, %379 : vector<8x32xf32>
    %382 = arith.divf %380, %381 : vector<8x32xf32>
    %383 = arith.mulf %374, %353 : vector<8x32xf32>
    %384 = arith.mulf %368, %376 : vector<8x32xf32>
    %385 = arith.addf %383, %384 : vector<8x32xf32>
    %386 = math.tanh %385 : vector<8x32xf32>
    %387 = arith.mulf %382, %386 : vector<8x32xf32>
    %c2_143 = arith.constant 2 : index
    %c0_144 = arith.constant 0 : index
    %c0_145 = arith.constant 0 : index
    %388 = vector.load %arg11[%c2_143, %c0_144, %c0_145] : memref<8x8x32xf32, #tpu.memory_space<vmem>>, vector<1x8x32xf32>
    %389 = vector.shape_cast %388 : vector<1x8x32xf32> to vector<8x32xf32>
    %390 = vector.shape_cast %387 : vector<8x32xf32> to vector<1x8x32xf32>
    tpu.vector_store %arg11[%c2_143, %c0_144, %c0_145], %390 {strides = array<i32>} : memref<8x8x32xf32, #tpu.memory_space<vmem>>, vector<1x8x32xf32>,
    %c3_146 = arith.constant 3 : index
    %c0_147 = arith.constant 0 : index
    %c0_148 = arith.constant 0 : index
    %391 = vector.load %arg16[%c3_146, %c0_147, %c0_148] : memref<8x8x128xf32, #tpu.memory_space<vmem>>, vector<1x8x128xf32>
    %392 = vector.shape_cast %391 : vector<1x8x128xf32> to vector<8x128xf32>
    %cst_149 = arith.constant dense<0.000000e+00> : vector<8x128xf32>
    %393 = tpu.matmul %387, %290, %cst_149 {dimension_numbers = #tpu.dot_dimension_numbers<[1], [0], [0], [1], [0, 0, 1, 1], [], []>} : vector<8x32xf32>, vector<32x128xf32>, vector<8x128xf32> -> vector<8x128xf32>
    %394 = arith.addf %392, %393 : vector<8x128xf32>
    %395 = vector.extract_strided_slice %394 {offsets = [0, 0], sizes = [8, 32], strides = [1, 1]} : vector<8x128xf32> to vector<8x32xf32>
    %396 = arith.negf %395 : vector<8x32xf32>
    %397 = math.exp %396 : vector<8x32xf32>
    %cst_150 = arith.constant 1.000000e+00 : f32
    %398 = vector.broadcast %cst_150 : f32 to vector<8x32xf32>
    %399 = arith.addf %398, %397 : vector<8x32xf32>
    %400 = arith.divf %398, %399 : vector<8x32xf32>
    %401 = vector.extract_strided_slice %394 {offsets = [0, 32], sizes = [8, 32], strides = [1, 1]} : vector<8x128xf32> to vector<8x32xf32>
    %402 = arith.negf %401 : vector<8x32xf32>
    %403 = math.exp %402 : vector<8x32xf32>
    %cst_151 = arith.constant 1.000000e+00 : f32
    %404 = vector.broadcast %cst_151 : f32 to vector<8x32xf32>
    %405 = arith.addf %404, %403 : vector<8x32xf32>
    %406 = arith.divf %404, %405 : vector<8x32xf32>
    %407 = vector.extract_strided_slice %394 {offsets = [0, 64], sizes = [8, 32], strides = [1, 1]} : vector<8x128xf32> to vector<8x32xf32>
    %408 = math.tanh %407 : vector<8x32xf32>
    %409 = vector.extract_strided_slice %394 {offsets = [0, 96], sizes = [8, 32], strides = [1, 1]} : vector<8x128xf32> to vector<8x32xf32>
    %410 = arith.negf %409 : vector<8x32xf32>
    %411 = math.exp %410 : vector<8x32xf32>
    %cst_152 = arith.constant 1.000000e+00 : f32
    %412 = vector.broadcast %cst_152 : f32 to vector<8x32xf32>
    %413 = arith.addf %412, %411 : vector<8x32xf32>
    %414 = arith.divf %412, %413 : vector<8x32xf32>
    %415 = arith.mulf %406, %385 : vector<8x32xf32>
    %416 = arith.mulf %400, %408 : vector<8x32xf32>
    %417 = arith.addf %415, %416 : vector<8x32xf32>
    %418 = math.tanh %417 : vector<8x32xf32>
    %419 = arith.mulf %414, %418 : vector<8x32xf32>
    %c3_153 = arith.constant 3 : index
    %c0_154 = arith.constant 0 : index
    %c0_155 = arith.constant 0 : index
    %420 = vector.load %arg11[%c3_153, %c0_154, %c0_155] : memref<8x8x32xf32, #tpu.memory_space<vmem>>, vector<1x8x32xf32>
    %421 = vector.shape_cast %420 : vector<1x8x32xf32> to vector<8x32xf32>
    %422 = vector.shape_cast %419 : vector<8x32xf32> to vector<1x8x32xf32>
    tpu.vector_store %arg11[%c3_153, %c0_154, %c0_155], %422 {strides = array<i32>} : memref<8x8x32xf32, #tpu.memory_space<vmem>>, vector<1x8x32xf32>,
    %c4_156 = arith.constant 4 : index
    %c0_157 = arith.constant 0 : index
    %c0_158 = arith.constant 0 : index
    %423 = vector.load %arg16[%c4_156, %c0_157, %c0_158] : memref<8x8x128xf32, #tpu.memory_space<vmem>>, vector<1x8x128xf32>
    %424 = vector.shape_cast %423 : vector<1x8x128xf32> to vector<8x128xf32>
    %cst_159 = arith.constant dense<0.000000e+00> : vector<8x128xf32>
    %425 = tpu.matmul %419, %290, %cst_159 {dimension_numbers = #tpu.dot_dimension_numbers<[1], [0], [0], [1], [0, 0, 1, 1], [], []>} : vector<8x32xf32>, vector<32x128xf32>, vector<8x128xf32> -> vector<8x128xf32>
    %426 = arith.addf %424, %425 : vector<8x128xf32>
    %427 = vector.extract_strided_slice %426 {offsets = [0, 0], sizes = [8, 32], strides = [1, 1]} : vector<8x128xf32> to vector<8x32xf32>
    %428 = arith.negf %427 : vector<8x32xf32>
    %429 = math.exp %428 : vector<8x32xf32>
    %cst_160 = arith.constant 1.000000e+00 : f32
    %430 = vector.broadcast %cst_160 : f32 to vector<8x32xf32>
    %431 = arith.addf %430, %429 : vector<8x32xf32>
    %432 = arith.divf %430, %431 : vector<8x32xf32>
    %433 = vector.extract_strided_slice %426 {offsets = [0, 32], sizes = [8, 32], strides = [1, 1]} : vector<8x128xf32> to vector<8x32xf32>
    %434 = arith.negf %433 : vector<8x32xf32>
    %435 = math.exp %434 : vector<8x32xf32>
    %cst_161 = arith.constant 1.000000e+00 : f32
    %436 = vector.broadcast %cst_161 : f32 to vector<8x32xf32>
    %437 = arith.addf %436, %435 : vector<8x32xf32>
    %438 = arith.divf %436, %437 : vector<8x32xf32>
    %439 = vector.extract_strided_slice %426 {offsets = [0, 64], sizes = [8, 32], strides = [1, 1]} : vector<8x128xf32> to vector<8x32xf32>
    %440 = math.tanh %439 : vector<8x32xf32>
    %441 = vector.extract_strided_slice %426 {offsets = [0, 96], sizes = [8, 32], strides = [1, 1]} : vector<8x128xf32> to vector<8x32xf32>
    %442 = arith.negf %441 : vector<8x32xf32>
    %443 = math.exp %442 : vector<8x32xf32>
    %cst_162 = arith.constant 1.000000e+00 : f32
    %444 = vector.broadcast %cst_162 : f32 to vector<8x32xf32>
    %445 = arith.addf %444, %443 : vector<8x32xf32>
    %446 = arith.divf %444, %445 : vector<8x32xf32>
    %447 = arith.mulf %438, %417 : vector<8x32xf32>
    %448 = arith.mulf %432, %440 : vector<8x32xf32>
    %449 = arith.addf %447, %448 : vector<8x32xf32>
    %450 = math.tanh %449 : vector<8x32xf32>
    %451 = arith.mulf %446, %450 : vector<8x32xf32>
    %c4_163 = arith.constant 4 : index
    %c0_164 = arith.constant 0 : index
    %c0_165 = arith.constant 0 : index
    %452 = vector.load %arg11[%c4_163, %c0_164, %c0_165] : memref<8x8x32xf32, #tpu.memory_space<vmem>>, vector<1x8x32xf32>
    %453 = vector.shape_cast %452 : vector<1x8x32xf32> to vector<8x32xf32>
    %454 = vector.shape_cast %451 : vector<8x32xf32> to vector<1x8x32xf32>
    tpu.vector_store %arg11[%c4_163, %c0_164, %c0_165], %454 {strides = array<i32>} : memref<8x8x32xf32, #tpu.memory_space<vmem>>, vector<1x8x32xf32>,
    %c5_166 = arith.constant 5 : index
    %c0_167 = arith.constant 0 : index
    %c0_168 = arith.constant 0 : index
    %455 = vector.load %arg16[%c5_166, %c0_167, %c0_168] : memref<8x8x128xf32, #tpu.memory_space<vmem>>, vector<1x8x128xf32>
    %456 = vector.shape_cast %455 : vector<1x8x128xf32> to vector<8x128xf32>
    %cst_169 = arith.constant dense<0.000000e+00> : vector<8x128xf32>
    %457 = tpu.matmul %451, %290, %cst_169 {dimension_numbers = #tpu.dot_dimension_numbers<[1], [0], [0], [1], [0, 0, 1, 1], [], []>} : vector<8x32xf32>, vector<32x128xf32>, vector<8x128xf32> -> vector<8x128xf32>
    %458 = arith.addf %456, %457 : vector<8x128xf32>
    %459 = vector.extract_strided_slice %458 {offsets = [0, 0], sizes = [8, 32], strides = [1, 1]} : vector<8x128xf32> to vector<8x32xf32>
    %460 = arith.negf %459 : vector<8x32xf32>
    %461 = math.exp %460 : vector<8x32xf32>
    %cst_170 = arith.constant 1.000000e+00 : f32
    %462 = vector.broadcast %cst_170 : f32 to vector<8x32xf32>
    %463 = arith.addf %462, %461 : vector<8x32xf32>
    %464 = arith.divf %462, %463 : vector<8x32xf32>
    %465 = vector.extract_strided_slice %458 {offsets = [0, 32], sizes = [8, 32], strides = [1, 1]} : vector<8x128xf32> to vector<8x32xf32>
    %466 = arith.negf %465 : vector<8x32xf32>
    %467 = math.exp %466 : vector<8x32xf32>
    %cst_171 = arith.constant 1.000000e+00 : f32
    %468 = vector.broadcast %cst_171 : f32 to vector<8x32xf32>
    %469 = arith.addf %468, %467 : vector<8x32xf32>
    %470 = arith.divf %468, %469 : vector<8x32xf32>
    %471 = vector.extract_strided_slice %458 {offsets = [0, 64], sizes = [8, 32], strides = [1, 1]} : vector<8x128xf32> to vector<8x32xf32>
    %472 = math.tanh %471 : vector<8x32xf32>
    %473 = vector.extract_strided_slice %458 {offsets = [0, 96], sizes = [8, 32], strides = [1, 1]} : vector<8x128xf32> to vector<8x32xf32>
    %474 = arith.negf %473 : vector<8x32xf32>
    %475 = math.exp %474 : vector<8x32xf32>
    %cst_172 = arith.constant 1.000000e+00 : f32
    %476 = vector.broadcast %cst_172 : f32 to vector<8x32xf32>
    %477 = arith.addf %476, %475 : vector<8x32xf32>
    %478 = arith.divf %476, %477 : vector<8x32xf32>
    %479 = arith.mulf %470, %449 : vector<8x32xf32>
    %480 = arith.mulf %464, %472 : vector<8x32xf32>
    %481 = arith.addf %479, %480 : vector<8x32xf32>
    %482 = math.tanh %481 : vector<8x32xf32>
    %483 = arith.mulf %478, %482 : vector<8x32xf32>
    %c5_173 = arith.constant 5 : index
    %c0_174 = arith.constant 0 : index
    %c0_175 = arith.constant 0 : index
    %484 = vector.load %arg11[%c5_173, %c0_174, %c0_175] : memref<8x8x32xf32, #tpu.memory_space<vmem>>, vector<1x8x32xf32>
    %485 = vector.shape_cast %484 : vector<1x8x32xf32> to vector<8x32xf32>
    %486 = vector.shape_cast %483 : vector<8x32xf32> to vector<1x8x32xf32>
    tpu.vector_store %arg11[%c5_173, %c0_174, %c0_175], %486 {strides = array<i32>} : memref<8x8x32xf32, #tpu.memory_space<vmem>>, vector<1x8x32xf32>,
    %c6_176 = arith.constant 6 : index
    %c0_177 = arith.constant 0 : index
    %c0_178 = arith.constant 0 : index
    %487 = vector.load %arg16[%c6_176, %c0_177, %c0_178] : memref<8x8x128xf32, #tpu.memory_space<vmem>>, vector<1x8x128xf32>
    %488 = vector.shape_cast %487 : vector<1x8x128xf32> to vector<8x128xf32>
    %cst_179 = arith.constant dense<0.000000e+00> : vector<8x128xf32>
    %489 = tpu.matmul %483, %290, %cst_179 {dimension_numbers = #tpu.dot_dimension_numbers<[1], [0], [0], [1], [0, 0, 1, 1], [], []>} : vector<8x32xf32>, vector<32x128xf32>, vector<8x128xf32> -> vector<8x128xf32>
    %490 = arith.addf %488, %489 : vector<8x128xf32>
    %491 = vector.extract_strided_slice %490 {offsets = [0, 0], sizes = [8, 32], strides = [1, 1]} : vector<8x128xf32> to vector<8x32xf32>
    %492 = arith.negf %491 : vector<8x32xf32>
    %493 = math.exp %492 : vector<8x32xf32>
    %cst_180 = arith.constant 1.000000e+00 : f32
    %494 = vector.broadcast %cst_180 : f32 to vector<8x32xf32>
    %495 = arith.addf %494, %493 : vector<8x32xf32>
    %496 = arith.divf %494, %495 : vector<8x32xf32>
    %497 = vector.extract_strided_slice %490 {offsets = [0, 32], sizes = [8, 32], strides = [1, 1]} : vector<8x128xf32> to vector<8x32xf32>
    %498 = arith.negf %497 : vector<8x32xf32>
    %499 = math.exp %498 : vector<8x32xf32>
    %cst_181 = arith.constant 1.000000e+00 : f32
    %500 = vector.broadcast %cst_181 : f32 to vector<8x32xf32>
    %501 = arith.addf %500, %499 : vector<8x32xf32>
    %502 = arith.divf %500, %501 : vector<8x32xf32>
    %503 = vector.extract_strided_slice %490 {offsets = [0, 64], sizes = [8, 32], strides = [1, 1]} : vector<8x128xf32> to vector<8x32xf32>
    %504 = math.tanh %503 : vector<8x32xf32>
    %505 = vector.extract_strided_slice %490 {offsets = [0, 96], sizes = [8, 32], strides = [1, 1]} : vector<8x128xf32> to vector<8x32xf32>
    %506 = arith.negf %505 : vector<8x32xf32>
    %507 = math.exp %506 : vector<8x32xf32>
    %cst_182 = arith.constant 1.000000e+00 : f32
    %508 = vector.broadcast %cst_182 : f32 to vector<8x32xf32>
    %509 = arith.addf %508, %507 : vector<8x32xf32>
    %510 = arith.divf %508, %509 : vector<8x32xf32>
    %511 = arith.mulf %502, %481 : vector<8x32xf32>
    %512 = arith.mulf %496, %504 : vector<8x32xf32>
    %513 = arith.addf %511, %512 : vector<8x32xf32>
    %514 = math.tanh %513 : vector<8x32xf32>
    %515 = arith.mulf %510, %514 : vector<8x32xf32>
    %c6_183 = arith.constant 6 : index
    %c0_184 = arith.constant 0 : index
    %c0_185 = arith.constant 0 : index
    %516 = vector.load %arg11[%c6_183, %c0_184, %c0_185] : memref<8x8x32xf32, #tpu.memory_space<vmem>>, vector<1x8x32xf32>
    %517 = vector.shape_cast %516 : vector<1x8x32xf32> to vector<8x32xf32>
    %518 = vector.shape_cast %515 : vector<8x32xf32> to vector<1x8x32xf32>
    tpu.vector_store %arg11[%c6_183, %c0_184, %c0_185], %518 {strides = array<i32>} : memref<8x8x32xf32, #tpu.memory_space<vmem>>, vector<1x8x32xf32>,
    %c7_186 = arith.constant 7 : index
    %c0_187 = arith.constant 0 : index
    %c0_188 = arith.constant 0 : index
    %519 = vector.load %arg16[%c7_186, %c0_187, %c0_188] : memref<8x8x128xf32, #tpu.memory_space<vmem>>, vector<1x8x128xf32>
    %520 = vector.shape_cast %519 : vector<1x8x128xf32> to vector<8x128xf32>
    %cst_189 = arith.constant dense<0.000000e+00> : vector<8x128xf32>
    %521 = tpu.matmul %515, %290, %cst_189 {dimension_numbers = #tpu.dot_dimension_numbers<[1], [0], [0], [1], [0, 0, 1, 1], [], []>} : vector<8x32xf32>, vector<32x128xf32>, vector<8x128xf32> -> vector<8x128xf32>
    %522 = arith.addf %520, %521 : vector<8x128xf32>
    %523 = vector.extract_strided_slice %522 {offsets = [0, 0], sizes = [8, 32], strides = [1, 1]} : vector<8x128xf32> to vector<8x32xf32>
    %524 = arith.negf %523 : vector<8x32xf32>
    %525 = math.exp %524 : vector<8x32xf32>
    %cst_190 = arith.constant 1.000000e+00 : f32
    %526 = vector.broadcast %cst_190 : f32 to vector<8x32xf32>
    %527 = arith.addf %526, %525 : vector<8x32xf32>
    %528 = arith.divf %526, %527 : vector<8x32xf32>
    %529 = vector.extract_strided_slice %522 {offsets = [0, 32], sizes = [8, 32], strides = [1, 1]} : vector<8x128xf32> to vector<8x32xf32>
    %530 = arith.negf %529 : vector<8x32xf32>
    %531 = math.exp %530 : vector<8x32xf32>
    %cst_191 = arith.constant 1.000000e+00 : f32
    %532 = vector.broadcast %cst_191 : f32 to vector<8x32xf32>
    %533 = arith.addf %532, %531 : vector<8x32xf32>
    %534 = arith.divf %532, %533 : vector<8x32xf32>
    %535 = vector.extract_strided_slice %522 {offsets = [0, 64], sizes = [8, 32], strides = [1, 1]} : vector<8x128xf32> to vector<8x32xf32>
    %536 = math.tanh %535 : vector<8x32xf32>
    %537 = vector.extract_strided_slice %522 {offsets = [0, 96], sizes = [8, 32], strides = [1, 1]} : vector<8x128xf32> to vector<8x32xf32>
    %538 = arith.negf %537 : vector<8x32xf32>
    %539 = math.exp %538 : vector<8x32xf32>
    %cst_192 = arith.constant 1.000000e+00 : f32
    %540 = vector.broadcast %cst_192 : f32 to vector<8x32xf32>
    %541 = arith.addf %540, %539 : vector<8x32xf32>
    %542 = arith.divf %540, %541 : vector<8x32xf32>
    %543 = arith.mulf %534, %513 : vector<8x32xf32>
    %544 = arith.mulf %528, %536 : vector<8x32xf32>
    %545 = arith.addf %543, %544 : vector<8x32xf32>
    %546 = math.tanh %545 : vector<8x32xf32>
    %547 = arith.mulf %542, %546 : vector<8x32xf32>
    %c7_193 = arith.constant 7 : index
    %c0_194 = arith.constant 0 : index
    %c0_195 = arith.constant 0 : index
    %548 = vector.load %arg11[%c7_193, %c0_194, %c0_195] : memref<8x8x32xf32, #tpu.memory_space<vmem>>, vector<1x8x32xf32>
    %549 = vector.shape_cast %548 : vector<1x8x32xf32> to vector<8x32xf32>
    %550 = vector.shape_cast %547 : vector<8x32xf32> to vector<1x8x32xf32>
    tpu.vector_store %arg11[%c7_193, %c0_194, %c0_195], %550 {strides = array<i32>} : memref<8x8x32xf32, #tpu.memory_space<vmem>>, vector<1x8x32xf32>,
    %c1_196 = arith.constant 1 : index
    %c0_197 = arith.constant 0 : index
    %c0_198 = arith.constant 0 : index
    %551 = vector.load %arg14[%c1_196, %c0_197, %c0_198] : memref<2x8x32xf32, #tpu.memory_space<vmem>>, vector<1x8x32xf32>
    %552 = vector.shape_cast %551 : vector<1x8x32xf32> to vector<8x32xf32>
    %553 = vector.shape_cast %547 : vector<8x32xf32> to vector<1x8x32xf32>
    tpu.vector_store %arg14[%c1_196, %c0_197, %c0_198], %553 {strides = array<i32>} : memref<2x8x32xf32, #tpu.memory_space<vmem>>, vector<1x8x32xf32>,
    %c1_199 = arith.constant 1 : index
    %c0_200 = arith.constant 0 : index
    %c0_201 = arith.constant 0 : index
    %554 = vector.load %arg15[%c1_199, %c0_200, %c0_201] : memref<2x8x32xf32, #tpu.memory_space<vmem>>, vector<1x8x32xf32>
    %555 = vector.shape_cast %554 : vector<1x8x32xf32> to vector<8x32xf32>
    %556 = vector.shape_cast %545 : vector<8x32xf32> to vector<1x8x32xf32>
    tpu.vector_store %arg15[%c1_199, %c0_200, %c0_201], %556 {strides = array<i32>} : memref<2x8x32xf32, #tpu.memory_space<vmem>>, vector<1x8x32xf32>,
    %c0_i32_202 = arith.constant 0 : i32
    %557 = arith.cmpi eq, %arg1, %c0_i32_202 : i32
    %558 = arith.extui %557 : i1 to i32
    %c0_i32_203 = arith.constant 0 : i32
    %559 = arith.cmpi ne, %558, %c0_i32_203 : i32
    scf.if %559 {
      %c0_204 = arith.constant 0 : index
      %c0_205 = arith.constant 0 : index
      %c0_206 = arith.constant 0 : index
      %560 = vector.load %arg14[%c0_204, %c0_205, %c0_206] : memref<2x8x32xf32, #tpu.memory_space<vmem>>, vector<2x8x32xf32>
      %c0_207 = arith.constant 0 : index
      %c0_208 = arith.constant 0 : index
      %c0_209 = arith.constant 0 : index
      %561 = vector.load %arg12[%c0_207, %c0_208, %c0_209] : memref<2x8x32xf32, #tpu.memory_space<vmem>>, vector<2x8x32xf32>
      tpu.vector_store %arg12[%c0_207, %c0_208, %c0_209], %560 {strides = array<i32>} : memref<2x8x32xf32, #tpu.memory_space<vmem>>, vector<2x8x32xf32>,
      %c0_210 = arith.constant 0 : index
      %c0_211 = arith.constant 0 : index
      %c0_212 = arith.constant 0 : index
      %562 = vector.load %arg15[%c0_210, %c0_211, %c0_212] : memref<2x8x32xf32, #tpu.memory_space<vmem>>, vector<2x8x32xf32>
      %c0_213 = arith.constant 0 : index
      %c0_214 = arith.constant 0 : index
      %c0_215 = arith.constant 0 : index
      %563 = vector.load %arg13[%c0_213, %c0_214, %c0_215] : memref<2x8x32xf32, #tpu.memory_space<vmem>>, vector<2x8x32xf32>
      tpu.vector_store %arg13[%c0_213, %c0_214, %c0_215], %562 {strides = array<i32>} : memref<2x8x32xf32, #tpu.memory_space<vmem>>, vector<2x8x32xf32>,
    } else {
    }
    return
  }
  func.func @transform_0(%arg0: i32, %arg1: i32) -> (i32, i32, i32) {
    %c0_i32 = arith.constant 0 : i32
    %c0_i32_0 = arith.constant 0 : i32
    return %arg1, %arg0, %c0_i32 : i32, i32, i32
  }
  func.func @transform_1(%arg0: i32, %arg1: i32) -> (i32, i32) {
    %c0_i32 = arith.constant 0 : i32
    %c0_i32_0 = arith.constant 0 : i32
    %c0_i32_1 = arith.constant 0 : i32
    return %c0_i32, %c0_i32_0 : i32, i32
  }
  func.func @transform_2(%arg0: i32, %arg1: i32) -> (i32, i32) {
    %c0_i32 = arith.constant 0 : i32
    %c0_i32_0 = arith.constant 0 : i32
    %c0_i32_1 = arith.constant 0 : i32
    return %c0_i32, %c0_i32_0 : i32, i32
  }
  func.func @transform_3(%arg0: i32, %arg1: i32) -> (i32, i32) {
    %c0_i32 = arith.constant 0 : i32
    %c0_i32_0 = arith.constant 0 : i32
    %c0_i32_1 = arith.constant 0 : i32
    return %c0_i32, %c0_i32_0 : i32, i32
  }
  func.func @transform_4(%arg0: i32, %arg1: i32) -> (i32, i32) {
    %c0_i32 = arith.constant 0 : i32
    %c0_i32_0 = arith.constant 0 : i32
    %c0_i32_1 = arith.constant 0 : i32
    return %c0_i32, %c0_i32_0 : i32, i32
  }
  func.func @transform_5(%arg0: i32, %arg1: i32) -> (i32, i32) {
    %c0_i32 = arith.constant 0 : i32
    %c0_i32_0 = arith.constant 0 : i32
    %c0_i32_1 = arith.constant 0 : i32
    return %c0_i32, %c0_i32_0 : i32, i32
  }
  func.func @transform_6(%arg0: i32, %arg1: i32) -> (i32, i32) {
    %c0_i32 = arith.constant 0 : i32
    %c0_i32_0 = arith.constant 0 : i32
    %c0_i32_1 = arith.constant 0 : i32
    return %c0_i32, %c0_i32_0 : i32, i32
  }
  func.func @transform_7(%arg0: i32, %arg1: i32) -> (i32, i32, i32) {
    %c0_i32 = arith.constant 0 : i32
    %c0_i32_0 = arith.constant 0 : i32
    %c0_i32_1 = arith.constant 0 : i32
    return %c0_i32, %arg0, %c0_i32_0 : i32, i32, i32
  }
  func.func @transform_8(%arg0: i32, %arg1: i32) -> (i32, i32, i32) {
    %c0_i32 = arith.constant 0 : i32
    %c0_i32_0 = arith.constant 0 : i32
    %c0_i32_1 = arith.constant 0 : i32
    return %c0_i32, %arg0, %c0_i32_0 : i32, i32, i32
  }
  func.func @transform_9(%arg0: i32, %arg1: i32) -> (i32, i32, i32) {
    %c0_i32 = arith.constant 0 : i32
    %c0_i32_0 = arith.constant 0 : i32
    return %arg1, %arg0, %c0_i32 : i32, i32, i32
  }
  func.func @transform_10(%arg0: i32, %arg1: i32) -> (i32, i32, i32) {
    %c0_i32 = arith.constant 0 : i32
    %c0_i32_0 = arith.constant 0 : i32
    %c0_i32_1 = arith.constant 0 : i32
    return %c0_i32, %arg0, %c0_i32_0 : i32, i32, i32
  }
  func.func @transform_11(%arg0: i32, %arg1: i32) -> (i32, i32, i32) {
    %c0_i32 = arith.constant 0 : i32
    %c0_i32_0 = arith.constant 0 : i32
    %c0_i32_1 = arith.constant 0 : i32
    return %c0_i32, %arg0, %c0_i32_0 : i32, i32, i32
  }
}

module attributes {stable_mosaic.version = 11 : i64} {
  func.func @_fused_lstm_kernel(%arg0: i32, %arg1: i32, %arg2: memref<8x8x16xf32, #tpu.memory_space<vmem>>, %arg3: memref<16x128xf32, #tpu.memory_space<vmem>>, %arg4: memref<32x128xf32, #tpu.memory_space<vmem>>, %arg5: memref<1x128xf32, #tpu.memory_space<vmem>>, %arg6: memref<32x128xf32, #tpu.memory_space<vmem>>, %arg7: memref<32x128xf32, #tpu.memory_space<vmem>>, %arg8: memref<1x128xf32, #tpu.memory_space<vmem>>, %arg9: memref<2x8x32xf32, #tpu.memory_space<vmem>>, %arg10: memref<2x8x32xf32, #tpu.memory_space<vmem>>, %arg11: memref<8x8x32xf32, #tpu.memory_space<vmem>>, %arg12: memref<2x8x32xf32, #tpu.memory_space<vmem>>, %arg13: memref<2x8x32xf32, #tpu.memory_space<vmem>>, %arg14: memref<2x8x32xf32, #tpu.memory_space<vmem>>, %arg15: memref<2x8x32xf32, #tpu.memory_space<vmem>>, %arg16: memref<8x8x128xf32, #tpu.memory_space<vmem>>, %arg17: memref<8x8x32xf32, #tpu.memory_space<vmem>>) attributes {dimension_semantics = [#tpu.dimension_semantics<parallel>, #tpu.dimension_semantics<arbitrary>], iteration_bounds = array<i64: 1, 1>, scalar_prefetch = 0 : i64, scratch_operands = 4 : i64, tpu.core_type = #tpu.core_type<tc>, window_params = [{transform_indices = @transform_0, window_bounds = array<i64: 8, 8, 16>}, {pipeline_mode = #tpu.pipeline_mode<synchronous>, transform_indices = @transform_1, window_bounds = array<i64: 16, 128>}, {pipeline_mode = #tpu.pipeline_mode<synchronous>, transform_indices = @transform_2, window_bounds = array<i64: 32, 128>}, {pipeline_mode = #tpu.pipeline_mode<synchronous>, transform_indices = @transform_3, window_bounds = array<i64: 1, 128>}, {pipeline_mode = #tpu.pipeline_mode<synchronous>, transform_indices = @transform_4, window_bounds = array<i64: 32, 128>}, {pipeline_mode = #tpu.pipeline_mode<synchronous>, transform_indices = @transform_5, window_bounds = array<i64: 32, 128>}, {pipeline_mode = #tpu.pipeline_mode<synchronous>, transform_indices = @transform_6, window_bounds = array<i64: 1, 128>}, {transform_indices = @transform_7, window_bounds = array<i64: 2, 8, 32>}, {transform_indices = @transform_8, window_bounds = array<i64: 2, 8, 32>}, {transform_indices = @transform_9, window_bounds = array<i64: 8, 8, 32>}, {transform_indices = @transform_10, window_bounds = array<i64: 2, 8, 32>}, {transform_indices = @transform_11, window_bounds = array<i64: 2, 8, 32>}]} {
    %c0_i32 = arith.constant 0 : i32
    %0 = arith.cmpi eq, %arg1, %c0_i32 : i32
    %1 = arith.extui %0 : i1 to i32
    %c0_i32_0 = arith.constant 0 : i32
    %2 = arith.cmpi ne, %1, %c0_i32_0 : i32
    scf.if %2 {
      %c0_204 = arith.constant 0 : index
      %c0_205 = arith.constant 0 : index
      %c0_206 = arith.constant 0 : index
      %560 = vector.load %arg9[%c0_204, %c0_205, %c0_206] : memref<2x8x32xf32, #tpu.memory_space<vmem>>, vector<2x8x32xf32>
      %c0_207 = arith.constant 0 : index
      %c0_208 = arith.constant 0 : index
      %c0_209 = arith.constant 0 : index
      %561 = vector.load %arg14[%c0_207, %c0_208, %c0_209] : memref<2x8x32xf32, #tpu.memory_space<vmem>>, vector<2x8x32xf32>
      tpu.vector_store %arg14[%c0_207, %c0_208, %c0_209], %560 {strides = array<i32>} : memref<2x8x32xf32, #tpu.memory_space<vmem>>, vector<2x8x32xf32>,
      %c0_210 = arith.constant 0 : index
      %c0_211 = arith.constant 0 : index
      %c0_212 = arith.constant 0 : index
      %562 = vector.load %arg10[%c0_210, %c0_211, %c0_212] : memref<2x8x32xf32, #tpu.memory_space<vmem>>, vector<2x8x32xf32>
      %c0_213 = arith.constant 0 : index
      %c0_214 = arith.constant 0 : index
      %c0_215 = arith.constant 0 : index
      %563 = vector.load %arg15[%c0_213, %c0_214, %c0_215] : memref<2x8x32xf32, #tpu.memory_space<vmem>>, vector<2x8x32xf32>
      tpu.vector_store %arg15[%c0_213, %c0_214, %c0_215], %562 {strides = array<i32>} : memref<2x8x32xf32, #tpu.memory_space<vmem>>, vector<2x8x32xf32>,
    } else {
    }
    %c0 = arith.constant 0 : index
    %c0_1 = arith.constant 0 : index
    %c0_2 = arith.constant 0 : index
    %3 = vector.load %arg2[%c0, %c0_1, %c0_2] : memref<8x8x16xf32, #tpu.memory_space<vmem>>, vector<8x8x16xf32>
    %4 = vector.shape_cast %3 : vector<8x8x16xf32> to vector<64x16xf32>
    %c0_3 = arith.constant 0 : index
    %c0_4 = arith.constant 0 : index
    %5 = vector.load %arg3[%c0_3, %c0_4] : memref<16x128xf32, #tpu.memory_space<vmem>>, vector<16x128xf32>
    %cst = arith.constant dense<0.000000e+00> : vector<64x128xf32>
    %6 = tpu.matmul %4, %5, %cst {dimension_numbers = #tpu.dot_dimension_numbers<[1], [0], [0], [1], [0, 0, 1, 1], [], []>} : vector<64x16xf32>, vector<16x128xf32>, vector<64x128xf32> -> vector<64x128xf32>
    %7 = vector.shape_cast %6 : vector<64x128xf32> to vector<8x8x128xf32>
    %c0_5 = arith.constant 0 : index
    %c0_6 = arith.constant 0 : index
    %8 = vector.load %arg5[%c0_5, %c0_6] : memref<1x128xf32, #tpu.memory_space<vmem>>, vector<1x128xf32>
    %9 = vector.shape_cast %8 : vector<1x128xf32> to vector<1x1x128xf32>
    %10 = vector.broadcast %9 : vector<1x1x128xf32> to vector<8x8x128xf32>
    %11 = arith.addf %7, %10 : vector<8x8x128xf32>
    %c0_7 = arith.constant 0 : index
    %c0_8 = arith.constant 0 : index
    %c0_9 = arith.constant 0 : index
    %12 = vector.load %arg16[%c0_7, %c0_8, %c0_9] : memref<8x8x128xf32, #tpu.memory_space<vmem>>, vector<8x8x128xf32>
    tpu.vector_store %arg16[%c0_7, %c0_8, %c0_9], %11 {strides = array<i32>} : memref<8x8x128xf32, #tpu.memory_space<vmem>>, vector<8x8x128xf32>,
    %c0_10 = arith.constant 0 : index
    %c0_11 = arith.constant 0 : index
    %13 = vector.load %arg4[%c0_10, %c0_11] : memref<32x128xf32, #tpu.memory_space<vmem>>, vector<32x128xf32>
    %c0_12 = arith.constant 0 : index
    %c0_13 = arith.constant 0 : index
    %c0_14 = arith.constant 0 : index
    %14 = vector.load %arg14[%c0_12, %c0_13, %c0_14] : memref<2x8x32xf32, #tpu.memory_space<vmem>>, vector<1x8x32xf32>
    %15 = vector.shape_cast %14 : vector<1x8x32xf32> to vector<8x32xf32>
    %c0_15 = arith.constant 0 : index
    %c0_16 = arith.constant 0 : index
    %c0_17 = arith.constant 0 : index
    %16 = vector.load %arg15[%c0_15, %c0_16, %c0_17] : memref<2x8x32xf32, #tpu.memory_space<vmem>>, vector<1x8x32xf32>
    %17 = vector.shape_cast %16 : vector<1x8x32xf32> to vector<8x32xf32>
    %c0_18 = arith.constant 0 : index
    %c0_19 = arith.constant 0 : index
    %c0_20 = arith.constant 0 : index
    %18 = vector.load %arg16[%c0_18, %c0_19, %c0_20] : memref<8x8x128xf32, #tpu.memory_space<vmem>>, vector<1x8x128xf32>
    %19 = vector.shape_cast %18 : vector<1x8x128xf32> to vector<8x128xf32>
    %cst_21 = arith.constant dense<0.000000e+00> : vector<8x128xf32>
    %20 = tpu.matmul %15, %13, %cst_21 {dimension_numbers = #tpu.dot_dimension_numbers<[1], [0], [0], [1], [0, 0, 1, 1], [], []>} : vector<8x32xf32>, vector<32x128xf32>, vector<8x128xf32> -> vector<8x128xf32>
    %21 = arith.addf %19, %20 : vector<8x128xf32>
    %22 = vector.extract_strided_slice %21 {offsets = [0, 0], sizes = [8, 32], strides = [1, 1]} : vector<8x128xf32> to vector<8x32xf32>
    %23 = arith.negf %22 : vector<8x32xf32>
    %24 = math.exp %23 : vector<8x32xf32>
    %cst_22 = arith.constant 1.000000e+00 : f32
    %25 = vector.broadcast %cst_22 : f32 to vector<8x32xf32>
    %26 = arith.addf %25, %24 : vector<8x32xf32>
    %27 = arith.divf %25, %26 : vector<8x32xf32>
    %28 = vector.extract_strided_slice %21 {offsets = [0, 32], sizes = [8, 32], strides = [1, 1]} : vector<8x128xf32> to vector<8x32xf32>
    %29 = arith.negf %28 : vector<8x32xf32>
    %30 = math.exp %29 : vector<8x32xf32>
    %cst_23 = arith.constant 1.000000e+00 : f32
    %31 = vector.broadcast %cst_23 : f32 to vector<8x32xf32>
    %32 = arith.addf %31, %30 : vector<8x32xf32>
    %33 = arith.divf %31, %32 : vector<8x32xf32>
    %34 = vector.extract_strided_slice %21 {offsets = [0, 64], sizes = [8, 32], strides = [1, 1]} : vector<8x128xf32> to vector<8x32xf32>
    %35 = math.tanh %34 : vector<8x32xf32>
    %36 = vector.extract_strided_slice %21 {offsets = [0, 96], sizes = [8, 32], strides = [1, 1]} : vector<8x128xf32> to vector<8x32xf32>
    %37 = arith.negf %36 : vector<8x32xf32>
    %38 = math.exp %37 : vector<8x32xf32>
    %cst_24 = arith.constant 1.000000e+00 : f32
    %39 = vector.broadcast %cst_24 : f32 to vector<8x32xf32>
    %40 = arith.addf %39, %38 : vector<8x32xf32>
    %41 = arith.divf %39, %40 : vector<8x32xf32>
    %42 = arith.mulf %33, %17 : vector<8x32xf32>
    %43 = arith.mulf %27, %35 : vector<8x32xf32>
    %44 = arith.addf %42, %43 : vector<8x32xf32>
    %45 = math.tanh %44 : vector<8x32xf32>
    %46 = arith.mulf %41, %45 : vector<8x32xf32>
    %c0_25 = arith.constant 0 : index
    %c0_26 = arith.constant 0 : index
    %c0_27 = arith.constant 0 : index
    %47 = vector.load %arg17[%c0_25, %c0_26, %c0_27] : memref<8x8x32xf32, #tpu.memory_space<vmem>>, vector<1x8x32xf32>
    %48 = vector.shape_cast %47 : vector<1x8x32xf32> to vector<8x32xf32>
    %49 = vector.shape_cast %46 : vector<8x32xf32> to vector<1x8x32xf32>
    tpu.vector_store %arg17[%c0_25, %c0_26, %c0_27], %49 {strides = array<i32>} : memref<8x8x32xf32, #tpu.memory_space<vmem>>, vector<1x8x32xf32>,
    %c1 = arith.constant 1 : index
    %c0_28 = arith.constant 0 : index
    %c0_29 = arith.constant 0 : index
    %50 = vector.load %arg16[%c1, %c0_28, %c0_29] : memref<8x8x128xf32, #tpu.memory_space<vmem>>, vector<1x8x128xf32>
    %51 = vector.shape_cast %50 : vector<1x8x128xf32> to vector<8x128xf32>
    %cst_30 = arith.constant dense<0.000000e+00> : vector<8x128xf32>
    %52 = tpu.matmul %46, %13, %cst_30 {dimension_numbers = #tpu.dot_dimension_numbers<[1], [0], [0], [1], [0, 0, 1, 1], [], []>} : vector<8x32xf32>, vector<32x128xf32>, vector<8x128xf32> -> vector<8x128xf32>
    %53 = arith.addf %51, %52 : vector<8x128xf32>
    %54 = vector.extract_strided_slice %53 {offsets = [0, 0], sizes = [8, 32], strides = [1, 1]} : vector<8x128xf32> to vector<8x32xf32>
    %55 = arith.negf %54 : vector<8x32xf32>
    %56 = math.exp %55 : vector<8x32xf32>
    %cst_31 = arith.constant 1.000000e+00 : f32
    %57 = vector.broadcast %cst_31 : f32 to vector<8x32xf32>
    %58 = arith.addf %57, %56 : vector<8x32xf32>
    %59 = arith.divf %57, %58 : vector<8x32xf32>
    %60 = vector.extract_strided_slice %53 {offsets = [0, 32], sizes = [8, 32], strides = [1, 1]} : vector<8x128xf32> to vector<8x32xf32>
    %61 = arith.negf %60 : vector<8x32xf32>
    %62 = math.exp %61 : vector<8x32xf32>
    %cst_32 = arith.constant 1.000000e+00 : f32
    %63 = vector.broadcast %cst_32 : f32 to vector<8x32xf32>
    %64 = arith.addf %63, %62 : vector<8x32xf32>
    %65 = arith.divf %63, %64 : vector<8x32xf32>
    %66 = vector.extract_strided_slice %53 {offsets = [0, 64], sizes = [8, 32], strides = [1, 1]} : vector<8x128xf32> to vector<8x32xf32>
    %67 = math.tanh %66 : vector<8x32xf32>
    %68 = vector.extract_strided_slice %53 {offsets = [0, 96], sizes = [8, 32], strides = [1, 1]} : vector<8x128xf32> to vector<8x32xf32>
    %69 = arith.negf %68 : vector<8x32xf32>
    %70 = math.exp %69 : vector<8x32xf32>
    %cst_33 = arith.constant 1.000000e+00 : f32
    %71 = vector.broadcast %cst_33 : f32 to vector<8x32xf32>
    %72 = arith.addf %71, %70 : vector<8x32xf32>
    %73 = arith.divf %71, %72 : vector<8x32xf32>
    %74 = arith.mulf %65, %44 : vector<8x32xf32>
    %75 = arith.mulf %59, %67 : vector<8x32xf32>
    %76 = arith.addf %74, %75 : vector<8x32xf32>
    %77 = math.tanh %76 : vector<8x32xf32>
    %78 = arith.mulf %73, %77 : vector<8x32xf32>
    %c1_34 = arith.constant 1 : index
    %c0_35 = arith.constant 0 : index
    %c0_36 = arith.constant 0 : index
    %79 = vector.load %arg17[%c1_34, %c0_35, %c0_36] : memref<8x8x32xf32, #tpu.memory_space<vmem>>, vector<1x8x32xf32>
    %80 = vector.shape_cast %79 : vector<1x8x32xf32> to vector<8x32xf32>
    %81 = vector.shape_cast %78 : vector<8x32xf32> to vector<1x8x32xf32>
    tpu.vector_store %arg17[%c1_34, %c0_35, %c0_36], %81 {strides = array<i32>} : memref<8x8x32xf32, #tpu.memory_space<vmem>>, vector<1x8x32xf32>,
    %c2 = arith.constant 2 : index
    %c0_37 = arith.constant 0 : index
    %c0_38 = arith.constant 0 : index
    %82 = vector.load %arg16[%c2, %c0_37, %c0_38] : memref<8x8x128xf32, #tpu.memory_space<vmem>>, vector<1x8x128xf32>
    %83 = vector.shape_cast %82 : vector<1x8x128xf32> to vector<8x128xf32>
    %cst_39 = arith.constant dense<0.000000e+00> : vector<8x128xf32>
    %84 = tpu.matmul %78, %13, %cst_39 {dimension_numbers = #tpu.dot_dimension_numbers<[1], [0], [0], [1], [0, 0, 1, 1], [], []>} : vector<8x32xf32>, vector<32x128xf32>, vector<8x128xf32> -> vector<8x128xf32>
    %85 = arith.addf %83, %84 : vector<8x128xf32>
    %86 = vector.extract_strided_slice %85 {offsets = [0, 0], sizes = [8, 32], strides = [1, 1]} : vector<8x128xf32> to vector<8x32xf32>
    %87 = arith.negf %86 : vector<8x32xf32>
    %88 = math.exp %87 : vector<8x32xf32>
    %cst_40 = arith.constant 1.000000e+00 : f32
    %89 = vector.broadcast %cst_40 : f32 to vector<8x32xf32>
    %90 = arith.addf %89, %88 : vector<8x32xf32>
    %91 = arith.divf %89, %90 : vector<8x32xf32>
    %92 = vector.extract_strided_slice %85 {offsets = [0, 32], sizes = [8, 32], strides = [1, 1]} : vector<8x128xf32> to vector<8x32xf32>
    %93 = arith.negf %92 : vector<8x32xf32>
    %94 = math.exp %93 : vector<8x32xf32>
    %cst_41 = arith.constant 1.000000e+00 : f32
    %95 = vector.broadcast %cst_41 : f32 to vector<8x32xf32>
    %96 = arith.addf %95, %94 : vector<8x32xf32>
    %97 = arith.divf %95, %96 : vector<8x32xf32>
    %98 = vector.extract_strided_slice %85 {offsets = [0, 64], sizes = [8, 32], strides = [1, 1]} : vector<8x128xf32> to vector<8x32xf32>
    %99 = math.tanh %98 : vector<8x32xf32>
    %100 = vector.extract_strided_slice %85 {offsets = [0, 96], sizes = [8, 32], strides = [1, 1]} : vector<8x128xf32> to vector<8x32xf32>
    %101 = arith.negf %100 : vector<8x32xf32>
    %102 = math.exp %101 : vector<8x32xf32>
    %cst_42 = arith.constant 1.000000e+00 : f32
    %103 = vector.broadcast %cst_42 : f32 to vector<8x32xf32>
    %104 = arith.addf %103, %102 : vector<8x32xf32>
    %105 = arith.divf %103, %104 : vector<8x32xf32>
    %106 = arith.mulf %97, %76 : vector<8x32xf32>
    %107 = arith.mulf %91, %99 : vector<8x32xf32>
    %108 = arith.addf %106, %107 : vector<8x32xf32>
    %109 = math.tanh %108 : vector<8x32xf32>
    %110 = arith.mulf %105, %109 : vector<8x32xf32>
    %c2_43 = arith.constant 2 : index
    %c0_44 = arith.constant 0 : index
    %c0_45 = arith.constant 0 : index
    %111 = vector.load %arg17[%c2_43, %c0_44, %c0_45] : memref<8x8x32xf32, #tpu.memory_space<vmem>>, vector<1x8x32xf32>
    %112 = vector.shape_cast %111 : vector<1x8x32xf32> to vector<8x32xf32>
    %113 = vector.shape_cast %110 : vector<8x32xf32> to vector<1x8x32xf32>
    tpu.vector_store %arg17[%c2_43, %c0_44, %c0_45], %113 {strides = array<i32>} : memref<8x8x32xf32, #tpu.memory_space<vmem>>, vector<1x8x32xf32>,
    %c3 = arith.constant 3 : index
    %c0_46 = arith.constant 0 : index
    %c0_47 = arith.constant 0 : index
    %114 = vector.load %arg16[%c3, %c0_46, %c0_47] : memref<8x8x128xf32, #tpu.memory_space<vmem>>, vector<1x8x128xf32>
    %115 = vector.shape_cast %114 : vector<1x8x128xf32> to vector<8x128xf32>
    %cst_48 = arith.constant dense<0.000000e+00> : vector<8x128xf32>
    %116 = tpu.matmul %110, %13, %cst_48 {dimension_numbers = #tpu.dot_dimension_numbers<[1], [0], [0], [1], [0, 0, 1, 1], [], []>} : vector<8x32xf32>, vector<32x128xf32>, vector<8x128xf32> -> vector<8x128xf32>
    %117 = arith.addf %115, %116 : vector<8x128xf32>
    %118 = vector.extract_strided_slice %117 {offsets = [0, 0], sizes = [8, 32], strides = [1, 1]} : vector<8x128xf32> to vector<8x32xf32>
    %119 = arith.negf %118 : vector<8x32xf32>
    %120 = math.exp %119 : vector<8x32xf32>
    %cst_49 = arith.constant 1.000000e+00 : f32
    %121 = vector.broadcast %cst_49 : f32 to vector<8x32xf32>
    %122 = arith.addf %121, %120 : vector<8x32xf32>
    %123 = arith.divf %121, %122 : vector<8x32xf32>
    %124 = vector.extract_strided_slice %117 {offsets = [0, 32], sizes = [8, 32], strides = [1, 1]} : vector<8x128xf32> to vector<8x32xf32>
    %125 = arith.negf %124 : vector<8x32xf32>
    %126 = math.exp %125 : vector<8x32xf32>
    %cst_50 = arith.constant 1.000000e+00 : f32
    %127 = vector.broadcast %cst_50 : f32 to vector<8x32xf32>
    %128 = arith.addf %127, %126 : vector<8x32xf32>
    %129 = arith.divf %127, %128 : vector<8x32xf32>
    %130 = vector.extract_strided_slice %117 {offsets = [0, 64], sizes = [8, 32], strides = [1, 1]} : vector<8x128xf32> to vector<8x32xf32>
    %131 = math.tanh %130 : vector<8x32xf32>
    %132 = vector.extract_strided_slice %117 {offsets = [0, 96], sizes = [8, 32], strides = [1, 1]} : vector<8x128xf32> to vector<8x32xf32>
    %133 = arith.negf %132 : vector<8x32xf32>
    %134 = math.exp %133 : vector<8x32xf32>
    %cst_51 = arith.constant 1.000000e+00 : f32
    %135 = vector.broadcast %cst_51 : f32 to vector<8x32xf32>
    %136 = arith.addf %135, %134 : vector<8x32xf32>
    %137 = arith.divf %135, %136 : vector<8x32xf32>
    %138 = arith.mulf %129, %108 : vector<8x32xf32>
    %139 = arith.mulf %123, %131 : vector<8x32xf32>
    %140 = arith.addf %138, %139 : vector<8x32xf32>
    %141 = math.tanh %140 : vector<8x32xf32>
    %142 = arith.mulf %137, %141 : vector<8x32xf32>
    %c3_52 = arith.constant 3 : index
    %c0_53 = arith.constant 0 : index
    %c0_54 = arith.constant 0 : index
    %143 = vector.load %arg17[%c3_52, %c0_53, %c0_54] : memref<8x8x32xf32, #tpu.memory_space<vmem>>, vector<1x8x32xf32>
    %144 = vector.shape_cast %143 : vector<1x8x32xf32> to vector<8x32xf32>
    %145 = vector.shape_cast %142 : vector<8x32xf32> to vector<1x8x32xf32>
    tpu.vector_store %arg17[%c3_52, %c0_53, %c0_54], %145 {strides = array<i32>} : memref<8x8x32xf32, #tpu.memory_space<vmem>>, vector<1x8x32xf32>,
    %c4 = arith.constant 4 : index
    %c0_55 = arith.constant 0 : index
    %c0_56 = arith.constant 0 : index
    %146 = vector.load %arg16[%c4, %c0_55, %c0_56] : memref<8x8x128xf32, #tpu.memory_space<vmem>>, vector<1x8x128xf32>
    %147 = vector.shape_cast %146 : vector<1x8x128xf32> to vector<8x128xf32>
    %cst_57 = arith.constant dense<0.000000e+00> : vector<8x128xf32>
    %148 = tpu.matmul %142, %13, %cst_57 {dimension_numbers = #tpu.dot_dimension_numbers<[1], [0], [0], [1], [0, 0, 1, 1], [], []>} : vector<8x32xf32>, vector<32x128xf32>, vector<8x128xf32> -> vector<8x128xf32>
    %149 = arith.addf %147, %148 : vector<8x128xf32>
    %150 = vector.extract_strided_slice %149 {offsets = [0, 0], sizes = [8, 32], strides = [1, 1]} : vector<8x128xf32> to vector<8x32xf32>
    %151 = arith.negf %150 : vector<8x32xf32>
    %152 = math.exp %151 : vector<8x32xf32>
    %cst_58 = arith.constant 1.000000e+00 : f32
    %153 = vector.broadcast %cst_58 : f32 to vector<8x32xf32>
    %154 = arith.addf %153, %152 : vector<8x32xf32>
    %155 = arith.divf %153, %154 : vector<8x32xf32>
    %156 = vector.extract_strided_slice %149 {offsets = [0, 32], sizes = [8, 32], strides = [1, 1]} : vector<8x128xf32> to vector<8x32xf32>
    %157 = arith.negf %156 : vector<8x32xf32>
    %158 = math.exp %157 : vector<8x32xf32>
    %cst_59 = arith.constant 1.000000e+00 : f32
    %159 = vector.broadcast %cst_59 : f32 to vector<8x32xf32>
    %160 = arith.addf %159, %158 : vector<8x32xf32>
    %161 = arith.divf %159, %160 : vector<8x32xf32>
    %162 = vector.extract_strided_slice %149 {offsets = [0, 64], sizes = [8, 32], strides = [1, 1]} : vector<8x128xf32> to vector<8x32xf32>
    %163 = math.tanh %162 : vector<8x32xf32>
    %164 = vector.extract_strided_slice %149 {offsets = [0, 96], sizes = [8, 32], strides = [1, 1]} : vector<8x128xf32> to vector<8x32xf32>
    %165 = arith.negf %164 : vector<8x32xf32>
    %166 = math.exp %165 : vector<8x32xf32>
    %cst_60 = arith.constant 1.000000e+00 : f32
    %167 = vector.broadcast %cst_60 : f32 to vector<8x32xf32>
    %168 = arith.addf %167, %166 : vector<8x32xf32>
    %169 = arith.divf %167, %168 : vector<8x32xf32>
    %170 = arith.mulf %161, %140 : vector<8x32xf32>
    %171 = arith.mulf %155, %163 : vector<8x32xf32>
    %172 = arith.addf %170, %171 : vector<8x32xf32>
    %173 = math.tanh %172 : vector<8x32xf32>
    %174 = arith.mulf %169, %173 : vector<8x32xf32>
    %c4_61 = arith.constant 4 : index
    %c0_62 = arith.constant 0 : index
    %c0_63 = arith.constant 0 : index
    %175 = vector.load %arg17[%c4_61, %c0_62, %c0_63] : memref<8x8x32xf32, #tpu.memory_space<vmem>>, vector<1x8x32xf32>
    %176 = vector.shape_cast %175 : vector<1x8x32xf32> to vector<8x32xf32>
    %177 = vector.shape_cast %174 : vector<8x32xf32> to vector<1x8x32xf32>
    tpu.vector_store %arg17[%c4_61, %c0_62, %c0_63], %177 {strides = array<i32>} : memref<8x8x32xf32, #tpu.memory_space<vmem>>, vector<1x8x32xf32>,
    %c5 = arith.constant 5 : index
    %c0_64 = arith.constant 0 : index
    %c0_65 = arith.constant 0 : index
    %178 = vector.load %arg16[%c5, %c0_64, %c0_65] : memref<8x8x128xf32, #tpu.memory_space<vmem>>, vector<1x8x128xf32>
    %179 = vector.shape_cast %178 : vector<1x8x128xf32> to vector<8x128xf32>
    %cst_66 = arith.constant dense<0.000000e+00> : vector<8x128xf32>
    %180 = tpu.matmul %174, %13, %cst_66 {dimension_numbers = #tpu.dot_dimension_numbers<[1], [0], [0], [1], [0, 0, 1, 1], [], []>} : vector<8x32xf32>, vector<32x128xf32>, vector<8x128xf32> -> vector<8x128xf32>
    %181 = arith.addf %179, %180 : vector<8x128xf32>
    %182 = vector.extract_strided_slice %181 {offsets = [0, 0], sizes = [8, 32], strides = [1, 1]} : vector<8x128xf32> to vector<8x32xf32>
    %183 = arith.negf %182 : vector<8x32xf32>
    %184 = math.exp %183 : vector<8x32xf32>
    %cst_67 = arith.constant 1.000000e+00 : f32
    %185 = vector.broadcast %cst_67 : f32 to vector<8x32xf32>
    %186 = arith.addf %185, %184 : vector<8x32xf32>
    %187 = arith.divf %185, %186 : vector<8x32xf32>
    %188 = vector.extract_strided_slice %181 {offsets = [0, 32], sizes = [8, 32], strides = [1, 1]} : vector<8x128xf32> to vector<8x32xf32>
    %189 = arith.negf %188 : vector<8x32xf32>
    %190 = math.exp %189 : vector<8x32xf32>
    %cst_68 = arith.constant 1.000000e+00 : f32
    %191 = vector.broadcast %cst_68 : f32 to vector<8x32xf32>
    %192 = arith.addf %191, %190 : vector<8x32xf32>
    %193 = arith.divf %191, %192 : vector<8x32xf32>
    %194 = vector.extract_strided_slice %181 {offsets = [0, 64], sizes = [8, 32], strides = [1, 1]} : vector<8x128xf32> to vector<8x32xf32>
    %195 = math.tanh %194 : vector<8x32xf32>
    %196 = vector.extract_strided_slice %181 {offsets = [0, 96], sizes = [8, 32], strides = [1, 1]} : vector<8x128xf32> to vector<8x32xf32>
    %197 = arith.negf %196 : vector<8x32xf32>
    %198 = math.exp %197 : vector<8x32xf32>
    %cst_69 = arith.constant 1.000000e+00 : f32
    %199 = vector.broadcast %cst_69 : f32 to vector<8x32xf32>
    %200 = arith.addf %199, %198 : vector<8x32xf32>
    %201 = arith.divf %199, %200 : vector<8x32xf32>
    %202 = arith.mulf %193, %172 : vector<8x32xf32>
    %203 = arith.mulf %187, %195 : vector<8x32xf32>
    %204 = arith.addf %202, %203 : vector<8x32xf32>
    %205 = math.tanh %204 : vector<8x32xf32>
    %206 = arith.mulf %201, %205 : vector<8x32xf32>
    %c5_70 = arith.constant 5 : index
    %c0_71 = arith.constant 0 : index
    %c0_72 = arith.constant 0 : index
    %207 = vector.load %arg17[%c5_70, %c0_71, %c0_72] : memref<8x8x32xf32, #tpu.memory_space<vmem>>, vector<1x8x32xf32>
    %208 = vector.shape_cast %207 : vector<1x8x32xf32> to vector<8x32xf32>
    %209 = vector.shape_cast %206 : vector<8x32xf32> to vector<1x8x32xf32>
    tpu.vector_store %arg17[%c5_70, %c0_71, %c0_72], %209 {strides = array<i32>} : memref<8x8x32xf32, #tpu.memory_space<vmem>>, vector<1x8x32xf32>,
    %c6 = arith.constant 6 : index
    %c0_73 = arith.constant 0 : index
    %c0_74 = arith.constant 0 : index
    %210 = vector.load %arg16[%c6, %c0_73, %c0_74] : memref<8x8x128xf32, #tpu.memory_space<vmem>>, vector<1x8x128xf32>
    %211 = vector.shape_cast %210 : vector<1x8x128xf32> to vector<8x128xf32>
    %cst_75 = arith.constant dense<0.000000e+00> : vector<8x128xf32>
    %212 = tpu.matmul %206, %13, %cst_75 {dimension_numbers = #tpu.dot_dimension_numbers<[1], [0], [0], [1], [0, 0, 1, 1], [], []>} : vector<8x32xf32>, vector<32x128xf32>, vector<8x128xf32> -> vector<8x128xf32>
    %213 = arith.addf %211, %212 : vector<8x128xf32>
    %214 = vector.extract_strided_slice %213 {offsets = [0, 0], sizes = [8, 32], strides = [1, 1]} : vector<8x128xf32> to vector<8x32xf32>
    %215 = arith.negf %214 : vector<8x32xf32>
    %216 = math.exp %215 : vector<8x32xf32>
    %cst_76 = arith.constant 1.000000e+00 : f32
    %217 = vector.broadcast %cst_76 : f32 to vector<8x32xf32>
    %218 = arith.addf %217, %216 : vector<8x32xf32>
    %219 = arith.divf %217, %218 : vector<8x32xf32>
    %220 = vector.extract_strided_slice %213 {offsets = [0, 32], sizes = [8, 32], strides = [1, 1]} : vector<8x128xf32> to vector<8x32xf32>
    %221 = arith.negf %220 : vector<8x32xf32>
    %222 = math.exp %221 : vector<8x32xf32>
    %cst_77 = arith.constant 1.000000e+00 : f32
    %223 = vector.broadcast %cst_77 : f32 to vector<8x32xf32>
    %224 = arith.addf %223, %222 : vector<8x32xf32>
    %225 = arith.divf %223, %224 : vector<8x32xf32>
    %226 = vector.extract_strided_slice %213 {offsets = [0, 64], sizes = [8, 32], strides = [1, 1]} : vector<8x128xf32> to vector<8x32xf32>
    %227 = math.tanh %226 : vector<8x32xf32>
    %228 = vector.extract_strided_slice %213 {offsets = [0, 96], sizes = [8, 32], strides = [1, 1]} : vector<8x128xf32> to vector<8x32xf32>
    %229 = arith.negf %228 : vector<8x32xf32>
    %230 = math.exp %229 : vector<8x32xf32>
    %cst_78 = arith.constant 1.000000e+00 : f32
    %231 = vector.broadcast %cst_78 : f32 to vector<8x32xf32>
    %232 = arith.addf %231, %230 : vector<8x32xf32>
    %233 = arith.divf %231, %232 : vector<8x32xf32>
    %234 = arith.mulf %225, %204 : vector<8x32xf32>
    %235 = arith.mulf %219, %227 : vector<8x32xf32>
    %236 = arith.addf %234, %235 : vector<8x32xf32>
    %237 = math.tanh %236 : vector<8x32xf32>
    %238 = arith.mulf %233, %237 : vector<8x32xf32>
    %c6_79 = arith.constant 6 : index
    %c0_80 = arith.constant 0 : index
    %c0_81 = arith.constant 0 : index
    %239 = vector.load %arg17[%c6_79, %c0_80, %c0_81] : memref<8x8x32xf32, #tpu.memory_space<vmem>>, vector<1x8x32xf32>
    %240 = vector.shape_cast %239 : vector<1x8x32xf32> to vector<8x32xf32>
    %241 = vector.shape_cast %238 : vector<8x32xf32> to vector<1x8x32xf32>
    tpu.vector_store %arg17[%c6_79, %c0_80, %c0_81], %241 {strides = array<i32>} : memref<8x8x32xf32, #tpu.memory_space<vmem>>, vector<1x8x32xf32>,
    %c7 = arith.constant 7 : index
    %c0_82 = arith.constant 0 : index
    %c0_83 = arith.constant 0 : index
    %242 = vector.load %arg16[%c7, %c0_82, %c0_83] : memref<8x8x128xf32, #tpu.memory_space<vmem>>, vector<1x8x128xf32>
    %243 = vector.shape_cast %242 : vector<1x8x128xf32> to vector<8x128xf32>
    %cst_84 = arith.constant dense<0.000000e+00> : vector<8x128xf32>
    %244 = tpu.matmul %238, %13, %cst_84 {dimension_numbers = #tpu.dot_dimension_numbers<[1], [0], [0], [1], [0, 0, 1, 1], [], []>} : vector<8x32xf32>, vector<32x128xf32>, vector<8x128xf32> -> vector<8x128xf32>
    %245 = arith.addf %243, %244 : vector<8x128xf32>
    %246 = vector.extract_strided_slice %245 {offsets = [0, 0], sizes = [8, 32], strides = [1, 1]} : vector<8x128xf32> to vector<8x32xf32>
    %247 = arith.negf %246 : vector<8x32xf32>
    %248 = math.exp %247 : vector<8x32xf32>
    %cst_85 = arith.constant 1.000000e+00 : f32
    %249 = vector.broadcast %cst_85 : f32 to vector<8x32xf32>
    %250 = arith.addf %249, %248 : vector<8x32xf32>
    %251 = arith.divf %249, %250 : vector<8x32xf32>
    %252 = vector.extract_strided_slice %245 {offsets = [0, 32], sizes = [8, 32], strides = [1, 1]} : vector<8x128xf32> to vector<8x32xf32>
    %253 = arith.negf %252 : vector<8x32xf32>
    %254 = math.exp %253 : vector<8x32xf32>
    %cst_86 = arith.constant 1.000000e+00 : f32
    %255 = vector.broadcast %cst_86 : f32 to vector<8x32xf32>
    %256 = arith.addf %255, %254 : vector<8x32xf32>
    %257 = arith.divf %255, %256 : vector<8x32xf32>
    %258 = vector.extract_strided_slice %245 {offsets = [0, 64], sizes = [8, 32], strides = [1, 1]} : vector<8x128xf32> to vector<8x32xf32>
    %259 = math.tanh %258 : vector<8x32xf32>
    %260 = vector.extract_strided_slice %245 {offsets = [0, 96], sizes = [8, 32], strides = [1, 1]} : vector<8x128xf32> to vector<8x32xf32>
    %261 = arith.negf %260 : vector<8x32xf32>
    %262 = math.exp %261 : vector<8x32xf32>
    %cst_87 = arith.constant 1.000000e+00 : f32
    %263 = vector.broadcast %cst_87 : f32 to vector<8x32xf32>
    %264 = arith.addf %263, %262 : vector<8x32xf32>
    %265 = arith.divf %263, %264 : vector<8x32xf32>
    %266 = arith.mulf %257, %236 : vector<8x32xf32>
    %267 = arith.mulf %251, %259 : vector<8x32xf32>
    %268 = arith.addf %266, %267 : vector<8x32xf32>
    %269 = math.tanh %268 : vector<8x32xf32>
    %270 = arith.mulf %265, %269 : vector<8x32xf32>
    %c7_88 = arith.constant 7 : index
    %c0_89 = arith.constant 0 : index
    %c0_90 = arith.constant 0 : index
    %271 = vector.load %arg17[%c7_88, %c0_89, %c0_90] : memref<8x8x32xf32, #tpu.memory_space<vmem>>, vector<1x8x32xf32>
    %272 = vector.shape_cast %271 : vector<1x8x32xf32> to vector<8x32xf32>
    %273 = vector.shape_cast %270 : vector<8x32xf32> to vector<1x8x32xf32>
    tpu.vector_store %arg17[%c7_88, %c0_89, %c0_90], %273 {strides = array<i32>} : memref<8x8x32xf32, #tpu.memory_space<vmem>>, vector<1x8x32xf32>,
    %c0_91 = arith.constant 0 : index
    %c0_92 = arith.constant 0 : index
    %c0_93 = arith.constant 0 : index
    %274 = vector.load %arg14[%c0_91, %c0_92, %c0_93] : memref<2x8x32xf32, #tpu.memory_space<vmem>>, vector<1x8x32xf32>
    %275 = vector.shape_cast %274 : vector<1x8x32xf32> to vector<8x32xf32>
    %276 = vector.shape_cast %270 : vector<8x32xf32> to vector<1x8x32xf32>
    tpu.vector_store %arg14[%c0_91, %c0_92, %c0_93], %276 {strides = array<i32>} : memref<2x8x32xf32, #tpu.memory_space<vmem>>, vector<1x8x32xf32>,
    %c0_94 = arith.constant 0 : index
    %c0_95 = arith.constant 0 : index
    %c0_96 = arith.constant 0 : index
    %277 = vector.load %arg15[%c0_94, %c0_95, %c0_96] : memref<2x8x32xf32, #tpu.memory_space<vmem>>, vector<1x8x32xf32>
    %278 = vector.shape_cast %277 : vector<1x8x32xf32> to vector<8x32xf32>
    %279 = vector.shape_cast %268 : vector<8x32xf32> to vector<1x8x32xf32>
    tpu.vector_store %arg15[%c0_94, %c0_95, %c0_96], %279 {strides = array<i32>} : memref<2x8x32xf32, #tpu.memory_space<vmem>>, vector<1x8x32xf32>,
    %c0_97 = arith.constant 0 : index
    %c0_98 = arith.constant 0 : index
    %c0_99 = arith.constant 0 : index
    %280 = vector.load %arg17[%c0_97, %c0_98, %c0_99] : memref<8x8x32xf32, #tpu.memory_space<vmem>>, vector<8x8x32xf32>
    %281 = vector.shape_cast %280 : vector<8x8x32xf32> to vector<64x32xf32>
    %c0_100 = arith.constant 0 : index
    %c0_101 = arith.constant 0 : index
    %282 = vector.load %arg6[%c0_100, %c0_101] : memref<32x128xf32, #tpu.memory_space<vmem>>, vector<32x128xf32>
    %cst_102 = arith.constant dense<0.000000e+00> : vector<64x128xf32>
    %283 = tpu.matmul %281, %282, %cst_102 {dimension_numbers = #tpu.dot_dimension_numbers<[1], [0], [0], [1], [0, 0, 1, 1], [], []>} : vector<64x32xf32>, vector<32x128xf32>, vector<64x128xf32> -> vector<64x128xf32>
    %284 = vector.shape_cast %283 : vector<64x128xf32> to vector<8x8x128xf32>
    %c0_103 = arith.constant 0 : index
    %c0_104 = arith.constant 0 : index
    %285 = vector.load %arg8[%c0_103, %c0_104] : memref<1x128xf32, #tpu.memory_space<vmem>>, vector<1x128xf32>
    %286 = vector.shape_cast %285 : vector<1x128xf32> to vector<1x1x128xf32>
    %287 = vector.broadcast %286 : vector<1x1x128xf32> to vector<8x8x128xf32>
    %288 = arith.addf %284, %287 : vector<8x8x128xf32>
    %c0_105 = arith.constant 0 : index
    %c0_106 = arith.constant 0 : index
    %c0_107 = arith.constant 0 : index
    %289 = vector.load %arg16[%c0_105, %c0_106, %c0_107] : memref<8x8x128xf32, #tpu.memory_space<vmem>>, vector<8x8x128xf32>
    tpu.vector_store %arg16[%c0_105, %c0_106, %c0_107], %288 {strides = array<i32>} : memref<8x8x128xf32, #tpu.memory_space<vmem>>, vector<8x8x128xf32>,
    %c0_108 = arith.constant 0 : index
    %c0_109 = arith.constant 0 : index
    %290 = vector.load %arg7[%c0_108, %c0_109] : memref<32x128xf32, #tpu.memory_space<vmem>>, vector<32x128xf32>
    %c1_110 = arith.constant 1 : index
    %c0_111 = arith.constant 0 : index
    %c0_112 = arith.constant 0 : index
    %291 = vector.load %arg14[%c1_110, %c0_111, %c0_112] : memref<2x8x32xf32, #tpu.memory_space<vmem>>, vector<1x8x32xf32>
    %292 = vector.shape_cast %291 : vector<1x8x32xf32> to vector<8x32xf32>
    %c1_113 = arith.constant 1 : index
    %c0_114 = arith.constant 0 : index
    %c0_115 = arith.constant 0 : index
    %293 = vector.load %arg15[%c1_113, %c0_114, %c0_115] : memref<2x8x32xf32, #tpu.memory_space<vmem>>, vector<1x8x32xf32>
    %294 = vector.shape_cast %293 : vector<1x8x32xf32> to vector<8x32xf32>
    %c0_116 = arith.constant 0 : index
    %c0_117 = arith.constant 0 : index
    %c0_118 = arith.constant 0 : index
    %295 = vector.load %arg16[%c0_116, %c0_117, %c0_118] : memref<8x8x128xf32, #tpu.memory_space<vmem>>, vector<1x8x128xf32>
    %296 = vector.shape_cast %295 : vector<1x8x128xf32> to vector<8x128xf32>
    %cst_119 = arith.constant dense<0.000000e+00> : vector<8x128xf32>
    %297 = tpu.matmul %292, %290, %cst_119 {dimension_numbers = #tpu.dot_dimension_numbers<[1], [0], [0], [1], [0, 0, 1, 1], [], []>} : vector<8x32xf32>, vector<32x128xf32>, vector<8x128xf32> -> vector<8x128xf32>
    %298 = arith.addf %296, %297 : vector<8x128xf32>
    %299 = vector.extract_strided_slice %298 {offsets = [0, 0], sizes = [8, 32], strides = [1, 1]} : vector<8x128xf32> to vector<8x32xf32>
    %300 = arith.negf %299 : vector<8x32xf32>
    %301 = math.exp %300 : vector<8x32xf32>
    %cst_120 = arith.constant 1.000000e+00 : f32
    %302 = vector.broadcast %cst_120 : f32 to vector<8x32xf32>
    %303 = arith.addf %302, %301 : vector<8x32xf32>
    %304 = arith.divf %302, %303 : vector<8x32xf32>
    %305 = vector.extract_strided_slice %298 {offsets = [0, 32], sizes = [8, 32], strides = [1, 1]} : vector<8x128xf32> to vector<8x32xf32>
    %306 = arith.negf %305 : vector<8x32xf32>
    %307 = math.exp %306 : vector<8x32xf32>
    %cst_121 = arith.constant 1.000000e+00 : f32
    %308 = vector.broadcast %cst_121 : f32 to vector<8x32xf32>
    %309 = arith.addf %308, %307 : vector<8x32xf32>
    %310 = arith.divf %308, %309 : vector<8x32xf32>
    %311 = vector.extract_strided_slice %298 {offsets = [0, 64], sizes = [8, 32], strides = [1, 1]} : vector<8x128xf32> to vector<8x32xf32>
    %312 = math.tanh %311 : vector<8x32xf32>
    %313 = vector.extract_strided_slice %298 {offsets = [0, 96], sizes = [8, 32], strides = [1, 1]} : vector<8x128xf32> to vector<8x32xf32>
    %314 = arith.negf %313 : vector<8x32xf32>
    %315 = math.exp %314 : vector<8x32xf32>
    %cst_122 = arith.constant 1.000000e+00 : f32
    %316 = vector.broadcast %cst_122 : f32 to vector<8x32xf32>
    %317 = arith.addf %316, %315 : vector<8x32xf32>
    %318 = arith.divf %316, %317 : vector<8x32xf32>
    %319 = arith.mulf %310, %294 : vector<8x32xf32>
    %320 = arith.mulf %304, %312 : vector<8x32xf32>
    %321 = arith.addf %319, %320 : vector<8x32xf32>
    %322 = math.tanh %321 : vector<8x32xf32>
    %323 = arith.mulf %318, %322 : vector<8x32xf32>
    %c0_123 = arith.constant 0 : index
    %c0_124 = arith.constant 0 : index
    %c0_125 = arith.constant 0 : index
    %324 = vector.load %arg11[%c0_123, %c0_124, %c0_125] : memref<8x8x32xf32, #tpu.memory_space<vmem>>, vector<1x8x32xf32>
    %325 = vector.shape_cast %324 : vector<1x8x32xf32> to vector<8x32xf32>
    %326 = vector.shape_cast %323 : vector<8x32xf32> to vector<1x8x32xf32>
    tpu.vector_store %arg11[%c0_123, %c0_124, %c0_125], %326 {strides = array<i32>} : memref<8x8x32xf32, #tpu.memory_space<vmem>>, vector<1x8x32xf32>,
    %c1_126 = arith.constant 1 : index
    %c0_127 = arith.constant 0 : index
    %c0_128 = arith.constant 0 : index
    %327 = vector.load %arg16[%c1_126, %c0_127, %c0_128] : memref<8x8x128xf32, #tpu.memory_space<vmem>>, vector<1x8x128xf32>
    %328 = vector.shape_cast %327 : vector<1x8x128xf32> to vector<8x128xf32>
    %cst_129 = arith.constant dense<0.000000e+00> : vector<8x128xf32>
    %329 = tpu.matmul %323, %290, %cst_129 {dimension_numbers = #tpu.dot_dimension_numbers<[1], [0], [0], [1], [0, 0, 1, 1], [], []>} : vector<8x32xf32>, vector<32x128xf32>, vector<8x128xf32> -> vector<8x128xf32>
    %330 = arith.addf %328, %329 : vector<8x128xf32>
    %331 = vector.extract_strided_slice %330 {offsets = [0, 0], sizes = [8, 32], strides = [1, 1]} : vector<8x128xf32> to vector<8x32xf32>
    %332 = arith.negf %331 : vector<8x32xf32>
    %333 = math.exp %332 : vector<8x32xf32>
    %cst_130 = arith.constant 1.000000e+00 : f32
    %334 = vector.broadcast %cst_130 : f32 to vector<8x32xf32>
    %335 = arith.addf %334, %333 : vector<8x32xf32>
    %336 = arith.divf %334, %335 : vector<8x32xf32>
    %337 = vector.extract_strided_slice %330 {offsets = [0, 32], sizes = [8, 32], strides = [1, 1]} : vector<8x128xf32> to vector<8x32xf32>
    %338 = arith.negf %337 : vector<8x32xf32>
    %339 = math.exp %338 : vector<8x32xf32>
    %cst_131 = arith.constant 1.000000e+00 : f32
    %340 = vector.broadcast %cst_131 : f32 to vector<8x32xf32>
    %341 = arith.addf %340, %339 : vector<8x32xf32>
    %342 = arith.divf %340, %341 : vector<8x32xf32>
    %343 = vector.extract_strided_slice %330 {offsets = [0, 64], sizes = [8, 32], strides = [1, 1]} : vector<8x128xf32> to vector<8x32xf32>
    %344 = math.tanh %343 : vector<8x32xf32>
    %345 = vector.extract_strided_slice %330 {offsets = [0, 96], sizes = [8, 32], strides = [1, 1]} : vector<8x128xf32> to vector<8x32xf32>
    %346 = arith.negf %345 : vector<8x32xf32>
    %347 = math.exp %346 : vector<8x32xf32>
    %cst_132 = arith.constant 1.000000e+00 : f32
    %348 = vector.broadcast %cst_132 : f32 to vector<8x32xf32>
    %349 = arith.addf %348, %347 : vector<8x32xf32>
    %350 = arith.divf %348, %349 : vector<8x32xf32>
    %351 = arith.mulf %342, %321 : vector<8x32xf32>
    %352 = arith.mulf %336, %344 : vector<8x32xf32>
    %353 = arith.addf %351, %352 : vector<8x32xf32>
    %354 = math.tanh %353 : vector<8x32xf32>
    %355 = arith.mulf %350, %354 : vector<8x32xf32>
    %c1_133 = arith.constant 1 : index
    %c0_134 = arith.constant 0 : index
    %c0_135 = arith.constant 0 : index
    %356 = vector.load %arg11[%c1_133, %c0_134, %c0_135] : memref<8x8x32xf32, #tpu.memory_space<vmem>>, vector<1x8x32xf32>
    %357 = vector.shape_cast %356 : vector<1x8x32xf32> to vector<8x32xf32>
    %358 = vector.shape_cast %355 : vector<8x32xf32> to vector<1x8x32xf32>
    tpu.vector_store %arg11[%c1_133, %c0_134, %c0_135], %358 {strides = array<i32>} : memref<8x8x32xf32, #tpu.memory_space<vmem>>, vector<1x8x32xf32>,
    %c2_136 = arith.constant 2 : index
    %c0_137 = arith.constant 0 : index
    %c0_138 = arith.constant 0 : index
    %359 = vector.load %arg16[%c2_136, %c0_137, %c0_138] : memref<8x8x128xf32, #tpu.memory_space<vmem>>, vector<1x8x128xf32>
    %360 = vector.shape_cast %359 : vector<1x8x128xf32> to vector<8x128xf32>
    %cst_139 = arith.constant dense<0.000000e+00> : vector<8x128xf32>
    %361 = tpu.matmul %355, %290, %cst_139 {dimension_numbers = #tpu.dot_dimension_numbers<[1], [0], [0], [1], [0, 0, 1, 1], [], []>} : vector<8x32xf32>, vector<32x128xf32>, vector<8x128xf32> -> vector<8x128xf32>
    %362 = arith.addf %360, %361 : vector<8x128xf32>
    %363 = vector.extract_strided_slice %362 {offsets = [0, 0], sizes = [8, 32], strides = [1, 1]} : vector<8x128xf32> to vector<8x32xf32>
    %364 = arith.negf %363 : vector<8x32xf32>
    %365 = math.exp %364 : vector<8x32xf32>
    %cst_140 = arith.constant 1.000000e+00 : f32
    %366 = vector.broadcast %cst_140 : f32 to vector<8x32xf32>
    %367 = arith.addf %366, %365 : vector<8x32xf32>
    %368 = arith.divf %366, %367 : vector<8x32xf32>
    %369 = vector.extract_strided_slice %362 {offsets = [0, 32], sizes = [8, 32], strides = [1, 1]} : vector<8x128xf32> to vector<8x32xf32>
    %370 = arith.negf %369 : vector<8x32xf32>
    %371 = math.exp %370 : vector<8x32xf32>
    %cst_141 = arith.constant 1.000000e+00 : f32
    %372 = vector.broadcast %cst_141 : f32 to vector<8x32xf32>
    %373 = arith.addf %372, %371 : vector<8x32xf32>
    %374 = arith.divf %372, %373 : vector<8x32xf32>
    %375 = vector.extract_strided_slice %362 {offsets = [0, 64], sizes = [8, 32], strides = [1, 1]} : vector<8x128xf32> to vector<8x32xf32>
    %376 = math.tanh %375 : vector<8x32xf32>
    %377 = vector.extract_strided_slice %362 {offsets = [0, 96], sizes = [8, 32], strides = [1, 1]} : vector<8x128xf32> to vector<8x32xf32>
    %378 = arith.negf %377 : vector<8x32xf32>
    %379 = math.exp %378 : vector<8x32xf32>
    %cst_142 = arith.constant 1.000000e+00 : f32
    %380 = vector.broadcast %cst_142 : f32 to vector<8x32xf32>
    %381 = arith.addf %380, %379 : vector<8x32xf32>
    %382 = arith.divf %380, %381 : vector<8x32xf32>
    %383 = arith.mulf %374, %353 : vector<8x32xf32>
    %384 = arith.mulf %368, %376 : vector<8x32xf32>
    %385 = arith.addf %383, %384 : vector<8x32xf32>
    %386 = math.tanh %385 : vector<8x32xf32>
    %387 = arith.mulf %382, %386 : vector<8x32xf32>
    %c2_143 = arith.constant 2 : index
    %c0_144 = arith.constant 0 : index
    %c0_145 = arith.constant 0 : index
    %388 = vector.load %arg11[%c2_143, %c0_144, %c0_145] : memref<8x8x32xf32, #tpu.memory_space<vmem>>, vector<1x8x32xf32>
    %389 = vector.shape_cast %388 : vector<1x8x32xf32> to vector<8x32xf32>
    %390 = vector.shape_cast %387 : vector<8x32xf32> to vector<1x8x32xf32>
    tpu.vector_store %arg11[%c2_143, %c0_144, %c0_145], %390 {strides = array<i32>} : memref<8x8x32xf32, #tpu.memory_space<vmem>>, vector<1x8x32xf32>,
    %c3_146 = arith.constant 3 : index
    %c0_147 = arith.constant 0 : index
    %c0_148 = arith.constant 0 : index
    %391 = vector.load %arg16[%c3_146, %c0_147, %c0_148] : memref<8x8x128xf32, #tpu.memory_space<vmem>>, vector<1x8x128xf32>
    %392 = vector.shape_cast %391 : vector<1x8x128xf32> to vector<8x128xf32>
    %cst_149 = arith.constant dense<0.000000e+00> : vector<8x128xf32>
    %393 = tpu.matmul %387, %290, %cst_149 {dimension_numbers = #tpu.dot_dimension_numbers<[1], [0], [0], [1], [0, 0, 1, 1], [], []>} : vector<8x32xf32>, vector<32x128xf32>, vector<8x128xf32> -> vector<8x128xf32>
    %394 = arith.addf %392, %393 : vector<8x128xf32>
    %395 = vector.extract_strided_slice %394 {offsets = [0, 0], sizes = [8, 32], strides = [1, 1]} : vector<8x128xf32> to vector<8x32xf32>
    %396 = arith.negf %395 : vector<8x32xf32>
    %397 = math.exp %396 : vector<8x32xf32>
    %cst_150 = arith.constant 1.000000e+00 : f32
    %398 = vector.broadcast %cst_150 : f32 to vector<8x32xf32>
    %399 = arith.addf %398, %397 : vector<8x32xf32>
    %400 = arith.divf %398, %399 : vector<8x32xf32>
    %401 = vector.extract_strided_slice %394 {offsets = [0, 32], sizes = [8, 32], strides = [1, 1]} : vector<8x128xf32> to vector<8x32xf32>
    %402 = arith.negf %401 : vector<8x32xf32>
    %403 = math.exp %402 : vector<8x32xf32>
    %cst_151 = arith.constant 1.000000e+00 : f32
    %404 = vector.broadcast %cst_151 : f32 to vector<8x32xf32>
    %405 = arith.addf %404, %403 : vector<8x32xf32>
    %406 = arith.divf %404, %405 : vector<8x32xf32>
    %407 = vector.extract_strided_slice %394 {offsets = [0, 64], sizes = [8, 32], strides = [1, 1]} : vector<8x128xf32> to vector<8x32xf32>
    %408 = math.tanh %407 : vector<8x32xf32>
    %409 = vector.extract_strided_slice %394 {offsets = [0, 96], sizes = [8, 32], strides = [1, 1]} : vector<8x128xf32> to vector<8x32xf32>
    %410 = arith.negf %409 : vector<8x32xf32>
    %411 = math.exp %410 : vector<8x32xf32>
    %cst_152 = arith.constant 1.000000e+00 : f32
    %412 = vector.broadcast %cst_152 : f32 to vector<8x32xf32>
    %413 = arith.addf %412, %411 : vector<8x32xf32>
    %414 = arith.divf %412, %413 : vector<8x32xf32>
    %415 = arith.mulf %406, %385 : vector<8x32xf32>
    %416 = arith.mulf %400, %408 : vector<8x32xf32>
    %417 = arith.addf %415, %416 : vector<8x32xf32>
    %418 = math.tanh %417 : vector<8x32xf32>
    %419 = arith.mulf %414, %418 : vector<8x32xf32>
    %c3_153 = arith.constant 3 : index
    %c0_154 = arith.constant 0 : index
    %c0_155 = arith.constant 0 : index
    %420 = vector.load %arg11[%c3_153, %c0_154, %c0_155] : memref<8x8x32xf32, #tpu.memory_space<vmem>>, vector<1x8x32xf32>
    %421 = vector.shape_cast %420 : vector<1x8x32xf32> to vector<8x32xf32>
    %422 = vector.shape_cast %419 : vector<8x32xf32> to vector<1x8x32xf32>
    tpu.vector_store %arg11[%c3_153, %c0_154, %c0_155], %422 {strides = array<i32>} : memref<8x8x32xf32, #tpu.memory_space<vmem>>, vector<1x8x32xf32>,
    %c4_156 = arith.constant 4 : index
    %c0_157 = arith.constant 0 : index
    %c0_158 = arith.constant 0 : index
    %423 = vector.load %arg16[%c4_156, %c0_157, %c0_158] : memref<8x8x128xf32, #tpu.memory_space<vmem>>, vector<1x8x128xf32>
    %424 = vector.shape_cast %423 : vector<1x8x128xf32> to vector<8x128xf32>
    %cst_159 = arith.constant dense<0.000000e+00> : vector<8x128xf32>
    %425 = tpu.matmul %419, %290, %cst_159 {dimension_numbers = #tpu.dot_dimension_numbers<[1], [0], [0], [1], [0, 0, 1, 1], [], []>} : vector<8x32xf32>, vector<32x128xf32>, vector<8x128xf32> -> vector<8x128xf32>
    %426 = arith.addf %424, %425 : vector<8x128xf32>
    %427 = vector.extract_strided_slice %426 {offsets = [0, 0], sizes = [8, 32], strides = [1, 1]} : vector<8x128xf32> to vector<8x32xf32>
    %428 = arith.negf %427 : vector<8x32xf32>
    %429 = math.exp %428 : vector<8x32xf32>
    %cst_160 = arith.constant 1.000000e+00 : f32
    %430 = vector.broadcast %cst_160 : f32 to vector<8x32xf32>
    %431 = arith.addf %430, %429 : vector<8x32xf32>
    %432 = arith.divf %430, %431 : vector<8x32xf32>
    %433 = vector.extract_strided_slice %426 {offsets = [0, 32], sizes = [8, 32], strides = [1, 1]} : vector<8x128xf32> to vector<8x32xf32>
    %434 = arith.negf %433 : vector<8x32xf32>
    %435 = math.exp %434 : vector<8x32xf32>
    %cst_161 = arith.constant 1.000000e+00 : f32
    %436 = vector.broadcast %cst_161 : f32 to vector<8x32xf32>
    %437 = arith.addf %436, %435 : vector<8x32xf32>
    %438 = arith.divf %436, %437 : vector<8x32xf32>
    %439 = vector.extract_strided_slice %426 {offsets = [0, 64], sizes = [8, 32], strides = [1, 1]} : vector<8x128xf32> to vector<8x32xf32>
    %440 = math.tanh %439 : vector<8x32xf32>
    %441 = vector.extract_strided_slice %426 {offsets = [0, 96], sizes = [8, 32], strides = [1, 1]} : vector<8x128xf32> to vector<8x32xf32>
    %442 = arith.negf %441 : vector<8x32xf32>
    %443 = math.exp %442 : vector<8x32xf32>
    %cst_162 = arith.constant 1.000000e+00 : f32
    %444 = vector.broadcast %cst_162 : f32 to vector<8x32xf32>
    %445 = arith.addf %444, %443 : vector<8x32xf32>
    %446 = arith.divf %444, %445 : vector<8x32xf32>
    %447 = arith.mulf %438, %417 : vector<8x32xf32>
    %448 = arith.mulf %432, %440 : vector<8x32xf32>
    %449 = arith.addf %447, %448 : vector<8x32xf32>
    %450 = math.tanh %449 : vector<8x32xf32>
    %451 = arith.mulf %446, %450 : vector<8x32xf32>
    %c4_163 = arith.constant 4 : index
    %c0_164 = arith.constant 0 : index
    %c0_165 = arith.constant 0 : index
    %452 = vector.load %arg11[%c4_163, %c0_164, %c0_165] : memref<8x8x32xf32, #tpu.memory_space<vmem>>, vector<1x8x32xf32>
    %453 = vector.shape_cast %452 : vector<1x8x32xf32> to vector<8x32xf32>
    %454 = vector.shape_cast %451 : vector<8x32xf32> to vector<1x8x32xf32>
    tpu.vector_store %arg11[%c4_163, %c0_164, %c0_165], %454 {strides = array<i32>} : memref<8x8x32xf32, #tpu.memory_space<vmem>>, vector<1x8x32xf32>,
    %c5_166 = arith.constant 5 : index
    %c0_167 = arith.constant 0 : index
    %c0_168 = arith.constant 0 : index
    %455 = vector.load %arg16[%c5_166, %c0_167, %c0_168] : memref<8x8x128xf32, #tpu.memory_space<vmem>>, vector<1x8x128xf32>
    %456 = vector.shape_cast %455 : vector<1x8x128xf32> to vector<8x128xf32>
    %cst_169 = arith.constant dense<0.000000e+00> : vector<8x128xf32>
    %457 = tpu.matmul %451, %290, %cst_169 {dimension_numbers = #tpu.dot_dimension_numbers<[1], [0], [0], [1], [0, 0, 1, 1], [], []>} : vector<8x32xf32>, vector<32x128xf32>, vector<8x128xf32> -> vector<8x128xf32>
    %458 = arith.addf %456, %457 : vector<8x128xf32>
    %459 = vector.extract_strided_slice %458 {offsets = [0, 0], sizes = [8, 32], strides = [1, 1]} : vector<8x128xf32> to vector<8x32xf32>
    %460 = arith.negf %459 : vector<8x32xf32>
    %461 = math.exp %460 : vector<8x32xf32>
    %cst_170 = arith.constant 1.000000e+00 : f32
    %462 = vector.broadcast %cst_170 : f32 to vector<8x32xf32>
    %463 = arith.addf %462, %461 : vector<8x32xf32>
    %464 = arith.divf %462, %463 : vector<8x32xf32>
    %465 = vector.extract_strided_slice %458 {offsets = [0, 32], sizes = [8, 32], strides = [1, 1]} : vector<8x128xf32> to vector<8x32xf32>
    %466 = arith.negf %465 : vector<8x32xf32>
    %467 = math.exp %466 : vector<8x32xf32>
    %cst_171 = arith.constant 1.000000e+00 : f32
    %468 = vector.broadcast %cst_171 : f32 to vector<8x32xf32>
    %469 = arith.addf %468, %467 : vector<8x32xf32>
    %470 = arith.divf %468, %469 : vector<8x32xf32>
    %471 = vector.extract_strided_slice %458 {offsets = [0, 64], sizes = [8, 32], strides = [1, 1]} : vector<8x128xf32> to vector<8x32xf32>
    %472 = math.tanh %471 : vector<8x32xf32>
    %473 = vector.extract_strided_slice %458 {offsets = [0, 96], sizes = [8, 32], strides = [1, 1]} : vector<8x128xf32> to vector<8x32xf32>
    %474 = arith.negf %473 : vector<8x32xf32>
    %475 = math.exp %474 : vector<8x32xf32>
    %cst_172 = arith.constant 1.000000e+00 : f32
    %476 = vector.broadcast %cst_172 : f32 to vector<8x32xf32>
    %477 = arith.addf %476, %475 : vector<8x32xf32>
    %478 = arith.divf %476, %477 : vector<8x32xf32>
    %479 = arith.mulf %470, %449 : vector<8x32xf32>
    %480 = arith.mulf %464, %472 : vector<8x32xf32>
    %481 = arith.addf %479, %480 : vector<8x32xf32>
    %482 = math.tanh %481 : vector<8x32xf32>
    %483 = arith.mulf %478, %482 : vector<8x32xf32>
    %c5_173 = arith.constant 5 : index
    %c0_174 = arith.constant 0 : index
    %c0_175 = arith.constant 0 : index
    %484 = vector.load %arg11[%c5_173, %c0_174, %c0_175] : memref<8x8x32xf32, #tpu.memory_space<vmem>>, vector<1x8x32xf32>
    %485 = vector.shape_cast %484 : vector<1x8x32xf32> to vector<8x32xf32>
    %486 = vector.shape_cast %483 : vector<8x32xf32> to vector<1x8x32xf32>
    tpu.vector_store %arg11[%c5_173, %c0_174, %c0_175], %486 {strides = array<i32>} : memref<8x8x32xf32, #tpu.memory_space<vmem>>, vector<1x8x32xf32>,
    %c6_176 = arith.constant 6 : index
    %c0_177 = arith.constant 0 : index
    %c0_178 = arith.constant 0 : index
    %487 = vector.load %arg16[%c6_176, %c0_177, %c0_178] : memref<8x8x128xf32, #tpu.memory_space<vmem>>, vector<1x8x128xf32>
    %488 = vector.shape_cast %487 : vector<1x8x128xf32> to vector<8x128xf32>
    %cst_179 = arith.constant dense<0.000000e+00> : vector<8x128xf32>
    %489 = tpu.matmul %483, %290, %cst_179 {dimension_numbers = #tpu.dot_dimension_numbers<[1], [0], [0], [1], [0, 0, 1, 1], [], []>} : vector<8x32xf32>, vector<32x128xf32>, vector<8x128xf32> -> vector<8x128xf32>
    %490 = arith.addf %488, %489 : vector<8x128xf32>
    %491 = vector.extract_strided_slice %490 {offsets = [0, 0], sizes = [8, 32], strides = [1, 1]} : vector<8x128xf32> to vector<8x32xf32>
    %492 = arith.negf %491 : vector<8x32xf32>
    %493 = math.exp %492 : vector<8x32xf32>
    %cst_180 = arith.constant 1.000000e+00 : f32
    %494 = vector.broadcast %cst_180 : f32 to vector<8x32xf32>
    %495 = arith.addf %494, %493 : vector<8x32xf32>
    %496 = arith.divf %494, %495 : vector<8x32xf32>
    %497 = vector.extract_strided_slice %490 {offsets = [0, 32], sizes = [8, 32], strides = [1, 1]} : vector<8x128xf32> to vector<8x32xf32>
    %498 = arith.negf %497 : vector<8x32xf32>
    %499 = math.exp %498 : vector<8x32xf32>
    %cst_181 = arith.constant 1.000000e+00 : f32
    %500 = vector.broadcast %cst_181 : f32 to vector<8x32xf32>
    %501 = arith.addf %500, %499 : vector<8x32xf32>
    %502 = arith.divf %500, %501 : vector<8x32xf32>
    %503 = vector.extract_strided_slice %490 {offsets = [0, 64], sizes = [8, 32], strides = [1, 1]} : vector<8x128xf32> to vector<8x32xf32>
    %504 = math.tanh %503 : vector<8x32xf32>
    %505 = vector.extract_strided_slice %490 {offsets = [0, 96], sizes = [8, 32], strides = [1, 1]} : vector<8x128xf32> to vector<8x32xf32>
    %506 = arith.negf %505 : vector<8x32xf32>
    %507 = math.exp %506 : vector<8x32xf32>
    %cst_182 = arith.constant 1.000000e+00 : f32
    %508 = vector.broadcast %cst_182 : f32 to vector<8x32xf32>
    %509 = arith.addf %508, %507 : vector<8x32xf32>
    %510 = arith.divf %508, %509 : vector<8x32xf32>
    %511 = arith.mulf %502, %481 : vector<8x32xf32>
    %512 = arith.mulf %496, %504 : vector<8x32xf32>
    %513 = arith.addf %511, %512 : vector<8x32xf32>
    %514 = math.tanh %513 : vector<8x32xf32>
    %515 = arith.mulf %510, %514 : vector<8x32xf32>
    %c6_183 = arith.constant 6 : index
    %c0_184 = arith.constant 0 : index
    %c0_185 = arith.constant 0 : index
    %516 = vector.load %arg11[%c6_183, %c0_184, %c0_185] : memref<8x8x32xf32, #tpu.memory_space<vmem>>, vector<1x8x32xf32>
    %517 = vector.shape_cast %516 : vector<1x8x32xf32> to vector<8x32xf32>
    %518 = vector.shape_cast %515 : vector<8x32xf32> to vector<1x8x32xf32>
    tpu.vector_store %arg11[%c6_183, %c0_184, %c0_185], %518 {strides = array<i32>} : memref<8x8x32xf32, #tpu.memory_space<vmem>>, vector<1x8x32xf32>,
    %c7_186 = arith.constant 7 : index
    %c0_187 = arith.constant 0 : index
    %c0_188 = arith.constant 0 : index
    %519 = vector.load %arg16[%c7_186, %c0_187, %c0_188] : memref<8x8x128xf32, #tpu.memory_space<vmem>>, vector<1x8x128xf32>
    %520 = vector.shape_cast %519 : vector<1x8x128xf32> to vector<8x128xf32>
    %cst_189 = arith.constant dense<0.000000e+00> : vector<8x128xf32>
    %521 = tpu.matmul %515, %290, %cst_189 {dimension_numbers = #tpu.dot_dimension_numbers<[1], [0], [0], [1], [0, 0, 1, 1], [], []>} : vector<8x32xf32>, vector<32x128xf32>, vector<8x128xf32> -> vector<8x128xf32>
    %522 = arith.addf %520, %521 : vector<8x128xf32>
    %523 = vector.extract_strided_slice %522 {offsets = [0, 0], sizes = [8, 32], strides = [1, 1]} : vector<8x128xf32> to vector<8x32xf32>
    %524 = arith.negf %523 : vector<8x32xf32>
    %525 = math.exp %524 : vector<8x32xf32>
    %cst_190 = arith.constant 1.000000e+00 : f32
    %526 = vector.broadcast %cst_190 : f32 to vector<8x32xf32>
    %527 = arith.addf %526, %525 : vector<8x32xf32>
    %528 = arith.divf %526, %527 : vector<8x32xf32>
    %529 = vector.extract_strided_slice %522 {offsets = [0, 32], sizes = [8, 32], strides = [1, 1]} : vector<8x128xf32> to vector<8x32xf32>
    %530 = arith.negf %529 : vector<8x32xf32>
    %531 = math.exp %530 : vector<8x32xf32>
    %cst_191 = arith.constant 1.000000e+00 : f32
    %532 = vector.broadcast %cst_191 : f32 to vector<8x32xf32>
    %533 = arith.addf %532, %531 : vector<8x32xf32>
    %534 = arith.divf %532, %533 : vector<8x32xf32>
    %535 = vector.extract_strided_slice %522 {offsets = [0, 64], sizes = [8, 32], strides = [1, 1]} : vector<8x128xf32> to vector<8x32xf32>
    %536 = math.tanh %535 : vector<8x32xf32>
    %537 = vector.extract_strided_slice %522 {offsets = [0, 96], sizes = [8, 32], strides = [1, 1]} : vector<8x128xf32> to vector<8x32xf32>
    %538 = arith.negf %537 : vector<8x32xf32>
    %539 = math.exp %538 : vector<8x32xf32>
    %cst_192 = arith.constant 1.000000e+00 : f32
    %540 = vector.broadcast %cst_192 : f32 to vector<8x32xf32>
    %541 = arith.addf %540, %539 : vector<8x32xf32>
    %542 = arith.divf %540, %541 : vector<8x32xf32>
    %543 = arith.mulf %534, %513 : vector<8x32xf32>
    %544 = arith.mulf %528, %536 : vector<8x32xf32>
    %545 = arith.addf %543, %544 : vector<8x32xf32>
    %546 = math.tanh %545 : vector<8x32xf32>
    %547 = arith.mulf %542, %546 : vector<8x32xf32>
    %c7_193 = arith.constant 7 : index
    %c0_194 = arith.constant 0 : index
    %c0_195 = arith.constant 0 : index
    %548 = vector.load %arg11[%c7_193, %c0_194, %c0_195] : memref<8x8x32xf32, #tpu.memory_space<vmem>>, vector<1x8x32xf32>
    %549 = vector.shape_cast %548 : vector<1x8x32xf32> to vector<8x32xf32>
    %550 = vector.shape_cast %547 : vector<8x32xf32> to vector<1x8x32xf32>
    tpu.vector_store %arg11[%c7_193, %c0_194, %c0_195], %550 {strides = array<i32>} : memref<8x8x32xf32, #tpu.memory_space<vmem>>, vector<1x8x32xf32>,
    %c1_196 = arith.constant 1 : index
    %c0_197 = arith.constant 0 : index
    %c0_198 = arith.constant 0 : index
    %551 = vector.load %arg14[%c1_196, %c0_197, %c0_198] : memref<2x8x32xf32, #tpu.memory_space<vmem>>, vector<1x8x32xf32>
    %552 = vector.shape_cast %551 : vector<1x8x32xf32> to vector<8x32xf32>
    %553 = vector.shape_cast %547 : vector<8x32xf32> to vector<1x8x32xf32>
    tpu.vector_store %arg14[%c1_196, %c0_197, %c0_198], %553 {strides = array<i32>} : memref<2x8x32xf32, #tpu.memory_space<vmem>>, vector<1x8x32xf32>,
    %c1_199 = arith.constant 1 : index
    %c0_200 = arith.constant 0 : index
    %c0_201 = arith.constant 0 : index
    %554 = vector.load %arg15[%c1_199, %c0_200, %c0_201] : memref<2x8x32xf32, #tpu.memory_space<vmem>>, vector<1x8x32xf32>
    %555 = vector.shape_cast %554 : vector<1x8x32xf32> to vector<8x32xf32>
    %556 = vector.shape_cast %545 : vector<8x32xf32> to vector<1x8x32xf32>
    tpu.vector_store %arg15[%c1_199, %c0_200, %c0_201], %556 {strides = array<i32>} : memref<2x8x32xf32, #tpu.memory_space<vmem>>, vector<1x8x32xf32>,
    %c0_i32_202 = arith.constant 0 : i32
    %557 = arith.cmpi eq, %arg1, %c0_i32_202 : i32
    %558 = arith.extui %557 : i1 to i32
    %c0_i32_203 = arith.constant 0 : i32
    %559 = arith.cmpi ne, %558, %c0_i32_203 : i32
    scf.if %559 {
      %c0_204 = arith.constant 0 : index
      %c0_205 = arith.constant 0 : index
      %c0_206 = arith.constant 0 : index
      %560 = vector.load %arg14[%c0_204, %c0_205, %c0_206] : memref<2x8x32xf32, #tpu.memory_space<vmem>>, vector<2x8x32xf32>
      %c0_207 = arith.constant 0 : index
      %c0_208 = arith.constant 0 : index
      %c0_209 = arith.constant 0 : index
      %561 = vector.load %arg12[%c0_207, %c0_208, %c0_209] : memref<2x8x32xf32, #tpu.memory_space<vmem>>, vector<2x8x32xf32>
      tpu.vector_store %arg12[%c0_207, %c0_208, %c0_209], %560 {strides = array<i32>} : memref<2x8x32xf32, #tpu.memory_space<vmem>>, vector<2x8x32xf32>,
      %c0_210 = arith.constant 0 : index
      %c0_211 = arith.constant 0 : index
      %c0_212 = arith.constant 0 : index
      %562 = vector.load %arg15[%c0_210, %c0_211, %c0_212] : memref<2x8x32xf32, #tpu.memory_space<vmem>>, vector<2x8x32xf32>
      %c0_213 = arith.constant 0 : index
      %c0_214 = arith.constant 0 : index
      %c0_215 = arith.constant 0 : index
      %563 = vector.load %arg13[%c0_213, %c0_214, %c0_215] : memref<2x8x32xf32, #tpu.memory_space<vmem>>, vector<2x8x32xf32>
      tpu.vector_store %arg13[%c0_213, %c0_214, %c0_215], %562 {strides = array<i32>} : memref<2x8x32xf32, #tpu.memory_space<vmem>>, vector<2x8x32xf32>,
    } else {
    }
    return
  }
  func.func @transform_0(%arg0: i32, %arg1: i32) -> (i32, i32, i32) {
    %c0_i32 = arith.constant 0 : i32
    %c0_i32_0 = arith.constant 0 : i32
    return %arg1, %arg0, %c0_i32 : i32, i32, i32
  }
  func.func @transform_1(%arg0: i32, %arg1: i32) -> (i32, i32) {
    %c0_i32 = arith.constant 0 : i32
    %c0_i32_0 = arith.constant 0 : i32
    %c0_i32_1 = arith.constant 0 : i32
    return %c0_i32, %c0_i32_0 : i32, i32
  }
  func.func @transform_2(%arg0: i32, %arg1: i32) -> (i32, i32) {
    %c0_i32 = arith.constant 0 : i32
    %c0_i32_0 = arith.constant 0 : i32
    %c0_i32_1 = arith.constant 0 : i32
    return %c0_i32, %c0_i32_0 : i32, i32
  }
  func.func @transform_3(%arg0: i32, %arg1: i32) -> (i32, i32) {
    %c0_i32 = arith.constant 0 : i32
    %c0_i32_0 = arith.constant 0 : i32
    %c0_i32_1 = arith.constant 0 : i32
    return %c0_i32, %c0_i32_0 : i32, i32
  }
  func.func @transform_4(%arg0: i32, %arg1: i32) -> (i32, i32) {
    %c0_i32 = arith.constant 0 : i32
    %c0_i32_0 = arith.constant 0 : i32
    %c0_i32_1 = arith.constant 0 : i32
    return %c0_i32, %c0_i32_0 : i32, i32
  }
  func.func @transform_5(%arg0: i32, %arg1: i32) -> (i32, i32) {
    %c0_i32 = arith.constant 0 : i32
    %c0_i32_0 = arith.constant 0 : i32
    %c0_i32_1 = arith.constant 0 : i32
    return %c0_i32, %c0_i32_0 : i32, i32
  }
  func.func @transform_6(%arg0: i32, %arg1: i32) -> (i32, i32) {
    %c0_i32 = arith.constant 0 : i32
    %c0_i32_0 = arith.constant 0 : i32
    %c0_i32_1 = arith.constant 0 : i32
    return %c0_i32, %c0_i32_0 : i32, i32
  }
  func.func @transform_7(%arg0: i32, %arg1: i32) -> (i32, i32, i32) {
    %c0_i32 = arith.constant 0 : i32
    %c0_i32_0 = arith.constant 0 : i32
    %c0_i32_1 = arith.constant 0 : i32
    return %c0_i32, %arg0, %c0_i32_0 : i32, i32, i32
  }
  func.func @transform_8(%arg0: i32, %arg1: i32) -> (i32, i32, i32) {
    %c0_i32 = arith.constant 0 : i32
    %c0_i32_0 = arith.constant 0 : i32
    %c0_i32_1 = arith.constant 0 : i32
    return %c0_i32, %arg0, %c0_i32_0 : i32, i32, i32
  }
  func.func @transform_9(%arg0: i32, %arg1: i32) -> (i32, i32, i32) {
    %c0_i32 = arith.constant 0 : i32
    %c0_i32_0 = arith.constant 0 : i32
    return %arg1, %arg0, %c0_i32 : i32, i32, i32
  }
  func.func @transform_10(%arg0: i32, %arg1: i32) -> (i32, i32, i32) {
    %c0_i32 = arith.constant 0 : i32
    %c0_i32_0 = arith.constant 0 : i32
    %c0_i32_1 = arith.constant 0 : i32
    return %c0_i32, %arg0, %c0_i32_0 : i32, i32, i32
  }
  func.func @transform_11(%arg0: i32, %arg1: i32) -> (i32, i32, i32) {
    %c0_i32 = arith.constant 0 : i32
    %c0_i32_0 = arith.constant 0 : i32
    %c0_i32_1 = arith.constant 0 : i32
    return %c0_i32, %arg0, %c0_i32_0 : i32, i32, i32
  }
}

</mosaic_0001>

<bundles_post_ra>
// kernel: tpu_custom_call.1
= control target key start
LH: loop header
LB: loop body
LE: loop exit
PB: predicated region body
PF: predicated region fallthrough
CT: control target
= control target key end

     0   :  { %17 = vsyncpa [#allocation7], 0  ;;  %s2372_s0 = inlined_call_operand.hbm [shape: f32[8,8,16], index: 0, kind: input, shape index: {}]   ;;  %s2373_s1 = inlined_call_operand.hbm [shape: f32[16,128], index: 1, kind: input, shape index: {}]   ;;  %s2374_s2 = inlined_call_operand.hbm [shape: f32[32,128], index: 2, kind: input, shape index: {}]   ;;  %s2375_s3 = inlined_call_operand.vmem [shape: f32[1,128], index: 3, kind: input, shape index: {}]   ;;  %s2376_s4 = inlined_call_operand.hbm [shape: f32[32,128], index: 4, kind: input, shape index: {}]   ;;  %s2377_s5 = inlined_call_operand.hbm [shape: f32[32,128], index: 5, kind: input, shape index: {}]   ;;  %s2378_s6 = inlined_call_operand.vmem [shape: f32[1,128], index: 6, kind: input, shape index: {}]   ;;  %s2379_s7 = inlined_call_operand.hbm [shape: f32[2,8,32], index: 7, kind: input, shape index: {}]   ;;  %s2380_s8 = inlined_call_operand.hbm [shape: f32[2,8,32], index: 8, kind: input, shape index: {}]   ;;  %s2381_s9 = inlined_call_operand.hbm [shape: f32[8,8,32], index: 9, kind: output, shape index: {0}]   ;;  %s2382_s10 = inlined_call_operand.hbm [shape: f32[2,8,32], index: 10, kind: output, shape index: {1}]   ;;  %s2383_s11 = inlined_call_operand.hbm [shape: f32[2,8,32], index: 11, kind: output, shape index: {2}]  }
   0x1   :  { %18 = vsyncpa [#allocation10], 0 }
   0x2   :  { %19 = vsyncpa [#allocation13], 0 }
   0x3   :  { %20 = vsyncpa [#allocation16], 0 }
   0x4   :  { %21 = vsyncpa [#allocation8], 0 }
   0x5   :  { %22 = vsyncpa [#allocation20], 0  ;;  %s40_s19 = sshll.u32 %s2373_s1, 4  ;;  %s1980_s20 = smov [#allocation9]   ;;  %s41_s19 = int_to_ptr.hbm [resolvable:$true] %s40_s19 }
   0x6   :  { %s42_s21 = sshll.u32 %s1980_s20, 4  ;;  %s68_s24 = sshll.u32 %s2376_s4, 4  ;;  %s43_s21 = int_to_ptr.vmem [resolvable:$true] %s42_s21  ;;  %s69_s24 = int_to_ptr.hbm [resolvable:$true] %s68_s24 }
   0x7   :  { %s1981_s25 = smov 128   ;;  %s1982_s26 = smov 8  }
   0x8   :  { %48 = dma.hbm_to_vmem [thread:$0]  %s41_s19, 256, %s43_s21, [#allocation10], %s1981_s25, %s1981_s25, %s1982_s26  }
   0x9   :  { %s1983_s27 = smov [#allocation12]   ;;  %s96_s1 = sshll.u32 %s2379_s7, 4  ;;  %s97_s1 = int_to_ptr.hbm [resolvable:$true] %s96_s1 }
   0xa   :  { %s70_s28 = sshll.u32 %s1983_s27, 4  ;;  %s27_s13 = sshll.u32 %s2372_s0, 4  ;;  %s71_s28 = int_to_ptr.vmem [resolvable:$true] %s70_s28  ;;  %s28_s13 = int_to_ptr.hbm [resolvable:$true] %s27_s13 }
   0xb   :  { %76 = dma.hbm_to_vmem [thread:$0]  %s69_s24, 512, %s71_s28, [#allocation13], %s1981_s25, %s1981_s25, %s1982_s26  }
   0xc   :  { %s1984_s14 = smov [#allocation15]   ;;  %s1985_s16 = smov [#allocation6]  }
   0xd   :  { %s98_s15 = sshll.u32 %s1984_s14, 4  ;;  %s29_s7 = sshll.u32 %s1985_s16, 4  ;;  %s99_s15 = int_to_ptr.vmem [resolvable:$true] %s98_s15  ;;  %s30_s7 = int_to_ptr.vmem [resolvable:$true] %s29_s7 }
   0xe   :  { %104 = dma.hbm_to_vmem [thread:$0]  %s97_s1, 256, %s99_s15, [#allocation16], %s1981_s25, %s1981_s25, %s1982_s26  }
   0xf   :  { %s53_s19 = sshll.u32 %s2374_s2, 4  ;;  %s81_s21 = sshll.u32 %s2377_s5, 4  ;;  %s54_s19 = int_to_ptr.hbm [resolvable:$true] %s53_s19  ;;  %s82_s21 = int_to_ptr.hbm [resolvable:$true] %s81_s21 }
  0x10   :  { %35 = dma.hbm_to_vmem [thread:$0]  %s28_s13, 1024, %s30_s7, [#allocation7], %s1981_s25, %s1981_s25, %s1982_s26  }
  0x11   :  { %s1986_s22 = smov [#allocation11]   ;;  %s1987_s24 = smov [#allocation14]  }
  0x12   :  { %s55_s23 = sshll.u32 %s1986_s22, 4  ;;  %s83_s2 = sshll.u32 %s1987_s24, 4  ;;  %s56_s23 = int_to_ptr.vmem [resolvable:$true] %s55_s23  ;;  %s84_s2 = int_to_ptr.vmem [resolvable:$true] %s83_s2 }
  0x13   :  { %61 = dma.hbm_to_vmem [thread:$0]  %s54_s19, 512, %s56_s23, [#allocation10], %s1981_s25, %s1981_s25, %s1982_s26  }
  0x14   :  { %s109_s29 = sshll.u32 %s2380_s8, 4  ;;  %s1988_s5 = smov [#allocation17]   ;;  %s110_s29 = int_to_ptr.hbm [resolvable:$true] %s109_s29 }
  0x15   :  { %89 = dma.hbm_to_vmem [thread:$0]  %s82_s21, 512, %s84_s2, [#allocation13], %s1981_s25, %s1981_s25, %s1982_s26  }
  0x16   :  { %s111_s30 = sshll.u32 %s1988_s5, 4  ;;  %s112_s30 = int_to_ptr.vmem [resolvable:$true] %s111_s30 }
  0x17   :  { %117 = dma.hbm_to_vmem [thread:$0]  %s110_s29, 256, %s112_s30, [#allocation16], %s1981_s25, %s1981_s25, %s1982_s26  }
  0x18   :  { %1968 = dma.done.wait [#allocation7], 1024  }
  0x19   :  { %1969 = vsyncadd [#allocation7], 4294966272 }
  0x1a   :  { %1970 = dma.done.wait [#allocation10], 768  }
  0x1b   :  { %1971 = vsyncadd [#allocation10], 4294966528 }
  0x1c   :  { %1972 = dma.done.wait [#allocation13], 1024  }
  0x1d   :  { %1973 = vsyncadd [#allocation13], 4294966272 }
  0x1e   :  { %1974 = dma.done.wait [#allocation16], 512  }
  0x1f   :  { %1975 = vsyncadd [#allocation16], 4294966784  ;;  %v2097_v0 = vld [vmem:[#allocation11 + $0x18] sm:$0xff]  ;;  %v2099_v2 = vld [vmem:[#allocation11 + $0x10] sm:$0xff]  ;;  %vm152_vm0 = vcmask 261120   ;;  %vm169_vm1 = vcmask 130048  }
  0x20   :  { %v168_v1 = vld [vmem:[#allocation9 + $0x8] sm:$0xff]  ;;  %278 = vmatpush.msra.mxu1 %v2097_v0  ;;  %v167_v3 = vld [vmem:[#allocation9] sm:$0xff]  ;;  %v2102_v5 = vld [vmem:[#allocation11 + $0x8] sm:$0xff]  ;;  %349 = vmatpush.msra.mxu2 %v2097_v0  ;;  %s1989_s4 = smov 64   ;;  %s1990_s12 = smov 32  }
  0x21   :  { %208 = vmatpush.msra.mxu0 %v168_v1  ;;  %v159_v4 = vld [vmem:[#allocation6] sm:$0xff]  ;;  %v150_v6 = vld [vmem:[#allocation15] sm:$0xff]  ;;  %v826_v39 = vld [vmem:[#allocation12 + $0x18] sm:$0xff]  ;;  %s1992_s16 = smov [#allocation18]   ;;  %s1483_s19 = sshll.u32 %s2381_s9, 4  ;;  %s1484_s19 = int_to_ptr.hbm [resolvable:$true] %s1483_s19 }
  0x22   :  { %279 = vmatpush.msra.mxu1 %v2099_v2  ;;  %153 = vst.msk [vmem:[#allocation2] sm:$0xff] %vm152_vm0, %v150_v6  ;;  %v2108_v7 = vld [vmem:[#allocation11] sm:$0xff]  ;;  %350 = vmatpush.msra.mxu2 %v2099_v2  ;;  %v155_v9 = vld [vmem:[#allocation17] sm:$0xff]  ;;  %v160_v41 = vld [vmem:[#allocation6 + $0x8] sm:$0xff]  ;;  %s1481_s7 = sshll.u32 %s1992_s16, 4  ;;  %s1993_s0 = smov [#allocation19]   ;;  %s1482_s7 = int_to_ptr.vmem [resolvable:$true] %s1481_s7 }
  0x23   :  { %209 = vmatpush.msra.mxu0 %v167_v3  ;;  %157 = vst.msk [vmem:[#allocation3] sm:$0xff] %vm152_vm0, %v155_v9  ;;  %v2132_v10 = vld [vmem:[%s2375_s3] ss:$0 sm:$0xff]  ;;  %863 = vmatpush.msra.mxu3 %v826_v39  ;;  %v824_v42 = vld [vmem:[#allocation12 + $0x8] sm:$0xff]  ;;  %v823_v43 = vld [vmem:[#allocation12] sm:$0xff]  ;;  %s1494_s20 = sshll.u32 %s1993_s0, 4  ;;  %s1495_s20 = int_to_ptr.vmem [resolvable:$true] %s1494_s20 }
  0x24   :  { %1534 = vmatmul.msk.f32.vlgmr.msra.gmra.mxu0 %vm169_vm1, %v159_v4  ;;  %280 = vmatpush.msra.mxu1 %v2102_v5  ;;  %v825_v40 = vld [vmem:[#allocation12 + $0x10] sm:$0xff]  ;;  %s1496_s23 = sshll.u32 %s2382_s10, 4  ;;  %s1994_s24 = smov [#allocation21]   ;;  %s1497_s23 = int_to_ptr.hbm [resolvable:$true] %s1496_s23 }
  0x25   :  { %351 = vmatpush.msra.mxu2 %v2102_v5  ;;  %864 = vmatpush.msra.mxu3 %v825_v40  ;;  %v162_v40 = vld [vmem:[#allocation6 + $0x18] sm:$0xff]  ;;  %s1507_s2 = sshll.u32 %s1994_s24, 4  ;;  %s1509_s28 = sshll.u32 %s2383_s11, 4  ;;  %s1508_s2 = int_to_ptr.vmem [resolvable:$true] %s1507_s2  ;;  %s1510_s28 = int_to_ptr.hbm [resolvable:$true] %s1509_s28 }
  0x26   :  { %281 = vmatpush.msra.mxu1 %v2108_v7 }
  0x27   :  { %352 = vmatpush.msra.mxu2 %v2108_v7  ;;  %865 = vmatpush.msra.mxu3 %v824_v42 }
  0x28   :  { %417 = vmatpush.msrb.mxu1 %v2097_v0 }
  0x29   :  { %553 = vmatpush.msrb.mxu2 %v2097_v0  ;;  %v259_v8 = vld [vmem:[#allocation2] sm:$0xff]  ;;  %866 = vmatpush.msra.mxu3 %v823_v43 }
  0x2a   :  { %418 = vmatpush.msrb.mxu1 %v2099_v2  ;;  %v260_v16 = vld [vmem:[#allocation3] sm:$0xff] }
  0x2b   :  { %1542 = vmatmul.msk.f32.vlgmr.msra.gmra.mxu1 %vm152_vm0, %v259_v8  ;;  %554 = vmatpush.msrb.mxu2 %v2099_v2 }
  0x2c   :  { %419 = vmatpush.msrb.mxu1 %v2102_v5  ;;  %1535 = vmatmul.msk.f32.gmra.mxu0 %vm169_vm1, %v160_v41 }
  0x2d   :  { %555 = vmatpush.msrb.mxu2 %v2102_v5 }
  0x2e   :  { %420 = vmatpush.msrb.mxu1 %v2108_v7 }
  0x2f   :  { %556 = vmatpush.msrb.mxu2 %v2108_v7 }
  0x30   :  { %485 = vmatpush.msra.mxu1 %v2097_v0 }
  0x32   :  { %486 = vmatpush.msra.mxu1 %v2099_v2 }
  0x34   :  { %487 = vmatpush.msra.mxu1 %v2102_v5 }
  0x36   :  { %488 = vmatpush.msra.mxu1 %v2108_v7 }
  0xa1   :  { %v211_v11 = vpop.f32.mrf.mxu0 }
  0xa2   :  { %v239_v12 = vadd.f32 %v2132_v10, %v211_v11  ;;  %v161_v11 = vld [vmem:[#allocation6 + $0x10] sm:$0xff] }
  0xa3   :  { %1536 = vmatmul.msk.f32.gmra.mxu0 %vm169_vm1, %v161_v11 }
  0xa8   :  { %v283_v13 = vpop.f32.mrf.mxu1 }
  0xa9   :  { %v286_v14 = vadd.f32 %v283_v13, %v239_v12  ;;  %v214_v46 = vpop.f32.mrf.mxu0 }
  0xaa   :  { %v240_v47 = vadd.f32 %v2132_v10, %v214_v46 }
  0xab   :  { %1599 = vtanh.f32 %v286_v14  ;;  %v1543_v17 = vmul.f32 -1.442695, %v286_v14  ;;  %1537 = vmatmul.msk.f32.gmra.mxu0 %vm169_vm1, %v162_v40 }
  0xad   :  { %1601 = vpow2.f32 %v1543_v17 }
  0xb1   :  { %v1600_v15 = vpop.eup %1599 }
  0xb2   :  { %313 = vrot.lane.b32.xlu0 %v1600_v15, %s1989_s4 }
  0xb3   :  { %v1602_v18 = vpop.eup %1601 }
  0xb4   :  { %v290_v19 = vadd.f32 1.0, %v1602_v18 }
  0xb6   :  { %1603 = vrcp.f32 %v290_v19  ;;  %v302_v25 = vand.u32 2147483648, %v290_v19  ;;  %vm296_vm3 = vweird.f32 %v290_v19  ;;  %v300_v26 = vand.u32 2147483647, %v290_v19 }
  0xb8   :  { %v303_v28 = vor.u32 1.1754944e-38, %v302_v25  ;;  %vm301_vm5 = vcmp.eq.f32.partialorder %v300_v26, 8.507059e+37 }
  0xba   :  { %308 = vrot.lane.b32.xlu0 %v260_v16, %s1990_s12 }
  0xbc   :  { %v1604_v20 = vpop.eup %1603 }
  0xbd   :  { %v292_v21 = vmul.f32 %v1604_v20, %v290_v19  ;;  %vm297_vm2 = vweird.f32 %v1604_v20 }
  0xbe   :  { %vm298_vm4 = vmor %vm296_vm3, %vm297_vm2 }
  0xbf   :  { %v293_v22 = vsub.f32 1.0, %v292_v21 }
  0xc1   :  { %v294_v23 = vmul.f32 %v1604_v20, %v293_v22 }
  0xc3   :  { %v295_v24 = vadd.f32 %v1604_v20, %v294_v23 }
  0xc5   :  { %v299_v27 = vsel %vm298_vm4, %v1604_v20, %v295_v24 }
  0xc6   :  { %v304_v30 = vsel %vm301_vm5, %v303_v28, %v299_v27 }
 0x120   :  { %v217_v16 = vpop.f32.mrf.mxu0 }
 0x121   :  { %v241_v17 = vadd.f32 %v2132_v10, %v217_v16 }
 0x124   :  { %v314_v29 = vpop.permute.xlu0 %313 }
 0x125   :  { %v316_v31 = vmul.f32 %v314_v29, %v304_v30 }
 0x127   :  { %318 = vrot.lane.b32.xlu1 %v316_v31, %s1990_s12 }
 0x12c   :  { %v309_v32 = vpop.permute.xlu0 %308 }
 0x12d   :  { %v311_v33 = vmul.f32 %v309_v32, %v304_v30 }
 0x199   :  { %v319_v34 = vpop.permute.xlu1 %318 }
 0x19a   :  { %v321_v35 = vadd.f32 %v319_v34, %v311_v33 }
 0x19c   :  { %1605 = vtanh.f32 %v321_v35 }
 0x1a2   :  { %v1606_v36 = vpop.eup %1605 }
 0x1a3   :  { %324 = vrot.lane.b32.xlu1 %v1606_v36, %s1989_s4 }
 0x215   :  { %v325_v37 = vpop.permute.xlu1 %324 }
 0x216   :  { %v327_v38 = vmul.f32 %v325_v37, %v304_v30 }
 0x218   :  { %329 = vrot.lane.b32.xlu2 %v327_v38, %s1990_s12 }
 0x272   :  { %v330_v44 = vpop.permute.xlu2 %329 }
 0x273   :  { %332 = vst.msk [vmem:[#allocation5] sm:$0xff] %vm152_vm0, %v330_v44  ;;  %1544 = vmatmul.msk.f32.vlgmr.msra.gmra.mxu2 %vm152_vm0, %v330_v44 }
 0x274   :  { %621 = vmatpush.msra.mxu2 %v2097_v0 }
 0x276   :  { %622 = vmatpush.msra.mxu2 %v2099_v2 }
 0x278   :  { %623 = vmatpush.msra.mxu2 %v2102_v5 }
 0x27a   :  { %v815_v45 = vld [vmem:[#allocation5] sm:$0xff]  ;;  %624 = vmatpush.msra.mxu2 %v2108_v7 }
 0x27b   :  { %1558 = vmatmul.msk.f32.vlgmr.msra.gmra.mxu3 %vm152_vm0, %v815_v45  ;;  %v220_v45 = vpop.f32.mrf.mxu0 }
 0x27c   :  { %v242_v46 = vadd.f32 %v2132_v10, %v220_v45 }
 0x2f6   :  { %v354_v48 = vpop.f32.mrf.mxu2 }
 0x2f7   :  { %v357_v49 = vadd.f32 %v354_v48, %v240_v47 }
 0x2f9   :  { %1607 = vtanh.f32 %v357_v49  ;;  %v1545_v51 = vmul.f32 -1.442695, %v357_v49 }
 0x2fb   :  { %1609 = vpow2.f32 %v1545_v51 }
 0x2ff   :  { %v1608_v50 = vpop.eup %1607 }
 0x300   :  { %380 = vrot.lane.b32.xlu2 %v1608_v50, %s1989_s4 }
 0x301   :  { %v1610_v52 = vpop.eup %1609 }
 0x302   :  { %v361_v53 = vadd.f32 1.0, %v1610_v52 }
 0x304   :  { %1611 = vrcp.f32 %v361_v53  ;;  %v373_v59 = vand.u32 2147483648, %v361_v53  ;;  %vm367_vm7 = vweird.f32 %v361_v53  ;;  %v371_v60 = vand.u32 2147483647, %v361_v53 }
 0x306   :  { %v374_v62 = vor.u32 1.1754944e-38, %v373_v59  ;;  %vm372_vm9 = vcmp.eq.f32.partialorder %v371_v60, 8.507059e+37 }
 0x30a   :  { %v1612_v54 = vpop.eup %1611 }
 0x30b   :  { %v363_v55 = vmul.f32 %v1612_v54, %v361_v53  ;;  %vm368_vm6 = vweird.f32 %v1612_v54 }
 0x30c   :  { %vm369_vm8 = vmor %vm367_vm7, %vm368_vm6 }
 0x30d   :  { %v364_v56 = vsub.f32 1.0, %v363_v55 }
 0x30f   :  { %v365_v57 = vmul.f32 %v1612_v54, %v364_v56 }
 0x311   :  { %v366_v58 = vadd.f32 %v1612_v54, %v365_v57 }
 0x313   :  { %v370_v61 = vsel %vm369_vm8, %v1612_v54, %v366_v58 }
 0x314   :  { %v375_v1 = vsel %vm372_vm9, %v374_v62, %v370_v61 }
 0x315   :  { %v378_v4 = vmul.f32 %v375_v1, %v321_v35 }
 0x35a   :  { %v381_v63 = vpop.permute.xlu2 %380 }
 0x35b   :  { %v383_v3 = vmul.f32 %v381_v63, %v375_v1 }
 0x35d   :  { %385 = vrot.lane.b32.xlu0 %v383_v3, %s1990_s12 }
 0x3cf   :  { %v386_v6 = vpop.permute.xlu0 %385 }
 0x3d0   :  { %v388_v8 = vadd.f32 %v386_v6, %v378_v4 }
 0x3d2   :  { %1613 = vtanh.f32 %v388_v8 }
 0x3d8   :  { %v1614_v9 = vpop.eup %1613 }
 0x3d9   :  { %391 = vrot.lane.b32.xlu1 %v1614_v9, %s1989_s4 }
 0x44b   :  { %v392_v12 = vpop.permute.xlu1 %391 }
 0x44c   :  { %v394_v13 = vmul.f32 %v392_v12, %v375_v1  ;;  %v163_v12 = vld [vmem:[#allocation6 + $0x20] sm:$0xff] }
 0x44d   :  { %1538 = vmatmul.msk.f32.gmra.mxu0 %vm169_vm1, %v163_v12  ;;  %v2212_v12 = vld [vmem:[#allocation14] sm:$0xff] }
 0x44e   :  { %396 = vrot.lane.b32.xlu2 %v394_v13, %s1990_s12 }
 0x4a8   :  { %v397_v14 = vpop.permute.xlu2 %396 }
 0x4a9   :  { %400 = vst.msk [vmem:[#allocation5 + $0x8] sm:$0xff] %vm152_vm0, %v397_v14  ;;  %1546 = vmatmul.msk.f32.vlgmr.msrb.gmra.mxu1 %vm152_vm0, %v397_v14 }
 0x4aa   :  { %689 = vmatpush.msrb.mxu1 %v2097_v0 }
 0x4ac   :  { %690 = vmatpush.msrb.mxu1 %v2099_v2 }
 0x4ae   :  { %691 = vmatpush.msrb.mxu1 %v2102_v5 }
 0x4b0   :  { %v816_v15 = vld [vmem:[#allocation5 + $0x8] sm:$0xff]  ;;  %692 = vmatpush.msrb.mxu1 %v2108_v7 }
 0x4b1   :  { %1559 = vmatmul.msk.f32.gmra.mxu3 %vm152_vm0, %v816_v15 }
 0x4ca   :  { %v223_v15 = vpop.f32.mrf.mxu0 }
 0x4cb   :  { %v243_v16 = vadd.f32 %v2132_v10, %v223_v15 }
 0x526   :  { %v422_v18 = vpop.f32.mrf.mxu1 }
 0x527   :  { %v425_v19 = vadd.f32 %v422_v18, %v241_v17 }
 0x529   :  { %1615 = vtanh.f32 %v425_v19  ;;  %v1547_v21 = vmul.f32 -1.442695, %v425_v19 }
 0x52b   :  { %1617 = vpow2.f32 %v1547_v21 }
 0x52f   :  { %v1616_v20 = vpop.eup %1615 }
 0x530   :  { %448 = vrot.lane.b32.xlu0 %v1616_v20, %s1989_s4 }
 0x531   :  { %v1618_v22 = vpop.eup %1617 }
 0x532   :  { %v429_v23 = vadd.f32 1.0, %v1618_v22 }
 0x534   :  { %1619 = vrcp.f32 %v429_v23  ;;  %v441_v29 = vand.u32 2147483648, %v429_v23  ;;  %vm435_vm11 = vweird.f32 %v429_v23  ;;  %v439_v30 = vand.u32 2147483647, %v429_v23 }
 0x536   :  { %v442_v32 = vor.u32 1.1754944e-38, %v441_v29  ;;  %vm440_vm13 = vcmp.eq.f32.partialorder %v439_v30, 8.507059e+37 }
 0x53a   :  { %v1620_v24 = vpop.eup %1619 }
 0x53b   :  { %v431_v25 = vmul.f32 %v1620_v24, %v429_v23  ;;  %vm436_vm10 = vweird.f32 %v1620_v24 }
 0x53c   :  { %vm437_vm12 = vmor %vm435_vm11, %vm436_vm10 }
 0x53d   :  { %v432_v26 = vsub.f32 1.0, %v431_v25 }
 0x53f   :  { %v433_v27 = vmul.f32 %v1620_v24, %v432_v26 }
 0x541   :  { %v434_v28 = vadd.f32 %v1620_v24, %v433_v27 }
 0x543   :  { %v438_v31 = vsel %vm437_vm12, %v1620_v24, %v434_v28 }
 0x544   :  { %v443_v34 = vsel %vm440_vm13, %v442_v32, %v438_v31 }
 0x545   :  { %v446_v36 = vmul.f32 %v443_v34, %v388_v8 }
 0x5a2   :  { %v449_v33 = vpop.permute.xlu0 %448 }
 0x5a3   :  { %v451_v35 = vmul.f32 %v449_v33, %v443_v34 }
 0x5a5   :  { %453 = vrot.lane.b32.xlu1 %v451_v35, %s1990_s12 }
 0x617   :  { %v454_v37 = vpop.permute.xlu1 %453 }
 0x618   :  { %v456_v38 = vadd.f32 %v454_v37, %v446_v36  ;;  %v164_v37 = vld [vmem:[#allocation6 + $0x28] sm:$0xff] }
 0x619   :  { %1539 = vmatmul.msk.f32.gmra.mxu0 %vm169_vm1, %v164_v37 }
 0x61a   :  { %1621 = vtanh.f32 %v456_v38 }
 0x620   :  { %v1622_v39 = vpop.eup %1621 }
 0x621   :  { %459 = vrot.lane.b32.xlu2 %v1622_v39, %s1989_s4 }
 0x67b   :  { %v460_v41 = vpop.permute.xlu2 %459 }
 0x67c   :  { %v462_v42 = vmul.f32 %v460_v41, %v443_v34 }
 0x67e   :  { %464 = vrot.lane.b32.xlu0 %v462_v42, %s1990_s12 }
 0x696   :  { %v226_v40 = vpop.f32.mrf.mxu0 }
 0x697   :  { %v244_v41 = vadd.f32 %v2132_v10, %v226_v40 }
 0x6f0   :  { %v465_v43 = vpop.permute.xlu0 %464 }
 0x6f1   :  { %468 = vst.msk [vmem:[#allocation5 + $0x10] sm:$0xff] %vm152_vm0, %v465_v43  ;;  %1548 = vmatmul.msk.f32.vlgmr.msra.gmra.mxu1 %vm152_vm0, %v465_v43 }
 0x6f8   :  { %v817_v44 = vld [vmem:[#allocation5 + $0x10] sm:$0xff] }
 0x6f9   :  { %1560 = vmatmul.msk.f32.gmra.mxu3 %vm152_vm0, %v817_v44 }
 0x76e   :  { %v490_v47 = vpop.f32.mrf.mxu1 }
 0x76f   :  { %v493_v48 = vadd.f32 %v490_v47, %v242_v46 }
 0x771   :  { %1623 = vtanh.f32 %v493_v48  ;;  %v1549_v50 = vmul.f32 -1.442695, %v493_v48 }
 0x773   :  { %1625 = vpow2.f32 %v1549_v50 }
 0x777   :  { %v1624_v49 = vpop.eup %1623 }
 0x778   :  { %516 = vrot.lane.b32.xlu1 %v1624_v49, %s1989_s4 }
 0x779   :  { %v1626_v51 = vpop.eup %1625 }
 0x77a   :  { %v497_v52 = vadd.f32 1.0, %v1626_v51 }
 0x77c   :  { %1627 = vrcp.f32 %v497_v52  ;;  %v509_v58 = vand.u32 2147483648, %v497_v52  ;;  %vm503_vm15 = vweird.f32 %v497_v52  ;;  %v507_v59 = vand.u32 2147483647, %v497_v52 }
 0x77e   :  { %v510_v61 = vor.u32 1.1754944e-38, %v509_v58  ;;  %vm508_vm3 = vcmp.eq.f32.partialorder %v507_v59, 8.507059e+37 }
 0x782   :  { %v1628_v53 = vpop.eup %1627 }
 0x783   :  { %v499_v54 = vmul.f32 %v1628_v53, %v497_v52  ;;  %vm504_vm14 = vweird.f32 %v1628_v53 }
 0x784   :  { %vm505_vm2 = vmor %vm503_vm15, %vm504_vm14 }
 0x785   :  { %v500_v55 = vsub.f32 1.0, %v499_v54 }
 0x787   :  { %v501_v56 = vmul.f32 %v1628_v53, %v500_v55 }
 0x789   :  { %v502_v57 = vadd.f32 %v1628_v53, %v501_v56 }
 0x78b   :  { %v506_v60 = vsel %vm505_vm2, %v1628_v53, %v502_v57 }
 0x78c   :  { %v511_v63 = vsel %vm508_vm3, %v510_v61, %v506_v60 }
 0x78d   :  { %v514_v3 = vmul.f32 %v511_v63, %v456_v38 }
 0x7ea   :  { %v517_v62 = vpop.permute.xlu1 %516 }
 0x7eb   :  { %v519_v1 = vmul.f32 %v517_v62, %v511_v63 }
 0x7ed   :  { %521 = vrot.lane.b32.xlu2 %v519_v1, %s1990_s12  ;;  %v165_v1 = vld [vmem:[#allocation6 + $0x30] sm:$0xff] }
 0x7ee   :  { %1540 = vmatmul.msk.f32.gmra.mxu0 %vm169_vm1, %v165_v1 }
 0x847   :  { %v522_v4 = vpop.permute.xlu2 %521 }
 0x848   :  { %v524_v6 = vadd.f32 %v522_v4, %v514_v3 }
 0x84a   :  { %1629 = vtanh.f32 %v524_v6 }
 0x850   :  { %v1630_v8 = vpop.eup %1629 }
 0x851   :  { %527 = vrot.lane.b32.xlu0 %v1630_v8, %s1989_s4  ;;  %v2201_v8 = vld [vmem:[#allocation14 + $0x18] sm:$0xff] }
 0x852   :  { %936 = vmatpush.msra.mxu1 %v2201_v8 }
 0x8c3   :  { %v528_v9 = vpop.permute.xlu0 %527 }
 0x8c4   :  { %v530_v11 = vmul.f32 %v528_v9, %v511_v63  ;;  %v2203_v9 = vld [vmem:[#allocation14 + $0x10] sm:$0xff] }
 0x8c5   :  { %937 = vmatpush.msra.mxu1 %v2203_v9 }
 0x8c6   :  { %532 = vrot.lane.b32.xlu1 %v530_v11, %s1990_s12  ;;  %v2208_v11 = vld [vmem:[#allocation14 + $0x8] sm:$0xff] }
 0x8c7   :  { %938 = vmatpush.msra.mxu1 %v2208_v11 }
 0x8c9   :  { %939 = vmatpush.msra.mxu1 %v2212_v12 }
 0x938   :  { %v533_v13 = vpop.permute.xlu1 %532 }
 0x939   :  { %536 = vst.msk [vmem:[#allocation5 + $0x18] sm:$0xff] %vm152_vm0, %v533_v13  ;;  %1550 = vmatmul.msk.f32.vlgmr.msrb.gmra.mxu2 %vm152_vm0, %v533_v13 }
 0x93a   :  { %757 = vmatpush.msrb.mxu2 %v2097_v0 }
 0x93c   :  { %758 = vmatpush.msrb.mxu2 %v2099_v2 }
 0x93e   :  { %759 = vmatpush.msrb.mxu2 %v2102_v5 }
 0x940   :  { %v818_v14 = vld [vmem:[#allocation5 + $0x18] sm:$0xff]  ;;  %760 = vmatpush.msrb.mxu2 %v2108_v7 }
 0x941   :  { %1561 = vmatmul.msk.f32.gmra.mxu3 %vm152_vm0, %v818_v14 }
 0x9bc   :  { %v558_v17 = vpop.f32.mrf.mxu2 }
 0x9bd   :  { %v561_v18 = vadd.f32 %v558_v17, %v243_v16  ;;  %v156_v16 = vld [vmem:[#allocation17 + $0x8] sm:$0xff]  ;;  %v229_v17 = vpop.f32.mrf.mxu0 }
 0x9be   :  { %158 = vst.msk [vmem:[#allocation3 + $0x8] sm:$0xff] %vm152_vm0, %v156_v16 }
 0x9bf   :  { %1631 = vtanh.f32 %v561_v18  ;;  %v1551_v20 = vmul.f32 -1.442695, %v561_v18  ;;  %v245_v18 = vadd.f32 %v2132_v10, %v229_v17 }
 0x9c1   :  { %1633 = vpow2.f32 %v1551_v20 }
 0x9c5   :  { %v1632_v19 = vpop.eup %1631 }
 0x9c6   :  { %584 = vrot.lane.b32.xlu2 %v1632_v19, %s1989_s4 }
 0x9c7   :  { %v1634_v0 = vpop.eup %1633 }
 0x9c8   :  { %v565_v2 = vadd.f32 1.0, %v1634_v0  ;;  %v2235_v0 = vld [vmem:[%s2378_s6] ss:$0 sm:$0xff] }
 0x9ca   :  { %1635 = vrcp.f32 %v565_v2  ;;  %v577_v24 = vand.u32 2147483648, %v565_v2  ;;  %vm571_vm5 = vweird.f32 %v565_v2  ;;  %v575_v25 = vand.u32 2147483647, %v565_v2 }
 0x9cc   :  { %v578_v27 = vor.u32 1.1754944e-38, %v577_v24  ;;  %vm576_vm7 = vcmp.eq.f32.partialorder %v575_v25, 8.507059e+37 }
 0x9d0   :  { %v1636_v5 = vpop.eup %1635 }
 0x9d1   :  { %v567_v21 = vmul.f32 %v1636_v5, %v565_v2  ;;  %vm572_vm4 = vweird.f32 %v1636_v5  ;;  %v868_v2 = vpop.f32.mrf.mxu3 }
 0x9d2   :  { %vm573_vm6 = vmor %vm571_vm5, %vm572_vm4 }
 0x9d3   :  { %v568_v22 = vsub.f32 1.0, %v567_v21 }
 0x9d5   :  { %v569_v7 = vmul.f32 %v1636_v5, %v568_v22 }
 0x9d7   :  { %v570_v23 = vadd.f32 %v1636_v5, %v569_v7 }
 0x9d9   :  { %v574_v26 = vsel %vm573_vm6, %v1636_v5, %v570_v23  ;;  %v896_v5 = vadd.f32 %v2235_v0, %v868_v2  ;;  %v919_v23 = vld [vmem:[#allocation3 + $0x8] sm:$0xff]  ;;  %v871_v17 = vpop.f32.mrf.mxu3 }
 0x9da   :  { %v579_v29 = vsel %vm576_vm7, %v578_v27, %v574_v26 }
 0x9db   :  { %v582_v31 = vmul.f32 %v579_v29, %v524_v6  ;;  %v151_v6 = vld [vmem:[#allocation15 + $0x8] sm:$0xff] }
 0x9dc   :  { %154 = vst.msk [vmem:[#allocation2 + $0x8] sm:$0xff] %vm152_vm0, %v151_v6 }
 0x9e3   :  { %v917_v14 = vld [vmem:[#allocation2 + $0x8] sm:$0xff] }
 0xa20   :  { %v585_v28 = vpop.permute.xlu2 %584 }
 0xa21   :  { %v587_v30 = vmul.f32 %v585_v28, %v579_v29 }
 0xa23   :  { %589 = vrot.lane.b32.xlu0 %v587_v30, %s1990_s12 }
 0xa95   :  { %v590_v32 = vpop.permute.xlu0 %589 }
 0xa96   :  { %v592_v33 = vadd.f32 %v590_v32, %v582_v31 }
 0xa98   :  { %1637 = vtanh.f32 %v592_v33 }
 0xa9e   :  { %v1638_v34 = vpop.eup %1637 }
 0xa9f   :  { %595 = vrot.lane.b32.xlu1 %v1638_v34, %s1989_s4 }
 0xb11   :  { %v596_v35 = vpop.permute.xlu1 %595 }
 0xb12   :  { %v598_v36 = vmul.f32 %v596_v35, %v579_v29 }
 0xb14   :  { %600 = vrot.lane.b32.xlu2 %v598_v36, %s1990_s12 }
 0xb6e   :  { %v601_v38 = vpop.permute.xlu2 %600 }
 0xb6f   :  { %604 = vst.msk [vmem:[#allocation5 + $0x20] sm:$0xff] %vm152_vm0, %v601_v38  ;;  %1552 = vmatmul.msk.f32.vlgmr.msra.gmra.mxu2 %vm152_vm0, %v601_v38 }
 0xb70   :  { %1006 = vmatpush.msra.mxu2 %v2201_v8 }
 0xb72   :  { %1007 = vmatpush.msra.mxu2 %v2203_v9 }
 0xb74   :  { %1008 = vmatpush.msra.mxu2 %v2208_v11 }
 0xb76   :  { %v819_v39 = vld [vmem:[#allocation5 + $0x20] sm:$0xff]  ;;  %1009 = vmatpush.msra.mxu2 %v2212_v12 }
 0xb77   :  { %1562 = vmatmul.msk.f32.gmra.mxu3 %vm152_vm0, %v819_v39 }
 0xbf2   :  { %v626_v42 = vpop.f32.mrf.mxu2 }
 0xbf3   :  { %v629_v43 = vadd.f32 %v626_v42, %v244_v41 }
 0xbf5   :  { %1639 = vtanh.f32 %v629_v43  ;;  %v1553_v45 = vmul.f32 -1.442695, %v629_v43 }
 0xbf7   :  { %1641 = vpow2.f32 %v1553_v45 }
 0xbfb   :  { %v1640_v44 = vpop.eup %1639 }
 0xbfc   :  { %652 = vrot.lane.b32.xlu0 %v1640_v44, %s1989_s4 }
 0xbfd   :  { %v1642_v46 = vpop.eup %1641 }
 0xbfe   :  { %v633_v47 = vadd.f32 1.0, %v1642_v46 }
 0xc00   :  { %1643 = vrcp.f32 %v633_v47  ;;  %v645_v53 = vand.u32 2147483648, %v633_v47  ;;  %vm639_vm9 = vweird.f32 %v633_v47  ;;  %v643_v54 = vand.u32 2147483647, %v633_v47 }
 0xc02   :  { %v646_v56 = vor.u32 1.1754944e-38, %v645_v53  ;;  %vm644_vm11 = vcmp.eq.f32.partialorder %v643_v54, 8.507059e+37 }
 0xc06   :  { %v1644_v48 = vpop.eup %1643 }
 0xc07   :  { %v635_v49 = vmul.f32 %v1644_v48, %v633_v47  ;;  %vm640_vm8 = vweird.f32 %v1644_v48 }
 0xc08   :  { %vm641_vm10 = vmor %vm639_vm9, %vm640_vm8 }
 0xc09   :  { %v636_v50 = vsub.f32 1.0, %v635_v49 }
 0xc0b   :  { %v637_v51 = vmul.f32 %v1644_v48, %v636_v50 }
 0xc0d   :  { %v638_v52 = vadd.f32 %v1644_v48, %v637_v51 }
 0xc0f   :  { %v642_v55 = vsel %vm641_vm10, %v1644_v48, %v638_v52 }
 0xc10   :  { %v647_v58 = vsel %vm644_vm11, %v646_v56, %v642_v55 }
 0xc11   :  { %v650_v60 = vmul.f32 %v647_v58, %v592_v33 }
 0xc6e   :  { %v653_v57 = vpop.permute.xlu0 %652 }
 0xc6f   :  { %v655_v59 = vmul.f32 %v653_v57, %v647_v58 }
 0xc71   :  { %657 = vrot.lane.b32.xlu1 %v655_v59, %s1990_s12 }
 0xce3   :  { %v658_v61 = vpop.permute.xlu1 %657 }
 0xce4   :  { %v2195_v62 = vadd.f32 %v658_v61, %v650_v60 }
 0xce6   :  { %1645 = vtanh.f32 %v2195_v62 }
 0xcec   :  { %v1646_v63 = vpop.eup %1645 }
 0xced   :  { %663 = vrot.lane.b32.xlu2 %v1646_v63, %s1989_s4 }
 0xd47   :  { %v664_v3 = vpop.permute.xlu2 %663 }
 0xd48   :  { %v666_v4 = vmul.f32 %v664_v3, %v647_v58 }
 0xd4a   :  { %668 = vrot.lane.b32.xlu0 %v666_v4, %s1990_s12 }
 0xdbc   :  { %v669_v13 = vpop.permute.xlu0 %668 }
 0xdbd   :  { %672 = vst.msk [vmem:[#allocation5 + $0x28] sm:$0xff] %vm152_vm0, %v669_v13  ;;  %1554 = vmatmul.msk.f32.vlgmr.msrb.gmra.mxu1 %vm152_vm0, %v669_v13  ;;  %v166_v13 = vld [vmem:[#allocation6 + $0x38] sm:$0xff] }
 0xdbe   :  { %1073 = vmatpush.msrb.mxu1 %v2201_v8  ;;  %1541 = vmatmul.msk.f32.gmra.mxu0 %vm169_vm1, %v166_v13 }
 0xdc0   :  { %1074 = vmatpush.msrb.mxu1 %v2203_v9 }
 0xdc2   :  { %1075 = vmatpush.msrb.mxu1 %v2208_v11 }
 0xdc4   :  { %v820_v15 = vld [vmem:[#allocation5 + $0x28] sm:$0xff]  ;;  %1076 = vmatpush.msrb.mxu1 %v2212_v12 }
 0xdc5   :  { %1563 = vmatmul.msk.f32.gmra.mxu3 %vm152_vm0, %v820_v15  ;;  %1566 = vmatmul.msk.f32.vlgmr.msra.gmra.mxu1 %vm152_vm0, %v917_v14 }
 0xdc6   :  { %1207 = vmatpush.msra.mxu1 %v2201_v8 }
 0xdc8   :  { %1208 = vmatpush.msra.mxu1 %v2203_v9 }
 0xdca   :  { %1209 = vmatpush.msra.mxu1 %v2208_v11 }
 0xdcc   :  { %1210 = vmatpush.msra.mxu1 %v2212_v12 }
 0xe3a   :  { %v694_v19 = vpop.f32.mrf.mxu1 }
 0xe3b   :  { %v697_v20 = vadd.f32 %v694_v19, %v245_v18  ;;  %v897_v18 = vadd.f32 %v2235_v0, %v871_v17 }
 0xe3d   :  { %1647 = vtanh.f32 %v697_v20  ;;  %v1555_v27 = vmul.f32 -1.442695, %v697_v20 }
 0xe42   :  { %v941_v21 = vpop.f32.mrf.mxu1 }
 0xe43   :  { %v1648_v22 = vpop.eup %1647  ;;  %v944_v7 = vadd.f32 %v941_v21, %v896_v5 }
 0xe44   :  { %720 = vrot.lane.b32.xlu1 %v1648_v22, %s1989_s4 }
 0xe45   :  { %1649 = vtanh.f32 %v944_v7  ;;  %v1567_v10 = vmul.f32 -1.442695, %v944_v7 }
 0xe47   :  { %1651 = vpow2.f32 %v1567_v10 }
 0xe4b   :  { %v1650_v24 = vpop.eup %1649 }
 0xe4c   :  { %966 = vrot.lane.b32.xlu1 %v919_v23, %s1990_s12  ;;  %971 = vrot.lane.b32.xlu2 %v1650_v24, %s1989_s4 }
 0xe4d   :  { %v1652_v25 = vpop.eup %1651 }
 0xe4e   :  { %v948_v26 = vadd.f32 1.0, %v1652_v25 }
 0xe50   :  { %1653 = vrcp.f32 %v948_v26  ;;  %v960_v36 = vand.u32 2147483648, %v948_v26  ;;  %vm954_vm13 = vweird.f32 %v948_v26  ;;  %v958_v37 = vand.u32 2147483647, %v948_v26 }
 0xe51   :  { %1655 = vpow2.f32 %v1555_v27 }
 0xe52   :  { %v961_v40 = vor.u32 1.1754944e-38, %v960_v36  ;;  %vm959_vm15 = vcmp.eq.f32.partialorder %v958_v37, 8.507059e+37 }
 0xe56   :  { %v1654_v28 = vpop.eup %1653 }
 0xe57   :  { %v1656_v29 = vpop.eup %1655  ;;  %v950_v30 = vmul.f32 %v1654_v28, %v948_v26  ;;  %vm955_vm12 = vweird.f32 %v1654_v28 }
 0xe58   :  { %v701_v31 = vadd.f32 1.0, %v1656_v29  ;;  %vm956_vm14 = vmor %vm954_vm13, %vm955_vm12 }
 0xe59   :  { %v951_v32 = vsub.f32 1.0, %v950_v30 }
 0xe5a   :  { %1657 = vrcp.f32 %v701_v31  ;;  %v713_v47 = vand.u32 2147483648, %v701_v31  ;;  %vm707_vm3 = vweird.f32 %v701_v31  ;;  %v711_v48 = vand.u32 2147483647, %v701_v31 }
 0xe5b   :  { %v952_v33 = vmul.f32 %v1654_v28, %v951_v32 }
 0xe5c   :  { %v714_v50 = vor.u32 1.1754944e-38, %v713_v47  ;;  %vm712_vm5 = vcmp.eq.f32.partialorder %v711_v48, 8.507059e+37 }
 0xe5d   :  { %v953_v34 = vadd.f32 %v1654_v28, %v952_v33 }
 0xe5f   :  { %v957_v38 = vsel %vm956_vm14, %v1654_v28, %v953_v34 }
 0xe60   :  { %v1658_v35 = vpop.eup %1657  ;;  %v962_v42 = vsel %vm959_vm15, %v961_v40, %v957_v38  ;;  %v874_v40 = vpop.f32.mrf.mxu3 }
 0xe61   :  { %v703_v39 = vmul.f32 %v1658_v35, %v701_v31  ;;  %vm708_vm2 = vweird.f32 %v1658_v35 }
 0xe62   :  { %vm709_vm4 = vmor %vm707_vm3, %vm708_vm2 }
 0xe63   :  { %v704_v44 = vsub.f32 1.0, %v703_v39 }
 0xe65   :  { %v705_v45 = vmul.f32 %v1658_v35, %v704_v44 }
 0xe67   :  { %v706_v46 = vadd.f32 %v1658_v35, %v705_v45 }
 0xe69   :  { %v710_v49 = vsel %vm709_vm4, %v1658_v35, %v706_v46 }
 0xe6a   :  { %v715_v52 = vsel %vm712_vm5, %v714_v50, %v710_v49 }
 0xe6b   :  { %v718_v59 = vmul.f32 %v715_v52, %v2195_v62 }
 0xea6   :  { %v972_v41 = vpop.permute.xlu2 %971 }
 0xea7   :  { %v974_v43 = vmul.f32 %v972_v41, %v962_v42  ;;  %v898_v41 = vadd.f32 %v2235_v0, %v874_v40 }
 0xea9   :  { %976 = vrot.lane.b32.xlu2 %v974_v43, %s1990_s12 }
 0xeb6   :  { %v721_v51 = vpop.permute.xlu1 %720 }
 0xeb7   :  { %v723_v53 = vmul.f32 %v721_v51, %v715_v52 }
 0xeb9   :  { %725 = vrot.lane.b32.xlu0 %v723_v53, %s1990_s12 }
 0xebe   :  { %v967_v54 = vpop.permute.xlu1 %966 }
 0xebf   :  { %v969_v55 = vmul.f32 %v967_v54, %v962_v42 }
 0xf03   :  { %v977_v56 = vpop.permute.xlu2 %976 }
 0xf04   :  { %v2243_v57 = vadd.f32 %v977_v56, %v969_v55 }
 0xf06   :  { %1659 = vtanh.f32 %v2243_v57 }
 0xf0c   :  { %v1660_v58 = vpop.eup %1659 }
 0xf0d   :  { %982 = vrot.lane.b32.xlu1 %v1660_v58, %s1989_s4 }
 0xf2b   :  { %v726_v60 = vpop.permute.xlu0 %725 }
 0xf2c   :  { %v2248_v61 = vadd.f32 %v726_v60, %v718_v59 }
 0xf2e   :  { %1661 = vtanh.f32 %v2248_v61 }
 0xf34   :  { %v1662_v63 = vpop.eup %1661 }
 0xf35   :  { %731 = vrot.lane.b32.xlu0 %v1662_v63, %s1989_s4 }
 0xf7f   :  { %v983_v1 = vpop.permute.xlu1 %982 }
 0xf80   :  { %v985_v3 = vmul.f32 %v983_v1, %v962_v42 }
 0xf82   :  { %987 = vrot.lane.b32.xlu0 %v985_v3, %s1990_s12 }
 0xfa7   :  { %v732_v4 = vpop.permute.xlu0 %731 }
 0xfa8   :  { %v734_v6 = vmul.f32 %v732_v4, %v715_v52 }
 0xfaa   :  { %736 = vrot.lane.b32.xlu2 %v734_v6, %s1990_s12 }
 0xff4   :  { %v988_v62 = vpop.permute.xlu0 %987 }
 0xff5   :  { %990 = vst.msk [vmem:[#allocation18] sm:$0xff] %vm152_vm0, %v988_v62 }
0x1004   :  { %v737_v14 = vpop.permute.xlu2 %736 }
0x1005   :  { %740 = vst.msk [vmem:[#allocation5 + $0x30] sm:$0xff] %vm152_vm0, %v737_v14  ;;  %1556 = vmatmul.msk.f32.vlgmr.msrb.gmra.mxu2 %vm152_vm0, %v737_v14 }
0x1006   :  { %1140 = vmatpush.msrb.mxu2 %v2201_v8 }
0x1008   :  { %1141 = vmatpush.msrb.mxu2 %v2203_v9 }
0x100a   :  { %1142 = vmatpush.msrb.mxu2 %v2208_v11 }
0x100c   :  { %v821_v15 = vld [vmem:[#allocation5 + $0x30] sm:$0xff]  ;;  %1143 = vmatpush.msrb.mxu2 %v2212_v12 }
0x100d   :  { %1564 = vmatmul.msk.f32.gmra.mxu3 %vm152_vm0, %v821_v15  ;;  %1568 = vmatmul.msk.f32.vlgmr.msra.gmra.mxu2 %vm152_vm0, %v988_v62  ;;  %v877_v62 = vpop.f32.mrf.mxu3 }
0x100e   :  { %1274 = vmatpush.msra.mxu2 %v2201_v8  ;;  %v899_v14 = vadd.f32 %v2235_v0, %v877_v62 }
0x1010   :  { %1275 = vmatpush.msra.mxu2 %v2203_v9 }
0x1012   :  { %1276 = vmatpush.msra.mxu2 %v2208_v11 }
0x1014   :  { %1277 = vmatpush.msra.mxu2 %v2212_v12 }
0x1088   :  { %v2268_v16 = vpop.f32.mrf.mxu2 }
0x1090   :  { %v1011_v19 = vpop.f32.mrf.mxu2 }
0x1091   :  { %v1014_v20 = vadd.f32 %v1011_v19, %v897_v18 }
0x1093   :  { %1663 = vtanh.f32 %v1014_v20  ;;  %v1569_v5 = vmul.f32 -1.442695, %v1014_v20 }
0x1095   :  { %1665 = vpow2.f32 %v1569_v5 }
0x1099   :  { %v1664_v2 = vpop.eup %1663 }
0x109a   :  { %1037 = vrot.lane.b32.xlu1 %v1664_v2, %s1989_s4 }
0x109b   :  { %v1666_v21 = vpop.eup %1665 }
0x109c   :  { %v1018_v22 = vadd.f32 1.0, %v1666_v21 }
0x109e   :  { %1667 = vrcp.f32 %v1018_v22  ;;  %v1030_v26 = vand.u32 2147483648, %v1018_v22  ;;  %vm1024_vm6 = vweird.f32 %v1018_v22  ;;  %v1028_v27 = vand.u32 2147483647, %v1018_v22 }
0x10a0   :  { %v1031_v29 = vor.u32 1.1754944e-38, %v1030_v26  ;;  %vm1029_vm8 = vcmp.eq.f32.partialorder %v1028_v27, 8.507059e+37 }
0x10a4   :  { %v1668_v7 = vpop.eup %1667 }
0x10a5   :  { %v1020_v23 = vmul.f32 %v1668_v7, %v1018_v22  ;;  %vm1025_vm1 = vweird.f32 %v1668_v7 }
0x10a6   :  { %vm1026_vm7 = vmor %vm1024_vm6, %vm1025_vm1 }
0x10a7   :  { %v1021_v24 = vsub.f32 1.0, %v1020_v23 }
0x10a9   :  { %v1022_v10 = vmul.f32 %v1668_v7, %v1021_v24 }
0x10ab   :  { %v1023_v25 = vadd.f32 %v1668_v7, %v1022_v10 }
0x10ad   :  { %v1027_v28 = vsel %vm1026_vm7, %v1668_v7, %v1023_v25 }
0x10ae   :  { %v1032_v31 = vsel %vm1029_vm8, %v1031_v29, %v1027_v28 }
0x10af   :  { %v1035_v33 = vmul.f32 %v1032_v31, %v2243_v57 }
0x110c   :  { %v1038_v30 = vpop.permute.xlu1 %1037 }
0x110d   :  { %v1040_v32 = vmul.f32 %v1038_v30, %v1032_v31 }
0x110f   :  { %1042 = vrot.lane.b32.xlu2 %v1040_v32, %s1990_s12 }
0x1169   :  { %v1043_v34 = vpop.permute.xlu2 %1042 }
0x116a   :  { %v1045_v35 = vadd.f32 %v1043_v34, %v1035_v33  ;;  %v880_v33 = vpop.f32.mrf.mxu3 }
0x116b   :  { %v900_v34 = vadd.f32 %v2235_v0, %v880_v33 }
0x116c   :  { %1669 = vtanh.f32 %v1045_v35 }
0x1172   :  { %v1670_v36 = vpop.eup %1669 }
0x1173   :  { %1048 = vrot.lane.b32.xlu0 %v1670_v36, %s1989_s4 }
0x11e5   :  { %v1049_v37 = vpop.permute.xlu0 %1048 }
0x11e6   :  { %v1051_v38 = vmul.f32 %v1049_v37, %v1032_v31 }
0x11e8   :  { %1053 = vrot.lane.b32.xlu1 %v1051_v38, %s1990_s12 }
0x125a   :  { %v1054_v39 = vpop.permute.xlu1 %1053 }
0x125b   :  { %1057 = vst.msk [vmem:[#allocation18 + $0x8] sm:$0xff] %vm152_vm0, %v1054_v39  ;;  %1570 = vmatmul.msk.f32.vlgmr.msrb.gmra.mxu1 %vm152_vm0, %v1054_v39 }
0x125c   :  { %1341 = vmatpush.msrb.mxu1 %v2201_v8 }
0x125e   :  { %1342 = vmatpush.msrb.mxu1 %v2203_v9 }
0x1260   :  { %1343 = vmatpush.msrb.mxu1 %v2208_v11 }
0x1262   :  { %1344 = vmatpush.msrb.mxu1 %v2212_v12 }
0x12d8   :  { %v1078_v42 = vpop.f32.mrf.mxu1 }
0x12d9   :  { %v1081_v43 = vadd.f32 %v1078_v42, %v898_v41 }
0x12db   :  { %1671 = vtanh.f32 %v1081_v43  ;;  %v1571_v45 = vmul.f32 -1.442695, %v1081_v43 }
0x12dd   :  { %1673 = vpow2.f32 %v1571_v45 }
0x12e1   :  { %v1672_v44 = vpop.eup %1671 }
0x12e2   :  { %1104 = vrot.lane.b32.xlu2 %v1672_v44, %s1989_s4 }
0x12e3   :  { %v1674_v46 = vpop.eup %1673 }
0x12e4   :  { %v1085_v47 = vadd.f32 1.0, %v1674_v46 }
0x12e6   :  { %1675 = vrcp.f32 %v1085_v47  ;;  %v1097_v53 = vand.u32 2147483648, %v1085_v47  ;;  %vm1091_vm10 = vweird.f32 %v1085_v47  ;;  %v1095_v54 = vand.u32 2147483647, %v1085_v47 }
0x12e8   :  { %v1098_v56 = vor.u32 1.1754944e-38, %v1097_v53  ;;  %vm1096_vm12 = vcmp.eq.f32.partialorder %v1095_v54, 8.507059e+37 }
0x12ec   :  { %v1676_v48 = vpop.eup %1675 }
0x12ed   :  { %v1087_v49 = vmul.f32 %v1676_v48, %v1085_v47  ;;  %vm1092_vm9 = vweird.f32 %v1676_v48 }
0x12ee   :  { %vm1093_vm11 = vmor %vm1091_vm10, %vm1092_vm9 }
0x12ef   :  { %v1088_v50 = vsub.f32 1.0, %v1087_v49 }
0x12f1   :  { %v1089_v51 = vmul.f32 %v1676_v48, %v1088_v50 }
0x12f3   :  { %v1090_v52 = vadd.f32 %v1676_v48, %v1089_v51 }
0x12f5   :  { %v1094_v55 = vsel %vm1093_vm11, %v1676_v48, %v1090_v52 }
0x12f6   :  { %v1099_v58 = vsel %vm1096_vm12, %v1098_v56, %v1094_v55 }
0x12f7   :  { %v1102_v60 = vmul.f32 %v1099_v58, %v1045_v35 }
0x133c   :  { %v1105_v57 = vpop.permute.xlu2 %1104 }
0x133d   :  { %v1107_v59 = vmul.f32 %v1105_v57, %v1099_v58 }
0x133f   :  { %1109 = vrot.lane.b32.xlu0 %v1107_v59, %s1990_s12 }
0x13b1   :  { %v1110_v63 = vpop.permute.xlu0 %1109 }
0x13b2   :  { %v1112_v1 = vadd.f32 %v1110_v63, %v1102_v60  ;;  %v883_v60 = vpop.f32.mrf.mxu3 }
0x13b3   :  { %v901_v63 = vadd.f32 %v2235_v0, %v883_v60 }
0x13b4   :  { %1677 = vtanh.f32 %v1112_v1 }
0x13ba   :  { %v1678_v3 = vpop.eup %1677 }
0x13bb   :  { %1115 = vrot.lane.b32.xlu1 %v1678_v3, %s1989_s4 }
0x142d   :  { %v1116_v4 = vpop.permute.xlu1 %1115 }
0x142e   :  { %v1118_v6 = vmul.f32 %v1116_v4, %v1099_v58 }
0x1430   :  { %1120 = vrot.lane.b32.xlu2 %v1118_v6, %s1990_s12 }
0x148a   :  { %v1121_v13 = vpop.permute.xlu2 %1120 }
0x148b   :  { %1124 = vst.msk [vmem:[#allocation18 + $0x10] sm:$0xff] %vm152_vm0, %v1121_v13  ;;  %1572 = vmatmul.msk.f32.vlgmr.msrb.gmra.mxu2 %vm152_vm0, %v1121_v13 }
0x148c   :  { %1408 = vmatpush.msrb.mxu2 %v2201_v8 }
0x148e   :  { %1409 = vmatpush.msrb.mxu2 %v2203_v9 }
0x1490   :  { %1410 = vmatpush.msrb.mxu2 %v2208_v11 }
0x1492   :  { %1411 = vmatpush.msrb.mxu2 %v2212_v12 }
0x150e   :  { %v1145_v15 = vpop.f32.mrf.mxu2 }
0x150f   :  { %v1148_v17 = vadd.f32 %v1145_v15, %v899_v14 }
0x1511   :  { %1679 = vtanh.f32 %v1148_v17  ;;  %v1573_v19 = vmul.f32 -1.442695, %v1148_v17 }
0x1513   :  { %1681 = vpow2.f32 %v1573_v19  ;;  %v232_v19 = vpop.f32.mrf.mxu0 }
0x1517   :  { %v1680_v18 = vpop.eup %1679 }
0x1518   :  { %1171 = vrot.lane.b32.xlu0 %v1680_v18, %s1989_s4 }
0x1519   :  { %v1682_v20 = vpop.eup %1681 }
0x151a   :  { %v1152_v2 = vadd.f32 1.0, %v1682_v20 }
0x151c   :  { %1683 = vrcp.f32 %v1152_v2  ;;  %v1164_v12 = vand.u32 2147483648, %v1152_v2  ;;  %vm1158_vm14 = vweird.f32 %v1152_v2  ;;  %v1162_v22 = vand.u32 2147483647, %v1152_v2 }
0x151e   :  { %v1165_v23 = vor.u32 1.1754944e-38, %v1164_v12  ;;  %vm1163_vm2 = vcmp.eq.f32.partialorder %v1162_v22, 8.507059e+37 }
0x1522   :  { %v1684_v8 = vpop.eup %1683 }
0x1523   :  { %v1154_v9 = vmul.f32 %v1684_v8, %v1152_v2  ;;  %vm1159_vm13 = vweird.f32 %v1684_v8 }
0x1524   :  { %vm1160_vm15 = vmor %vm1158_vm14, %vm1159_vm13 }
0x1525   :  { %v1155_v5 = vsub.f32 1.0, %v1154_v9  ;;  %v1727_v9 = vld [vmem:[%s2375_s3] ss:$0 sm:$0xff]  ;;  %s1991_s3 = smov 96  }
0x1527   :  { %v1156_v11 = vmul.f32 %v1684_v8, %v1155_v5  ;;  %v246_v5 = vadd.f32 %v1727_v9, %v232_v19 }
0x1529   :  { %v1157_v21 = vadd.f32 %v1684_v8, %v1156_v11  ;;  %v765_v12 = vadd.f32 %v2268_v16, %v246_v5 }
0x152b   :  { %v1161_v7 = vsel %vm1160_vm15, %v1684_v8, %v1157_v21 }
0x152c   :  { %v1166_v10 = vsel %vm1163_vm2, %v1165_v23, %v1161_v7 }
0x152d   :  { %v1169_v26 = vmul.f32 %v1166_v10, %v1112_v1 }
0x158a   :  { %v1172_v24 = vpop.permute.xlu0 %1171 }
0x158b   :  { %v1174_v25 = vmul.f32 %v1172_v24, %v1166_v10 }
0x158d   :  { %1176 = vrot.lane.b32.xlu1 %v1174_v25, %s1990_s12 }
0x15ff   :  { %v1177_v27 = vpop.permute.xlu1 %1176 }
0x1600   :  { %v1179_v28 = vadd.f32 %v1177_v27, %v1169_v26 }
0x1602   :  { %1685 = vtanh.f32 %v1179_v28 }
0x1608   :  { %v1686_v29 = vpop.eup %1685 }
0x1609   :  { %1182 = vrot.lane.b32.xlu2 %v1686_v29, %s1989_s4 }
0x1663   :  { %v1183_v30 = vpop.permute.xlu2 %1182 }
0x1664   :  { %v1185_v31 = vmul.f32 %v1183_v30, %v1166_v10 }
0x1666   :  { %1187 = vrot.lane.b32.xlu0 %v1185_v31, %s1990_s12 }
0x16d8   :  { %v1188_v32 = vpop.permute.xlu0 %1187 }
0x16d9   :  { %1191 = vst.msk [vmem:[#allocation18 + $0x18] sm:$0xff] %vm152_vm0, %v1188_v32  ;;  %1574 = vmatmul.msk.f32.vlgmr.msra.gmra.mxu1 %vm152_vm0, %v1188_v32 }
0x1756   :  { %v1212_v35 = vpop.f32.mrf.mxu1 }
0x1757   :  { %v1215_v36 = vadd.f32 %v1212_v35, %v900_v34 }
0x1759   :  { %1687 = vtanh.f32 %v1215_v36  ;;  %v1575_v38 = vmul.f32 -1.442695, %v1215_v36 }
0x175b   :  { %1689 = vpow2.f32 %v1575_v38 }
0x175f   :  { %v1688_v37 = vpop.eup %1687 }
0x1760   :  { %1238 = vrot.lane.b32.xlu1 %v1688_v37, %s1989_s4 }
0x1761   :  { %v1690_v39 = vpop.eup %1689 }
0x1762   :  { %v1219_v40 = vadd.f32 1.0, %v1690_v39 }
0x1764   :  { %1691 = vrcp.f32 %v1219_v40  ;;  %v1231_v46 = vand.u32 2147483648, %v1219_v40  ;;  %vm1225_vm4 = vweird.f32 %v1219_v40  ;;  %v1229_v47 = vand.u32 2147483647, %v1219_v40 }
0x1766   :  { %v1232_v49 = vor.u32 1.1754944e-38, %v1231_v46  ;;  %vm1230_vm1 = vcmp.eq.f32.partialorder %v1229_v47, 8.507059e+37 }
0x176a   :  { %v1692_v41 = vpop.eup %1691 }
0x176b   :  { %v1221_v42 = vmul.f32 %v1692_v41, %v1219_v40  ;;  %vm1226_vm3 = vweird.f32 %v1692_v41 }
0x176c   :  { %vm1227_vm5 = vmor %vm1225_vm4, %vm1226_vm3 }
0x176d   :  { %v1222_v43 = vsub.f32 1.0, %v1221_v42 }
0x176f   :  { %v1223_v44 = vmul.f32 %v1692_v41, %v1222_v43 }
0x1771   :  { %v1224_v45 = vadd.f32 %v1692_v41, %v1223_v44 }
0x1773   :  { %v1228_v48 = vsel %vm1227_vm5, %v1692_v41, %v1224_v45  ;;  %v886_v45 = vpop.f32.mrf.mxu3 }
0x1774   :  { %v1233_v51 = vsel %vm1230_vm1, %v1232_v49, %v1228_v48  ;;  %v902_v46 = vadd.f32 %v2235_v0, %v886_v45 }
0x1775   :  { %v1236_v53 = vmul.f32 %v1233_v51, %v1179_v28  ;;  %v1557_v28 = vmul.f32 -1.442695, %v765_v12 }
0x17d2   :  { %v1239_v50 = vpop.permute.xlu1 %1238 }
0x17d3   :  { %v1241_v52 = vmul.f32 %v1239_v50, %v1233_v51 }
0x17d5   :  { %1243 = vrot.lane.b32.xlu2 %v1241_v52, %s1990_s12 }
0x182f   :  { %v1244_v54 = vpop.permute.xlu2 %1243 }
0x1830   :  { %v1246_v55 = vadd.f32 %v1244_v54, %v1236_v53 }
0x1832   :  { %1693 = vtanh.f32 %v1246_v55 }
0x1838   :  { %v1694_v56 = vpop.eup %1693 }
0x1839   :  { %1249 = vrot.lane.b32.xlu0 %v1694_v56, %s1989_s4 }
0x18ab   :  { %v1250_v57 = vpop.permute.xlu0 %1249 }
0x18ac   :  { %v1252_v58 = vmul.f32 %v1250_v57, %v1233_v51 }
0x18ae   :  { %1254 = vrot.lane.b32.xlu1 %v1252_v58, %s1990_s12 }
0x1920   :  { %v1255_v59 = vpop.permute.xlu1 %1254 }
0x1921   :  { %1258 = vst.msk [vmem:[#allocation18 + $0x20] sm:$0xff] %vm152_vm0, %v1255_v59  ;;  %1576 = vmatmul.msk.f32.vlgmr.msra.gmra.mxu2 %vm152_vm0, %v1255_v59 }
0x19a4   :  { %v1279_v1 = vpop.f32.mrf.mxu2 }
0x19a5   :  { %v1282_v3 = vadd.f32 %v1279_v1, %v901_v63 }
0x19a7   :  { %1695 = vtanh.f32 %v1282_v3  ;;  %v1577_v6 = vmul.f32 -1.442695, %v1282_v3 }
0x19a9   :  { %1697 = vpow2.f32 %v1577_v6 }
0x19ad   :  { %v1696_v4 = vpop.eup %1695 }
0x19ae   :  { %1305 = vrot.lane.b32.xlu2 %v1696_v4, %s1989_s4 }
0x19af   :  { %v1698_v13 = vpop.eup %1697 }
0x19b0   :  { %v1286_v62 = vadd.f32 1.0, %v1698_v13 }
0x19b2   :  { %1699 = vrcp.f32 %v1286_v62  ;;  %v1298_v2 = vand.u32 2147483648, %v1286_v62  ;;  %vm1292_vm7 = vweird.f32 %v1286_v62  ;;  %v1296_v8 = vand.u32 2147483647, %v1286_v62 }
0x19b3   :  { %1701 = vtanh.f32 %v765_v12 }
0x19b4   :  { %v1299_v21 = vor.u32 1.1754944e-38, %v1298_v2  ;;  %vm1297_vm9 = vcmp.eq.f32.partialorder %v1296_v8, 8.507059e+37 }
0x19b8   :  { %v1700_v14 = vpop.eup %1699 }
0x19b9   :  { %v1288_v15 = vmul.f32 %v1700_v14, %v1286_v62  ;;  %vm1293_vm6 = vweird.f32 %v1700_v14  ;;  %v1702_v24 = vpop.eup %1701 }
0x19ba   :  { %vm1294_vm8 = vmor %vm1292_vm7, %vm1293_vm6 }
0x19bb   :  { %v1289_v17 = vsub.f32 1.0, %v1288_v15 }
0x19bd   :  { %v1290_v18 = vmul.f32 %v1700_v14, %v1289_v17 }
0x19bf   :  { %v1291_v20 = vadd.f32 %v1700_v14, %v1290_v18 }
0x19c1   :  { %v1295_v11 = vsel %vm1294_vm8, %v1700_v14, %v1291_v20 }
0x19c2   :  { %v1300_v7 = vsel %vm1297_vm9, %v1299_v21, %v1295_v11 }
0x19c3   :  { %v1303_v10 = vmul.f32 %v1300_v7, %v1246_v55 }
0x1a08   :  { %v1306_v22 = vpop.permute.xlu2 %1305 }
0x1a09   :  { %v1308_v23 = vmul.f32 %v1306_v22, %v1300_v7 }
0x1a0b   :  { %1310 = vrot.lane.b32.xlu0 %v1308_v23, %s1990_s12 }
0x1a13   :  { %788 = vrot.lane.b32.xlu0 %v1702_v24, %s1989_s4 }
0x1a7d   :  { %v1311_v25 = vpop.permute.xlu0 %1310 }
0x1a7e   :  { %v2315_v26 = vadd.f32 %v1311_v25, %v1303_v10 }
0x1a80   :  { %1703 = vtanh.f32 %v2315_v26 }
0x1a81   :  { %1705 = vpow2.f32 %v1557_v28 }
0x1a85   :  { %v789_v41 = vpop.permute.xlu0 %788 }
0x1a86   :  { %v1704_v27 = vpop.eup %1703 }
0x1a87   :  { %1316 = vrot.lane.b32.xlu1 %v1704_v27, %s1989_s4  ;;  %v1706_v16 = vpop.eup %1705 }
0x1a88   :  { %v769_v29 = vadd.f32 1.0, %v1706_v16 }
0x1a8a   :  { %1707 = vrcp.f32 %v769_v29  ;;  %v781_v37 = vand.u32 2147483648, %v769_v29  ;;  %vm775_vm11 = vweird.f32 %v769_v29  ;;  %v779_v38 = vand.u32 2147483647, %v769_v29 }
0x1a8c   :  { %v782_v40 = vor.u32 1.1754944e-38, %v781_v37  ;;  %vm780_vm13 = vcmp.eq.f32.partialorder %v779_v38, 8.507059e+37 }
0x1a90   :  { %v1708_v30 = vpop.eup %1707 }
0x1a91   :  { %v771_v31 = vmul.f32 %v1708_v30, %v769_v29  ;;  %vm776_vm10 = vweird.f32 %v1708_v30 }
0x1a92   :  { %vm777_vm12 = vmor %vm775_vm11, %vm776_vm10 }
0x1a93   :  { %v772_v32 = vsub.f32 1.0, %v771_v31 }
0x1a95   :  { %v773_v33 = vmul.f32 %v1708_v30, %v772_v32 }
0x1a97   :  { %v774_v35 = vadd.f32 %v1708_v30, %v773_v33 }
0x1a99   :  { %v778_v39 = vsel %vm777_vm12, %v1708_v30, %v774_v35 }
0x1a9a   :  { %v783_v42 = vsel %vm780_vm13, %v782_v40, %v778_v39 }
0x1a9b   :  { %v791_v43 = vmul.f32 %v789_v41, %v783_v42  ;;  %v786_v50 = vmul.f32 %v783_v42, %v2248_v61 }
0x1af9   :  { %v1317_v34 = vpop.permute.xlu1 %1316 }
0x1afa   :  { %v1319_v36 = vmul.f32 %v1317_v34, %v1300_v7 }
0x1afc   :  { %1321 = vrot.lane.b32.xlu2 %v1319_v36, %s1990_s12 }
0x1b04   :  { %793 = vrot.lane.b32.xlu2 %v791_v43, %s1990_s12 }
0x1b56   :  { %v1322_v44 = vpop.permute.xlu2 %1321 }
0x1b57   :  { %1325 = vst.msk [vmem:[#allocation18 + $0x28] sm:$0xff] %vm152_vm0, %v1322_v44  ;;  %1578 = vmatmul.msk.f32.vlgmr.msrb.gmra.mxu1 %vm152_vm0, %v1322_v44 }
0x1b5e   :  { %v794_v49 = vpop.permute.xlu2 %793 }
0x1b5f   :  { %v2325_v51 = vadd.f32 %v794_v49, %v786_v50 }
0x1bd4   :  { %v1346_v47 = vpop.f32.mrf.mxu1 }
0x1bd5   :  { %v1349_v48 = vadd.f32 %v1346_v47, %v902_v46 }
0x1bd7   :  { %1709 = vtanh.f32 %v1349_v48  ;;  %v1579_v54 = vmul.f32 -1.442695, %v1349_v48 }
0x1bd8   :  { %1711 = vtanh.f32 %v2325_v51 }
0x1bd9   :  { %1713 = vpow2.f32 %v1579_v54 }
0x1bdd   :  { %v1710_v52 = vpop.eup %1709 }
0x1bde   :  { %1372 = vrot.lane.b32.xlu1 %v1710_v52, %s1989_s4  ;;  %v1712_v53 = vpop.eup %1711 }
0x1bdf   :  { %v1714_v55 = vpop.eup %1713 }
0x1be0   :  { %v1353_v56 = vadd.f32 1.0, %v1714_v55 }
0x1be2   :  { %1715 = vrcp.f32 %v1353_v56  ;;  %v1365_v63 = vand.u32 2147483648, %v1353_v56  ;;  %vm1359_vm15 = vweird.f32 %v1353_v56  ;;  %v1363_v1 = vand.u32 2147483647, %v1353_v56 }
0x1be4   :  { %v1366_v4 = vor.u32 1.1754944e-38, %v1365_v63  ;;  %vm1364_vm3 = vcmp.eq.f32.partialorder %v1363_v1, 8.507059e+37 }
0x1be6   :  { %799 = vrot.lane.b32.xlu1 %v1712_v53, %s1989_s4 }
0x1be8   :  { %v1716_v57 = vpop.eup %1715 }
0x1be9   :  { %v1355_v58 = vmul.f32 %v1716_v57, %v1353_v56  ;;  %vm1360_vm14 = vweird.f32 %v1716_v57 }
0x1bea   :  { %vm1361_vm2 = vmor %vm1359_vm15, %vm1360_vm14 }
0x1beb   :  { %v1356_v59 = vsub.f32 1.0, %v1355_v58 }
0x1bed   :  { %v1357_v60 = vmul.f32 %v1716_v57, %v1356_v59 }
0x1bef   :  { %v1358_v61 = vadd.f32 %v1716_v57, %v1357_v60 }
0x1bf1   :  { %v1362_v3 = vsel %vm1361_vm2, %v1716_v57, %v1358_v61 }
0x1bf2   :  { %v1367_v13 = vsel %vm1364_vm3, %v1366_v4, %v1362_v3 }
0x1bf3   :  { %v1370_v17 = vmul.f32 %v1367_v13, %v2315_v26 }
0x1c50   :  { %v1373_v6 = vpop.permute.xlu1 %1372 }
0x1c51   :  { %v1375_v62 = vmul.f32 %v1373_v6, %v1367_v13 }
0x1c53   :  { %1377 = vrot.lane.b32.xlu0 %v1375_v62, %s1990_s12 }
0x1c58   :  { %v800_v14 = vpop.permute.xlu1 %799 }
0x1c59   :  { %v802_v15 = vmul.f32 %v800_v14, %v783_v42 }
0x1c5b   :  { %804 = vrot.lane.b32.xlu0 %v802_v15, %s1990_s12 }
0x1cc5   :  { %v1378_v18 = vpop.permute.xlu0 %1377 }
0x1cc6   :  { %v1380_v19 = vadd.f32 %v1378_v18, %v1370_v17 }
0x1cc8   :  { %1717 = vtanh.f32 %v1380_v19 }
0x1ccd   :  { %v805_v20 = vpop.permute.xlu0 %804 }
0x1cce   :  { %v1718_v2 = vpop.eup %1717  ;;  %808 = vst.msk [vmem:[#allocation5 + $0x38] sm:$0xff] %vm152_vm0, %v805_v20 }
0x1ccf   :  { %809 = vst.msk [vmem:[#allocation2] sm:$0xff] %vm152_vm0, %v805_v20  ;;  %1383 = vrot.lane.b32.xlu2 %v1718_v2, %s1989_s4 }
0x1cd5   :  { %v822_v8 = vld [vmem:[#allocation5 + $0x38] sm:$0xff] }
0x1cd6   :  { %1565 = vmatmul.msk.f32.gmra.mxu3 %vm152_vm0, %v822_v8  ;;  %v1469_v9 = vld [vmem:[#allocation2] sm:$0xff] }
0x1cd7   :  { %1471 = vst.msk [vmem:[#allocation19] sm:$0xff] %vm152_vm0, %v1469_v9 }
0x1d29   :  { %v1384_v5 = vpop.permute.xlu2 %1383 }
0x1d2a   :  { %v1386_v11 = vmul.f32 %v1384_v5, %v1367_v13 }
0x1d2c   :  { %1388 = vrot.lane.b32.xlu1 %v1386_v11, %s1990_s12 }
0x1d59   :  { %v889_v12 = vpop.f32.mrf.mxu3 }
0x1d5a   :  { %v903_v22 = vadd.f32 %v2235_v0, %v889_v12 }
0x1d9e   :  { %v1389_v21 = vpop.permute.xlu1 %1388 }
0x1d9f   :  { %1392 = vst.msk [vmem:[#allocation18 + $0x30] sm:$0xff] %vm152_vm0, %v1389_v21  ;;  %1580 = vmatmul.msk.f32.vlgmr.msrb.gmra.mxu2 %vm152_vm0, %v1389_v21 }
0x1e22   :  { %v1413_v7 = vpop.f32.mrf.mxu2 }
0x1e23   :  { %v1416_v23 = vadd.f32 %v1413_v7, %v903_v22 }
0x1e25   :  { %1719 = vtanh.f32 %v1416_v23  ;;  %v1581_v10 = vmul.f32 -1.442695, %v1416_v23 }
0x1e27   :  { %1721 = vpow2.f32 %v1581_v10 }
0x1e2b   :  { %v1720_v24 = vpop.eup %1719 }
0x1e2c   :  { %1439 = vrot.lane.b32.xlu2 %v1720_v24, %s1989_s4 }
0x1e2d   :  { %v1722_v25 = vpop.eup %1721 }
0x1e2e   :  { %v1420_v26 = vadd.f32 1.0, %v1722_v25 }
0x1e30   :  { %1723 = vrcp.f32 %v1420_v26  ;;  %v1432_v31 = vand.u32 2147483648, %v1420_v26  ;;  %vm1426_vm5 = vweird.f32 %v1420_v26  ;;  %v1430_v0 = vand.u32 2147483647, %v1420_v26 }
0x1e32   :  { %v1433_v33 = vor.u32 1.1754944e-38, %v1432_v31  ;;  %vm1431_vm6 = vcmp.eq.f32.partialorder %v1430_v0, 8.507059e+37 }
0x1e36   :  { %v1724_v27 = vpop.eup %1723 }
0x1e37   :  { %v1422_v28 = vmul.f32 %v1724_v27, %v1420_v26  ;;  %vm1427_vm4 = vweird.f32 %v1724_v27 }
0x1e38   :  { %vm1428_vm1 = vmor %vm1426_vm5, %vm1427_vm4 }
0x1e39   :  { %v1423_v16 = vsub.f32 1.0, %v1422_v28 }
0x1e3b   :  { %v1424_v29 = vmul.f32 %v1724_v27, %v1423_v16 }
0x1e3d   :  { %v1425_v30 = vadd.f32 %v1724_v27, %v1424_v29 }
0x1e3f   :  { %v1429_v32 = vsel %vm1428_vm1, %v1724_v27, %v1425_v30 }
0x1e40   :  { %v1434_v35 = vsel %vm1431_vm6, %v1433_v33, %v1429_v32 }
0x1e41   :  { %v1437_v37 = vmul.f32 %v1434_v35, %v1380_v19 }
0x1e86   :  { %v1440_v34 = vpop.permute.xlu2 %1439 }
0x1e87   :  { %v1442_v36 = vmul.f32 %v1440_v34, %v1434_v35 }
0x1e89   :  { %1444 = vrot.lane.b32.xlu0 %v1442_v36, %s1990_s12 }
0x1e91   :  { %811 = vrot.lane.b32.xlu0 %v2325_v51, %s1991_s3 }
0x1efb   :  { %v1445_v38 = vpop.permute.xlu0 %1444 }
0x1efc   :  { %v1447_v39 = vadd.f32 %v1445_v38, %v1437_v37 }
0x1efe   :  { %1725 = vtanh.f32 %v1447_v39 }
0x1f03   :  { %v812_v40 = vpop.permute.xlu0 %811 }
0x1f04   :  { %v1726_v41 = vpop.eup %1725  ;;  %814 = vst.msk [vmem:[#allocation3] sm:$0xff] %vm152_vm0, %v812_v40 }
0x1f05   :  { %1450 = vrot.lane.b32.xlu1 %v1726_v41, %s1989_s4 }
0x1f0b   :  { %v1473_v42 = vld [vmem:[#allocation3] sm:$0xff] }
0x1f0c   :  { %1475 = vst.msk [vmem:[#allocation21] sm:$0xff] %vm152_vm0, %v1473_v42 }
0x1f0d   :  { %1462 = vrot.lane.b32.xlu1 %v1447_v39, %s1991_s3 }
0x1f77   :  { %v1451_v43 = vpop.permute.xlu1 %1450 }
0x1f78   :  { %v1453_v44 = vmul.f32 %v1451_v43, %v1434_v35 }
0x1f7a   :  { %1455 = vrot.lane.b32.xlu2 %v1453_v44, %s1990_s12 }
0x1f7f   :  { %v1463_v45 = vpop.permute.xlu1 %1462 }
0x1f80   :  { %1465 = vst.msk [vmem:[#allocation3 + $0x8] sm:$0xff] %vm152_vm0, %v1463_v45 }
0x1f87   :  { %v1474_v46 = vld [vmem:[#allocation3 + $0x8] sm:$0xff] }
0x1f88   :  { %1476 = vst.msk [vmem:[#allocation21 + $0x8] sm:$0xff] %vm152_vm0, %v1474_v46 }
0x1fd4   :  { %v1456_v47 = vpop.permute.xlu2 %1455 }
0x1fd5   :  { %1459 = vst.msk [vmem:[#allocation18 + $0x38] sm:$0xff] %vm152_vm0, %v1456_v47 }
0x1fd6   :  { %1460 = vst.msk [vmem:[#allocation2 + $0x8] sm:$0xff] %vm152_vm0, %v1456_v47  ;;  %1489 = dma.vmem_to_hbm [thread:$0]  %s1482_s7, 1024, %s1484_s19, [#allocation8], %s1981_s25, %s1981_s25, %s1982_s26  }
0x1fdd   :  { %v1470_v48 = vld [vmem:[#allocation2 + $0x8] sm:$0xff] }
0x1fde   :  { %1472 = vst.msk [vmem:[#allocation19 + $0x8] sm:$0xff] %vm152_vm0, %v1470_v48 }
0x1fdf   :  { %1502 = dma.vmem_to_hbm [thread:$0]  %s1495_s20, 256, %s1497_s23, [#allocation20], %s1981_s25, %s1981_s25, %s1982_s26  }
0x1fe0   :  { %1515 = dma.vmem_to_hbm [thread:$0]  %s1508_s2, 256, %s1510_s28, [#allocation20], %s1981_s25, %s1981_s25, %s1982_s26  }
0x1fe1   :  { %1976 = dma.done.wait [#allocation8], 1024  }
0x1fe2   :  { %1977 = vsyncadd [#allocation8], 4294966272 }
0x1fe3   :  { %1978 = dma.done.wait [#allocation20], 512  }
0x1fe4   :  { %1979 = vsyncadd [#allocation20], 4294966784 }
0x1fe5   :  { %1528 = vsyncpa [#allocation7], 1 }
0x1fe6   :  { %1529 = vsyncpa [#allocation10], 1 }
0x1fe7   :  { %1530 = vsyncpa [#allocation13], 1 }
0x1fe8   :  { %1531 = vsyncpa [#allocation16], 1 }
0x1fe9   :  { %1532 = vsyncpa [#allocation8], 1 }
0x1fea   :  { %1533 = vsyncpa [#allocation20], 1 }

// kernel: tpu_custom_call.1
= control target key start
LH: loop header
LB: loop body
LE: loop exit
PB: predicated region body
PF: predicated region fallthrough
CT: control target
= control target key end

     0   :  { %17 = vsyncpa [#allocation7], 0  ;;  %s2372_s0 = inlined_call_operand.hbm [shape: f32[8,8,16], index: 0, kind: input, shape index: {}]   ;;  %s2373_s1 = inlined_call_operand.hbm [shape: f32[16,128], index: 1, kind: input, shape index: {}]   ;;  %s2374_s2 = inlined_call_operand.hbm [shape: f32[32,128], index: 2, kind: input, shape index: {}]   ;;  %s2375_s3 = inlined_call_operand.vmem [shape: f32[1,128], index: 3, kind: input, shape index: {}]   ;;  %s2376_s4 = inlined_call_operand.hbm [shape: f32[32,128], index: 4, kind: input, shape index: {}]   ;;  %s2377_s5 = inlined_call_operand.hbm [shape: f32[32,128], index: 5, kind: input, shape index: {}]   ;;  %s2378_s6 = inlined_call_operand.vmem [shape: f32[1,128], index: 6, kind: input, shape index: {}]   ;;  %s2379_s7 = inlined_call_operand.hbm [shape: f32[2,8,32], index: 7, kind: input, shape index: {}]   ;;  %s2380_s8 = inlined_call_operand.hbm [shape: f32[2,8,32], index: 8, kind: input, shape index: {}]   ;;  %s2381_s9 = inlined_call_operand.hbm [shape: f32[8,8,32], index: 9, kind: output, shape index: {0}]   ;;  %s2382_s10 = inlined_call_operand.hbm [shape: f32[2,8,32], index: 10, kind: output, shape index: {1}]   ;;  %s2383_s11 = inlined_call_operand.hbm [shape: f32[2,8,32], index: 11, kind: output, shape index: {2}]  }
   0x1   :  { %18 = vsyncpa [#allocation10], 0 }
   0x2   :  { %19 = vsyncpa [#allocation13], 0 }
   0x3   :  { %20 = vsyncpa [#allocation16], 0 }
   0x4   :  { %21 = vsyncpa [#allocation8], 0 }
   0x5   :  { %22 = vsyncpa [#allocation20], 0  ;;  %s40_s19 = sshll.u32 %s2373_s1, 4  ;;  %s1980_s20 = smov [#allocation9]   ;;  %s41_s19 = int_to_ptr.hbm [resolvable:$true] %s40_s19 }
   0x6   :  { %s42_s21 = sshll.u32 %s1980_s20, 4  ;;  %s68_s24 = sshll.u32 %s2376_s4, 4  ;;  %s43_s21 = int_to_ptr.vmem [resolvable:$true] %s42_s21  ;;  %s69_s24 = int_to_ptr.hbm [resolvable:$true] %s68_s24 }
   0x7   :  { %s1981_s25 = smov 128   ;;  %s1982_s26 = smov 8  }
   0x8   :  { %48 = dma.hbm_to_vmem [thread:$0]  %s41_s19, 256, %s43_s21, [#allocation10], %s1981_s25, %s1981_s25, %s1982_s26  }
   0x9   :  { %s1983_s27 = smov [#allocation12]   ;;  %s96_s1 = sshll.u32 %s2379_s7, 4  ;;  %s97_s1 = int_to_ptr.hbm [resolvable:$true] %s96_s1 }
   0xa   :  { %s70_s28 = sshll.u32 %s1983_s27, 4  ;;  %s27_s13 = sshll.u32 %s2372_s0, 4  ;;  %s71_s28 = int_to_ptr.vmem [resolvable:$true] %s70_s28  ;;  %s28_s13 = int_to_ptr.hbm [resolvable:$true] %s27_s13 }
   0xb   :  { %76 = dma.hbm_to_vmem [thread:$0]  %s69_s24, 512, %s71_s28, [#allocation13], %s1981_s25, %s1981_s25, %s1982_s26  }
   0xc   :  { %s1984_s14 = smov [#allocation15]   ;;  %s1985_s16 = smov [#allocation6]  }
   0xd   :  { %s98_s15 = sshll.u32 %s1984_s14, 4  ;;  %s29_s7 = sshll.u32 %s1985_s16, 4  ;;  %s99_s15 = int_to_ptr.vmem [resolvable:$true] %s98_s15  ;;  %s30_s7 = int_to_ptr.vmem [resolvable:$true] %s29_s7 }
   0xe   :  { %104 = dma.hbm_to_vmem [thread:$0]  %s97_s1, 256, %s99_s15, [#allocation16], %s1981_s25, %s1981_s25, %s1982_s26  }
   0xf   :  { %s53_s19 = sshll.u32 %s2374_s2, 4  ;;  %s81_s21 = sshll.u32 %s2377_s5, 4  ;;  %s54_s19 = int_to_ptr.hbm [resolvable:$true] %s53_s19  ;;  %s82_s21 = int_to_ptr.hbm [resolvable:$true] %s81_s21 }
  0x10   :  { %35 = dma.hbm_to_vmem [thread:$0]  %s28_s13, 1024, %s30_s7, [#allocation7], %s1981_s25, %s1981_s25, %s1982_s26  }
  0x11   :  { %s1986_s22 = smov [#allocation11]   ;;  %s1987_s24 = smov [#allocation14]  }
  0x12   :  { %s55_s23 = sshll.u32 %s1986_s22, 4  ;;  %s83_s2 = sshll.u32 %s1987_s24, 4  ;;  %s56_s23 = int_to_ptr.vmem [resolvable:$true] %s55_s23  ;;  %s84_s2 = int_to_ptr.vmem [resolvable:$true] %s83_s2 }
  0x13   :  { %61 = dma.hbm_to_vmem [thread:$0]  %s54_s19, 512, %s56_s23, [#allocation10], %s1981_s25, %s1981_s25, %s1982_s26  }
  0x14   :  { %s109_s29 = sshll.u32 %s2380_s8, 4  ;;  %s1988_s5 = smov [#allocation17]   ;;  %s110_s29 = int_to_ptr.hbm [resolvable:$true] %s109_s29 }
  0x15   :  { %89 = dma.hbm_to_vmem [thread:$0]  %s82_s21, 512, %s84_s2, [#allocation13], %s1981_s25, %s1981_s25, %s1982_s26  }
  0x16   :  { %s111_s30 = sshll.u32 %s1988_s5, 4  ;;  %s112_s30 = int_to_ptr.vmem [resolvable:$true] %s111_s30 }
  0x17   :  { %117 = dma.hbm_to_vmem [thread:$0]  %s110_s29, 256, %s112_s30, [#allocation16], %s1981_s25, %s1981_s25, %s1982_s26  }
  0x18   :  { %1968 = dma.done.wait [#allocation7], 1024  }
  0x19   :  { %1969 = vsyncadd [#allocation7], 4294966272 }
  0x1a   :  { %1970 = dma.done.wait [#allocation10], 768  }
  0x1b   :  { %1971 = vsyncadd [#allocation10], 4294966528 }
  0x1c   :  { %1972 = dma.done.wait [#allocation13], 1024  }
  0x1d   :  { %1973 = vsyncadd [#allocation13], 4294966272 }
  0x1e   :  { %1974 = dma.done.wait [#allocation16], 512  }
  0x1f   :  { %1975 = vsyncadd [#allocation16], 4294966784  ;;  %v2097_v0 = vld [vmem:[#allocation11 + $0x18] sm:$0xff]  ;;  %v2099_v2 = vld [vmem:[#allocation11 + $0x10] sm:$0xff]  ;;  %vm152_vm0 = vcmask 261120   ;;  %vm169_vm1 = vcmask 130048  }
  0x20   :  { %v168_v1 = vld [vmem:[#allocation9 + $0x8] sm:$0xff]  ;;  %278 = vmatpush.msra.mxu1 %v2097_v0  ;;  %v167_v3 = vld [vmem:[#allocation9] sm:$0xff]  ;;  %v2102_v5 = vld [vmem:[#allocation11 + $0x8] sm:$0xff]  ;;  %349 = vmatpush.msra.mxu2 %v2097_v0  ;;  %s1989_s4 = smov 64   ;;  %s1990_s12 = smov 32  }
  0x21   :  { %208 = vmatpush.msra.mxu0 %v168_v1  ;;  %v159_v4 = vld [vmem:[#allocation6] sm:$0xff]  ;;  %v150_v6 = vld [vmem:[#allocation15] sm:$0xff]  ;;  %v826_v39 = vld [vmem:[#allocation12 + $0x18] sm:$0xff]  ;;  %s1992_s16 = smov [#allocation18]   ;;  %s1483_s19 = sshll.u32 %s2381_s9, 4  ;;  %s1484_s19 = int_to_ptr.hbm [resolvable:$true] %s1483_s19 }
  0x22   :  { %279 = vmatpush.msra.mxu1 %v2099_v2  ;;  %153 = vst.msk [vmem:[#allocation2] sm:$0xff] %vm152_vm0, %v150_v6  ;;  %v2108_v7 = vld [vmem:[#allocation11] sm:$0xff]  ;;  %350 = vmatpush.msra.mxu2 %v2099_v2  ;;  %v155_v9 = vld [vmem:[#allocation17] sm:$0xff]  ;;  %v160_v41 = vld [vmem:[#allocation6 + $0x8] sm:$0xff]  ;;  %s1481_s7 = sshll.u32 %s1992_s16, 4  ;;  %s1993_s0 = smov [#allocation19]   ;;  %s1482_s7 = int_to_ptr.vmem [resolvable:$true] %s1481_s7 }
  0x23   :  { %209 = vmatpush.msra.mxu0 %v167_v3  ;;  %157 = vst.msk [vmem:[#allocation3] sm:$0xff] %vm152_vm0, %v155_v9  ;;  %v2132_v10 = vld [vmem:[%s2375_s3] ss:$0 sm:$0xff]  ;;  %863 = vmatpush.msra.mxu3 %v826_v39  ;;  %v824_v42 = vld [vmem:[#allocation12 + $0x8] sm:$0xff]  ;;  %v823_v43 = vld [vmem:[#allocation12] sm:$0xff]  ;;  %s1494_s20 = sshll.u32 %s1993_s0, 4  ;;  %s1495_s20 = int_to_ptr.vmem [resolvable:$true] %s1494_s20 }
  0x24   :  { %1534 = vmatmul.msk.f32.vlgmr.msra.gmra.mxu0 %vm169_vm1, %v159_v4  ;;  %280 = vmatpush.msra.mxu1 %v2102_v5  ;;  %v825_v40 = vld [vmem:[#allocation12 + $0x10] sm:$0xff]  ;;  %s1496_s23 = sshll.u32 %s2382_s10, 4  ;;  %s1994_s24 = smov [#allocation21]   ;;  %s1497_s23 = int_to_ptr.hbm [resolvable:$true] %s1496_s23 }
  0x25   :  { %351 = vmatpush.msra.mxu2 %v2102_v5  ;;  %864 = vmatpush.msra.mxu3 %v825_v40  ;;  %v162_v40 = vld [vmem:[#allocation6 + $0x18] sm:$0xff]  ;;  %s1507_s2 = sshll.u32 %s1994_s24, 4  ;;  %s1509_s28 = sshll.u32 %s2383_s11, 4  ;;  %s1508_s2 = int_to_ptr.vmem [resolvable:$true] %s1507_s2  ;;  %s1510_s28 = int_to_ptr.hbm [resolvable:$true] %s1509_s28 }
  0x26   :  { %281 = vmatpush.msra.mxu1 %v2108_v7 }
  0x27   :  { %352 = vmatpush.msra.mxu2 %v2108_v7  ;;  %865 = vmatpush.msra.mxu3 %v824_v42 }
  0x28   :  { %417 = vmatpush.msrb.mxu1 %v2097_v0 }
  0x29   :  { %553 = vmatpush.msrb.mxu2 %v2097_v0  ;;  %v259_v8 = vld [vmem:[#allocation2] sm:$0xff]  ;;  %866 = vmatpush.msra.mxu3 %v823_v43 }
  0x2a   :  { %418 = vmatpush.msrb.mxu1 %v2099_v2  ;;  %v260_v16 = vld [vmem:[#allocation3] sm:$0xff] }
  0x2b   :  { %1542 = vmatmul.msk.f32.vlgmr.msra.gmra.mxu1 %vm152_vm0, %v259_v8  ;;  %554 = vmatpush.msrb.mxu2 %v2099_v2 }
  0x2c   :  { %419 = vmatpush.msrb.mxu1 %v2102_v5  ;;  %1535 = vmatmul.msk.f32.gmra.mxu0 %vm169_vm1, %v160_v41 }
  0x2d   :  { %555 = vmatpush.msrb.mxu2 %v2102_v5 }
  0x2e   :  { %420 = vmatpush.msrb.mxu1 %v2108_v7 }
  0x2f   :  { %556 = vmatpush.msrb.mxu2 %v2108_v7 }
  0x30   :  { %485 = vmatpush.msra.mxu1 %v2097_v0 }
  0x32   :  { %486 = vmatpush.msra.mxu1 %v2099_v2 }
  0x34   :  { %487 = vmatpush.msra.mxu1 %v2102_v5 }
  0x36   :  { %488 = vmatpush.msra.mxu1 %v2108_v7 }
  0xa1   :  { %v211_v11 = vpop.f32.mrf.mxu0 }
  0xa2   :  { %v239_v12 = vadd.f32 %v2132_v10, %v211_v11  ;;  %v161_v11 = vld [vmem:[#allocation6 + $0x10] sm:$0xff] }
  0xa3   :  { %1536 = vmatmul.msk.f32.gmra.mxu0 %vm169_vm1, %v161_v11 }
  0xa8   :  { %v283_v13 = vpop.f32.mrf.mxu1 }
  0xa9   :  { %v286_v14 = vadd.f32 %v283_v13, %v239_v12  ;;  %v214_v46 = vpop.f32.mrf.mxu0 }
  0xaa   :  { %v240_v47 = vadd.f32 %v2132_v10, %v214_v46 }
  0xab   :  { %1599 = vtanh.f32 %v286_v14  ;;  %v1543_v17 = vmul.f32 -1.442695, %v286_v14  ;;  %1537 = vmatmul.msk.f32.gmra.mxu0 %vm169_vm1, %v162_v40 }
  0xad   :  { %1601 = vpow2.f32 %v1543_v17 }
  0xb1   :  { %v1600_v15 = vpop.eup %1599 }
  0xb2   :  { %313 = vrot.lane.b32.xlu0 %v1600_v15, %s1989_s4 }
  0xb3   :  { %v1602_v18 = vpop.eup %1601 }
  0xb4   :  { %v290_v19 = vadd.f32 1.0, %v1602_v18 }
  0xb6   :  { %1603 = vrcp.f32 %v290_v19  ;;  %v302_v25 = vand.u32 2147483648, %v290_v19  ;;  %vm296_vm3 = vweird.f32 %v290_v19  ;;  %v300_v26 = vand.u32 2147483647, %v290_v19 }
  0xb8   :  { %v303_v28 = vor.u32 1.1754944e-38, %v302_v25  ;;  %vm301_vm5 = vcmp.eq.f32.partialorder %v300_v26, 8.507059e+37 }
  0xba   :  { %308 = vrot.lane.b32.xlu0 %v260_v16, %s1990_s12 }
  0xbc   :  { %v1604_v20 = vpop.eup %1603 }
  0xbd   :  { %v292_v21 = vmul.f32 %v1604_v20, %v290_v19  ;;  %vm297_vm2 = vweird.f32 %v1604_v20 }
  0xbe   :  { %vm298_vm4 = vmor %vm296_vm3, %vm297_vm2 }
  0xbf   :  { %v293_v22 = vsub.f32 1.0, %v292_v21 }
  0xc1   :  { %v294_v23 = vmul.f32 %v1604_v20, %v293_v22 }
  0xc3   :  { %v295_v24 = vadd.f32 %v1604_v20, %v294_v23 }
  0xc5   :  { %v299_v27 = vsel %vm298_vm4, %v1604_v20, %v295_v24 }
  0xc6   :  { %v304_v30 = vsel %vm301_vm5, %v303_v28, %v299_v27 }
 0x120   :  { %v217_v16 = vpop.f32.mrf.mxu0 }
 0x121   :  { %v241_v17 = vadd.f32 %v2132_v10, %v217_v16 }
 0x124   :  { %v314_v29 = vpop.permute.xlu0 %313 }
 0x125   :  { %v316_v31 = vmul.f32 %v314_v29, %v304_v30 }
 0x127   :  { %318 = vrot.lane.b32.xlu1 %v316_v31, %s1990_s12 }
 0x12c   :  { %v309_v32 = vpop.permute.xlu0 %308 }
 0x12d   :  { %v311_v33 = vmul.f32 %v309_v32, %v304_v30 }
 0x199   :  { %v319_v34 = vpop.permute.xlu1 %318 }
 0x19a   :  { %v321_v35 = vadd.f32 %v319_v34, %v311_v33 }
 0x19c   :  { %1605 = vtanh.f32 %v321_v35 }
 0x1a2   :  { %v1606_v36 = vpop.eup %1605 }
 0x1a3   :  { %324 = vrot.lane.b32.xlu1 %v1606_v36, %s1989_s4 }
 0x215   :  { %v325_v37 = vpop.permute.xlu1 %324 }
 0x216   :  { %v327_v38 = vmul.f32 %v325_v37, %v304_v30 }
 0x218   :  { %329 = vrot.lane.b32.xlu2 %v327_v38, %s1990_s12 }
 0x272   :  { %v330_v44 = vpop.permute.xlu2 %329 }
 0x273   :  { %332 = vst.msk [vmem:[#allocation5] sm:$0xff] %vm152_vm0, %v330_v44  ;;  %1544 = vmatmul.msk.f32.vlgmr.msra.gmra.mxu2 %vm152_vm0, %v330_v44 }
 0x274   :  { %621 = vmatpush.msra.mxu2 %v2097_v0 }
 0x276   :  { %622 = vmatpush.msra.mxu2 %v2099_v2 }
 0x278   :  { %623 = vmatpush.msra.mxu2 %v2102_v5 }
 0x27a   :  { %v815_v45 = vld [vmem:[#allocation5] sm:$0xff]  ;;  %624 = vmatpush.msra.mxu2 %v2108_v7 }
 0x27b   :  { %1558 = vmatmul.msk.f32.vlgmr.msra.gmra.mxu3 %vm152_vm0, %v815_v45  ;;  %v220_v45 = vpop.f32.mrf.mxu0 }
 0x27c   :  { %v242_v46 = vadd.f32 %v2132_v10, %v220_v45 }
 0x2f6   :  { %v354_v48 = vpop.f32.mrf.mxu2 }
 0x2f7   :  { %v357_v49 = vadd.f32 %v354_v48, %v240_v47 }
 0x2f9   :  { %1607 = vtanh.f32 %v357_v49  ;;  %v1545_v51 = vmul.f32 -1.442695, %v357_v49 }
 0x2fb   :  { %1609 = vpow2.f32 %v1545_v51 }
 0x2ff   :  { %v1608_v50 = vpop.eup %1607 }
 0x300   :  { %380 = vrot.lane.b32.xlu2 %v1608_v50, %s1989_s4 }
 0x301   :  { %v1610_v52 = vpop.eup %1609 }
 0x302   :  { %v361_v53 = vadd.f32 1.0, %v1610_v52 }
 0x304   :  { %1611 = vrcp.f32 %v361_v53  ;;  %v373_v59 = vand.u32 2147483648, %v361_v53  ;;  %vm367_vm7 = vweird.f32 %v361_v53  ;;  %v371_v60 = vand.u32 2147483647, %v361_v53 }
 0x306   :  { %v374_v62 = vor.u32 1.1754944e-38, %v373_v59  ;;  %vm372_vm9 = vcmp.eq.f32.partialorder %v371_v60, 8.507059e+37 }
 0x30a   :  { %v1612_v54 = vpop.eup %1611 }
 0x30b   :  { %v363_v55 = vmul.f32 %v1612_v54, %v361_v53  ;;  %vm368_vm6 = vweird.f32 %v1612_v54 }
 0x30c   :  { %vm369_vm8 = vmor %vm367_vm7, %vm368_vm6 }
 0x30d   :  { %v364_v56 = vsub.f32 1.0, %v363_v55 }
 0x30f   :  { %v365_v57 = vmul.f32 %v1612_v54, %v364_v56 }
 0x311   :  { %v366_v58 = vadd.f32 %v1612_v54, %v365_v57 }
 0x313   :  { %v370_v61 = vsel %vm369_vm8, %v1612_v54, %v366_v58 }
 0x314   :  { %v375_v1 = vsel %vm372_vm9, %v374_v62, %v370_v61 }
 0x315   :  { %v378_v4 = vmul.f32 %v375_v1, %v321_v35 }
 0x35a   :  { %v381_v63 = vpop.permute.xlu2 %380 }
 0x35b   :  { %v383_v3 = vmul.f32 %v381_v63, %v375_v1 }
 0x35d   :  { %385 = vrot.lane.b32.xlu0 %v383_v3, %s1990_s12 }
 0x3cf   :  { %v386_v6 = vpop.permute.xlu0 %385 }
 0x3d0   :  { %v388_v8 = vadd.f32 %v386_v6, %v378_v4 }
 0x3d2   :  { %1613 = vtanh.f32 %v388_v8 }
 0x3d8   :  { %v1614_v9 = vpop.eup %1613 }
 0x3d9   :  { %391 = vrot.lane.b32.xlu1 %v1614_v9, %s1989_s4 }
 0x44b   :  { %v392_v12 = vpop.permute.xlu1 %391 }
 0x44c   :  { %v394_v13 = vmul.f32 %v392_v12, %v375_v1  ;;  %v163_v12 = vld [vmem:[#allocation6 + $0x20] sm:$0xff] }
 0x44d   :  { %1538 = vmatmul.msk.f32.gmra.mxu0 %vm169_vm1, %v163_v12  ;;  %v2212_v12 = vld [vmem:[#allocation14] sm:$0xff] }
 0x44e   :  { %396 = vrot.lane.b32.xlu2 %v394_v13, %s1990_s12 }
 0x4a8   :  { %v397_v14 = vpop.permute.xlu2 %396 }
 0x4a9   :  { %400 = vst.msk [vmem:[#allocation5 + $0x8] sm:$0xff] %vm152_vm0, %v397_v14  ;;  %1546 = vmatmul.msk.f32.vlgmr.msrb.gmra.mxu1 %vm152_vm0, %v397_v14 }
 0x4aa   :  { %689 = vmatpush.msrb.mxu1 %v2097_v0 }
 0x4ac   :  { %690 = vmatpush.msrb.mxu1 %v2099_v2 }
 0x4ae   :  { %691 = vmatpush.msrb.mxu1 %v2102_v5 }
 0x4b0   :  { %v816_v15 = vld [vmem:[#allocation5 + $0x8] sm:$0xff]  ;;  %692 = vmatpush.msrb.mxu1 %v2108_v7 }
 0x4b1   :  { %1559 = vmatmul.msk.f32.gmra.mxu3 %vm152_vm0, %v816_v15 }
 0x4ca   :  { %v223_v15 = vpop.f32.mrf.mxu0 }
 0x4cb   :  { %v243_v16 = vadd.f32 %v2132_v10, %v223_v15 }
 0x526   :  { %v422_v18 = vpop.f32.mrf.mxu1 }
 0x527   :  { %v425_v19 = vadd.f32 %v422_v18, %v241_v17 }
 0x529   :  { %1615 = vtanh.f32 %v425_v19  ;;  %v1547_v21 = vmul.f32 -1.442695, %v425_v19 }
 0x52b   :  { %1617 = vpow2.f32 %v1547_v21 }
 0x52f   :  { %v1616_v20 = vpop.eup %1615 }
 0x530   :  { %448 = vrot.lane.b32.xlu0 %v1616_v20, %s1989_s4 }
 0x531   :  { %v1618_v22 = vpop.eup %1617 }
 0x532   :  { %v429_v23 = vadd.f32 1.0, %v1618_v22 }
 0x534   :  { %1619 = vrcp.f32 %v429_v23  ;;  %v441_v29 = vand.u32 2147483648, %v429_v23  ;;  %vm435_vm11 = vweird.f32 %v429_v23  ;;  %v439_v30 = vand.u32 2147483647, %v429_v23 }
 0x536   :  { %v442_v32 = vor.u32 1.1754944e-38, %v441_v29  ;;  %vm440_vm13 = vcmp.eq.f32.partialorder %v439_v30, 8.507059e+37 }
 0x53a   :  { %v1620_v24 = vpop.eup %1619 }
 0x53b   :  { %v431_v25 = vmul.f32 %v1620_v24, %v429_v23  ;;  %vm436_vm10 = vweird.f32 %v1620_v24 }
 0x53c   :  { %vm437_vm12 = vmor %vm435_vm11, %vm436_vm10 }
 0x53d   :  { %v432_v26 = vsub.f32 1.0, %v431_v25 }
 0x53f   :  { %v433_v27 = vmul.f32 %v1620_v24, %v432_v26 }
 0x541   :  { %v434_v28 = vadd.f32 %v1620_v24, %v433_v27 }
 0x543   :  { %v438_v31 = vsel %vm437_vm12, %v1620_v24, %v434_v28 }
 0x544   :  { %v443_v34 = vsel %vm440_vm13, %v442_v32, %v438_v31 }
 0x545   :  { %v446_v36 = vmul.f32 %v443_v34, %v388_v8 }
 0x5a2   :  { %v449_v33 = vpop.permute.xlu0 %448 }
 0x5a3   :  { %v451_v35 = vmul.f32 %v449_v33, %v443_v34 }
 0x5a5   :  { %453 = vrot.lane.b32.xlu1 %v451_v35, %s1990_s12 }
 0x617   :  { %v454_v37 = vpop.permute.xlu1 %453 }
 0x618   :  { %v456_v38 = vadd.f32 %v454_v37, %v446_v36  ;;  %v164_v37 = vld [vmem:[#allocation6 + $0x28] sm:$0xff] }
 0x619   :  { %1539 = vmatmul.msk.f32.gmra.mxu0 %vm169_vm1, %v164_v37 }
 0x61a   :  { %1621 = vtanh.f32 %v456_v38 }
 0x620   :  { %v1622_v39 = vpop.eup %1621 }
 0x621   :  { %459 = vrot.lane.b32.xlu2 %v1622_v39, %s1989_s4 }
 0x67b   :  { %v460_v41 = vpop.permute.xlu2 %459 }
 0x67c   :  { %v462_v42 = vmul.f32 %v460_v41, %v443_v34 }
 0x67e   :  { %464 = vrot.lane.b32.xlu0 %v462_v42, %s1990_s12 }
 0x696   :  { %v226_v40 = vpop.f32.mrf.mxu0 }
 0x697   :  { %v244_v41 = vadd.f32 %v2132_v10, %v226_v40 }
 0x6f0   :  { %v465_v43 = vpop.permute.xlu0 %464 }
 0x6f1   :  { %468 = vst.msk [vmem:[#allocation5 + $0x10] sm:$0xff] %vm152_vm0, %v465_v43  ;;  %1548 = vmatmul.msk.f32.vlgmr.msra.gmra.mxu1 %vm152_vm0, %v465_v43 }
 0x6f8   :  { %v817_v44 = vld [vmem:[#allocation5 + $0x10] sm:$0xff] }
 0x6f9   :  { %1560 = vmatmul.msk.f32.gmra.mxu3 %vm152_vm0, %v817_v44 }
 0x76e   :  { %v490_v47 = vpop.f32.mrf.mxu1 }
 0x76f   :  { %v493_v48 = vadd.f32 %v490_v47, %v242_v46 }
 0x771   :  { %1623 = vtanh.f32 %v493_v48  ;;  %v1549_v50 = vmul.f32 -1.442695, %v493_v48 }
 0x773   :  { %1625 = vpow2.f32 %v1549_v50 }
 0x777   :  { %v1624_v49 = vpop.eup %1623 }
 0x778   :  { %516 = vrot.lane.b32.xlu1 %v1624_v49, %s1989_s4 }
 0x779   :  { %v1626_v51 = vpop.eup %1625 }
 0x77a   :  { %v497_v52 = vadd.f32 1.0, %v1626_v51 }
 0x77c   :  { %1627 = vrcp.f32 %v497_v52  ;;  %v509_v58 = vand.u32 2147483648, %v497_v52  ;;  %vm503_vm15 = vweird.f32 %v497_v52  ;;  %v507_v59 = vand.u32 2147483647, %v497_v52 }
 0x77e   :  { %v510_v61 = vor.u32 1.1754944e-38, %v509_v58  ;;  %vm508_vm3 = vcmp.eq.f32.partialorder %v507_v59, 8.507059e+37 }
 0x782   :  { %v1628_v53 = vpop.eup %1627 }
 0x783   :  { %v499_v54 = vmul.f32 %v1628_v53, %v497_v52  ;;  %vm504_vm14 = vweird.f32 %v1628_v53 }
 0x784   :  { %vm505_vm2 = vmor %vm503_vm15, %vm504_vm14 }
 0x785   :  { %v500_v55 = vsub.f32 1.0, %v499_v54 }
 0x787   :  { %v501_v56 = vmul.f32 %v1628_v53, %v500_v55 }
 0x789   :  { %v502_v57 = vadd.f32 %v1628_v53, %v501_v56 }
 0x78b   :  { %v506_v60 = vsel %vm505_vm2, %v1628_v53, %v502_v57 }
 0x78c   :  { %v511_v63 = vsel %vm508_vm3, %v510_v61, %v506_v60 }
 0x78d   :  { %v514_v3 = vmul.f32 %v511_v63, %v456_v38 }
 0x7ea   :  { %v517_v62 = vpop.permute.xlu1 %516 }
 0x7eb   :  { %v519_v1 = vmul.f32 %v517_v62, %v511_v63 }
 0x7ed   :  { %521 = vrot.lane.b32.xlu2 %v519_v1, %s1990_s12  ;;  %v165_v1 = vld [vmem:[#allocation6 + $0x30] sm:$0xff] }
 0x7ee   :  { %1540 = vmatmul.msk.f32.gmra.mxu0 %vm169_vm1, %v165_v1 }
 0x847   :  { %v522_v4 = vpop.permute.xlu2 %521 }
 0x848   :  { %v524_v6 = vadd.f32 %v522_v4, %v514_v3 }
 0x84a   :  { %1629 = vtanh.f32 %v524_v6 }
 0x850   :  { %v1630_v8 = vpop.eup %1629 }
 0x851   :  { %527 = vrot.lane.b32.xlu0 %v1630_v8, %s1989_s4  ;;  %v2201_v8 = vld [vmem:[#allocation14 + $0x18] sm:$0xff] }
 0x852   :  { %936 = vmatpush.msra.mxu1 %v2201_v8 }
 0x8c3   :  { %v528_v9 = vpop.permute.xlu0 %527 }
 0x8c4   :  { %v530_v11 = vmul.f32 %v528_v9, %v511_v63  ;;  %v2203_v9 = vld [vmem:[#allocation14 + $0x10] sm:$0xff] }
 0x8c5   :  { %937 = vmatpush.msra.mxu1 %v2203_v9 }
 0x8c6   :  { %532 = vrot.lane.b32.xlu1 %v530_v11, %s1990_s12  ;;  %v2208_v11 = vld [vmem:[#allocation14 + $0x8] sm:$0xff] }
 0x8c7   :  { %938 = vmatpush.msra.mxu1 %v2208_v11 }
 0x8c9   :  { %939 = vmatpush.msra.mxu1 %v2212_v12 }
 0x938   :  { %v533_v13 = vpop.permute.xlu1 %532 }
 0x939   :  { %536 = vst.msk [vmem:[#allocation5 + $0x18] sm:$0xff] %vm152_vm0, %v533_v13  ;;  %1550 = vmatmul.msk.f32.vlgmr.msrb.gmra.mxu2 %vm152_vm0, %v533_v13 }
 0x93a   :  { %757 = vmatpush.msrb.mxu2 %v2097_v0 }
 0x93c   :  { %758 = vmatpush.msrb.mxu2 %v2099_v2 }
 0x93e   :  { %759 = vmatpush.msrb.mxu2 %v2102_v5 }
 0x940   :  { %v818_v14 = vld [vmem:[#allocation5 + $0x18] sm:$0xff]  ;;  %760 = vmatpush.msrb.mxu2 %v2108_v7 }
 0x941   :  { %1561 = vmatmul.msk.f32.gmra.mxu3 %vm152_vm0, %v818_v14 }
 0x9bc   :  { %v558_v17 = vpop.f32.mrf.mxu2 }
 0x9bd   :  { %v561_v18 = vadd.f32 %v558_v17, %v243_v16  ;;  %v156_v16 = vld [vmem:[#allocation17 + $0x8] sm:$0xff]  ;;  %v229_v17 = vpop.f32.mrf.mxu0 }
 0x9be   :  { %158 = vst.msk [vmem:[#allocation3 + $0x8] sm:$0xff] %vm152_vm0, %v156_v16 }
 0x9bf   :  { %1631 = vtanh.f32 %v561_v18  ;;  %v1551_v20 = vmul.f32 -1.442695, %v561_v18  ;;  %v245_v18 = vadd.f32 %v2132_v10, %v229_v17 }
 0x9c1   :  { %1633 = vpow2.f32 %v1551_v20 }
 0x9c5   :  { %v1632_v19 = vpop.eup %1631 }
 0x9c6   :  { %584 = vrot.lane.b32.xlu2 %v1632_v19, %s1989_s4 }
 0x9c7   :  { %v1634_v0 = vpop.eup %1633 }
 0x9c8   :  { %v565_v2 = vadd.f32 1.0, %v1634_v0  ;;  %v2235_v0 = vld [vmem:[%s2378_s6] ss:$0 sm:$0xff] }
 0x9ca   :  { %1635 = vrcp.f32 %v565_v2  ;;  %v577_v24 = vand.u32 2147483648, %v565_v2  ;;  %vm571_vm5 = vweird.f32 %v565_v2  ;;  %v575_v25 = vand.u32 2147483647, %v565_v2 }
 0x9cc   :  { %v578_v27 = vor.u32 1.1754944e-38, %v577_v24  ;;  %vm576_vm7 = vcmp.eq.f32.partialorder %v575_v25, 8.507059e+37 }
 0x9d0   :  { %v1636_v5 = vpop.eup %1635 }
 0x9d1   :  { %v567_v21 = vmul.f32 %v1636_v5, %v565_v2  ;;  %vm572_vm4 = vweird.f32 %v1636_v5  ;;  %v868_v2 = vpop.f32.mrf.mxu3 }
 0x9d2   :  { %vm573_vm6 = vmor %vm571_vm5, %vm572_vm4 }
 0x9d3   :  { %v568_v22 = vsub.f32 1.0, %v567_v21 }
 0x9d5   :  { %v569_v7 = vmul.f32 %v1636_v5, %v568_v22 }
 0x9d7   :  { %v570_v23 = vadd.f32 %v1636_v5, %v569_v7 }
 0x9d9   :  { %v574_v26 = vsel %vm573_vm6, %v1636_v5, %v570_v23  ;;  %v896_v5 = vadd.f32 %v2235_v0, %v868_v2  ;;  %v919_v23 = vld [vmem:[#allocation3 + $0x8] sm:$0xff]  ;;  %v871_v17 = vpop.f32.mrf.mxu3 }
 0x9da   :  { %v579_v29 = vsel %vm576_vm7, %v578_v27, %v574_v26 }
 0x9db   :  { %v582_v31 = vmul.f32 %v579_v29, %v524_v6  ;;  %v151_v6 = vld [vmem:[#allocation15 + $0x8] sm:$0xff] }
 0x9dc   :  { %154 = vst.msk [vmem:[#allocation2 + $0x8] sm:$0xff] %vm152_vm0, %v151_v6 }
 0x9e3   :  { %v917_v14 = vld [vmem:[#allocation2 + $0x8] sm:$0xff] }
 0xa20   :  { %v585_v28 = vpop.permute.xlu2 %584 }
 0xa21   :  { %v587_v30 = vmul.f32 %v585_v28, %v579_v29 }
 0xa23   :  { %589 = vrot.lane.b32.xlu0 %v587_v30, %s1990_s12 }
 0xa95   :  { %v590_v32 = vpop.permute.xlu0 %589 }
 0xa96   :  { %v592_v33 = vadd.f32 %v590_v32, %v582_v31 }
 0xa98   :  { %1637 = vtanh.f32 %v592_v33 }
 0xa9e   :  { %v1638_v34 = vpop.eup %1637 }
 0xa9f   :  { %595 = vrot.lane.b32.xlu1 %v1638_v34, %s1989_s4 }
 0xb11   :  { %v596_v35 = vpop.permute.xlu1 %595 }
 0xb12   :  { %v598_v36 = vmul.f32 %v596_v35, %v579_v29 }
 0xb14   :  { %600 = vrot.lane.b32.xlu2 %v598_v36, %s1990_s12 }
 0xb6e   :  { %v601_v38 = vpop.permute.xlu2 %600 }
 0xb6f   :  { %604 = vst.msk [vmem:[#allocation5 + $0x20] sm:$0xff] %vm152_vm0, %v601_v38  ;;  %1552 = vmatmul.msk.f32.vlgmr.msra.gmra.mxu2 %vm152_vm0, %v601_v38 }
 0xb70   :  { %1006 = vmatpush.msra.mxu2 %v2201_v8 }
 0xb72   :  { %1007 = vmatpush.msra.mxu2 %v2203_v9 }
 0xb74   :  { %1008 = vmatpush.msra.mxu2 %v2208_v11 }
 0xb76   :  { %v819_v39 = vld [vmem:[#allocation5 + $0x20] sm:$0xff]  ;;  %1009 = vmatpush.msra.mxu2 %v2212_v12 }
 0xb77   :  { %1562 = vmatmul.msk.f32.gmra.mxu3 %vm152_vm0, %v819_v39 }
 0xbf2   :  { %v626_v42 = vpop.f32.mrf.mxu2 }
 0xbf3   :  { %v629_v43 = vadd.f32 %v626_v42, %v244_v41 }
 0xbf5   :  { %1639 = vtanh.f32 %v629_v43  ;;  %v1553_v45 = vmul.f32 -1.442695, %v629_v43 }
 0xbf7   :  { %1641 = vpow2.f32 %v1553_v45 }
 0xbfb   :  { %v1640_v44 = vpop.eup %1639 }
 0xbfc   :  { %652 = vrot.lane.b32.xlu0 %v1640_v44, %s1989_s4 }
 0xbfd   :  { %v1642_v46 = vpop.eup %1641 }
 0xbfe   :  { %v633_v47 = vadd.f32 1.0, %v1642_v46 }
 0xc00   :  { %1643 = vrcp.f32 %v633_v47  ;;  %v645_v53 = vand.u32 2147483648, %v633_v47  ;;  %vm639_vm9 = vweird.f32 %v633_v47  ;;  %v643_v54 = vand.u32 2147483647, %v633_v47 }
 0xc02   :  { %v646_v56 = vor.u32 1.1754944e-38, %v645_v53  ;;  %vm644_vm11 = vcmp.eq.f32.partialorder %v643_v54, 8.507059e+37 }
 0xc06   :  { %v1644_v48 = vpop.eup %1643 }
 0xc07   :  { %v635_v49 = vmul.f32 %v1644_v48, %v633_v47  ;;  %vm640_vm8 = vweird.f32 %v1644_v48 }
 0xc08   :  { %vm641_vm10 = vmor %vm639_vm9, %vm640_vm8 }
 0xc09   :  { %v636_v50 = vsub.f32 1.0, %v635_v49 }
 0xc0b   :  { %v637_v51 = vmul.f32 %v1644_v48, %v636_v50 }
 0xc0d   :  { %v638_v52 = vadd.f32 %v1644_v48, %v637_v51 }
 0xc0f   :  { %v642_v55 = vsel %vm641_vm10, %v1644_v48, %v638_v52 }
 0xc10   :  { %v647_v58 = vsel %vm644_vm11, %v646_v56, %v642_v55 }
 0xc11   :  { %v650_v60 = vmul.f32 %v647_v58, %v592_v33 }
 0xc6e   :  { %v653_v57 = vpop.permute.xlu0 %652 }
 0xc6f   :  { %v655_v59 = vmul.f32 %v653_v57, %v647_v58 }
 0xc71   :  { %657 = vrot.lane.b32.xlu1 %v655_v59, %s1990_s12 }
 0xce3   :  { %v658_v61 = vpop.permute.xlu1 %657 }
 0xce4   :  { %v2195_v62 = vadd.f32 %v658_v61, %v650_v60 }
 0xce6   :  { %1645 = vtanh.f32 %v2195_v62 }
 0xcec   :  { %v1646_v63 = vpop.eup %1645 }
 0xced   :  { %663 = vrot.lane.b32.xlu2 %v1646_v63, %s1989_s4 }
 0xd47   :  { %v664_v3 = vpop.permute.xlu2 %663 }
 0xd48   :  { %v666_v4 = vmul.f32 %v664_v3, %v647_v58 }
 0xd4a   :  { %668 = vrot.lane.b32.xlu0 %v666_v4, %s1990_s12 }
 0xdbc   :  { %v669_v13 = vpop.permute.xlu0 %668 }
 0xdbd   :  { %672 = vst.msk [vmem:[#allocation5 + $0x28] sm:$0xff] %vm152_vm0, %v669_v13  ;;  %1554 = vmatmul.msk.f32.vlgmr.msrb.gmra.mxu1 %vm152_vm0, %v669_v13  ;;  %v166_v13 = vld [vmem:[#allocation6 + $0x38] sm:$0xff] }
 0xdbe   :  { %1073 = vmatpush.msrb.mxu1 %v2201_v8  ;;  %1541 = vmatmul.msk.f32.gmra.mxu0 %vm169_vm1, %v166_v13 }
 0xdc0   :  { %1074 = vmatpush.msrb.mxu1 %v2203_v9 }
 0xdc2   :  { %1075 = vmatpush.msrb.mxu1 %v2208_v11 }
 0xdc4   :  { %v820_v15 = vld [vmem:[#allocation5 + $0x28] sm:$0xff]  ;;  %1076 = vmatpush.msrb.mxu1 %v2212_v12 }
 0xdc5   :  { %1563 = vmatmul.msk.f32.gmra.mxu3 %vm152_vm0, %v820_v15  ;;  %1566 = vmatmul.msk.f32.vlgmr.msra.gmra.mxu1 %vm152_vm0, %v917_v14 }
 0xdc6   :  { %1207 = vmatpush.msra.mxu1 %v2201_v8 }
 0xdc8   :  { %1208 = vmatpush.msra.mxu1 %v2203_v9 }
 0xdca   :  { %1209 = vmatpush.msra.mxu1 %v2208_v11 }
 0xdcc   :  { %1210 = vmatpush.msra.mxu1 %v2212_v12 }
 0xe3a   :  { %v694_v19 = vpop.f32.mrf.mxu1 }
 0xe3b   :  { %v697_v20 = vadd.f32 %v694_v19, %v245_v18  ;;  %v897_v18 = vadd.f32 %v2235_v0, %v871_v17 }
 0xe3d   :  { %1647 = vtanh.f32 %v697_v20  ;;  %v1555_v27 = vmul.f32 -1.442695, %v697_v20 }
 0xe42   :  { %v941_v21 = vpop.f32.mrf.mxu1 }
 0xe43   :  { %v1648_v22 = vpop.eup %1647  ;;  %v944_v7 = vadd.f32 %v941_v21, %v896_v5 }
 0xe44   :  { %720 = vrot.lane.b32.xlu1 %v1648_v22, %s1989_s4 }
 0xe45   :  { %1649 = vtanh.f32 %v944_v7  ;;  %v1567_v10 = vmul.f32 -1.442695, %v944_v7 }
 0xe47   :  { %1651 = vpow2.f32 %v1567_v10 }
 0xe4b   :  { %v1650_v24 = vpop.eup %1649 }
 0xe4c   :  { %966 = vrot.lane.b32.xlu1 %v919_v23, %s1990_s12  ;;  %971 = vrot.lane.b32.xlu2 %v1650_v24, %s1989_s4 }
 0xe4d   :  { %v1652_v25 = vpop.eup %1651 }
 0xe4e   :  { %v948_v26 = vadd.f32 1.0, %v1652_v25 }
 0xe50   :  { %1653 = vrcp.f32 %v948_v26  ;;  %v960_v36 = vand.u32 2147483648, %v948_v26  ;;  %vm954_vm13 = vweird.f32 %v948_v26  ;;  %v958_v37 = vand.u32 2147483647, %v948_v26 }
 0xe51   :  { %1655 = vpow2.f32 %v1555_v27 }
 0xe52   :  { %v961_v40 = vor.u32 1.1754944e-38, %v960_v36  ;;  %vm959_vm15 = vcmp.eq.f32.partialorder %v958_v37, 8.507059e+37 }
 0xe56   :  { %v1654_v28 = vpop.eup %1653 }
 0xe57   :  { %v1656_v29 = vpop.eup %1655  ;;  %v950_v30 = vmul.f32 %v1654_v28, %v948_v26  ;;  %vm955_vm12 = vweird.f32 %v1654_v28 }
 0xe58   :  { %v701_v31 = vadd.f32 1.0, %v1656_v29  ;;  %vm956_vm14 = vmor %vm954_vm13, %vm955_vm12 }
 0xe59   :  { %v951_v32 = vsub.f32 1.0, %v950_v30 }
 0xe5a   :  { %1657 = vrcp.f32 %v701_v31  ;;  %v713_v47 = vand.u32 2147483648, %v701_v31  ;;  %vm707_vm3 = vweird.f32 %v701_v31  ;;  %v711_v48 = vand.u32 2147483647, %v701_v31 }
 0xe5b   :  { %v952_v33 = vmul.f32 %v1654_v28, %v951_v32 }
 0xe5c   :  { %v714_v50 = vor.u32 1.1754944e-38, %v713_v47  ;;  %vm712_vm5 = vcmp.eq.f32.partialorder %v711_v48, 8.507059e+37 }
 0xe5d   :  { %v953_v34 = vadd.f32 %v1654_v28, %v952_v33 }
 0xe5f   :  { %v957_v38 = vsel %vm956_vm14, %v1654_v28, %v953_v34 }
 0xe60   :  { %v1658_v35 = vpop.eup %1657  ;;  %v962_v42 = vsel %vm959_vm15, %v961_v40, %v957_v38  ;;  %v874_v40 = vpop.f32.mrf.mxu3 }
 0xe61   :  { %v703_v39 = vmul.f32 %v1658_v35, %v701_v31  ;;  %vm708_vm2 = vweird.f32 %v1658_v35 }
 0xe62   :  { %vm709_vm4 = vmor %vm707_vm3, %vm708_vm2 }
 0xe63   :  { %v704_v44 = vsub.f32 1.0, %v703_v39 }
 0xe65   :  { %v705_v45 = vmul.f32 %v1658_v35, %v704_v44 }
 0xe67   :  { %v706_v46 = vadd.f32 %v1658_v35, %v705_v45 }
 0xe69   :  { %v710_v49 = vsel %vm709_vm4, %v1658_v35, %v706_v46 }
 0xe6a   :  { %v715_v52 = vsel %vm712_vm5, %v714_v50, %v710_v49 }
 0xe6b   :  { %v718_v59 = vmul.f32 %v715_v52, %v2195_v62 }
 0xea6   :  { %v972_v41 = vpop.permute.xlu2 %971 }
 0xea7   :  { %v974_v43 = vmul.f32 %v972_v41, %v962_v42  ;;  %v898_v41 = vadd.f32 %v2235_v0, %v874_v40 }
 0xea9   :  { %976 = vrot.lane.b32.xlu2 %v974_v43, %s1990_s12 }
 0xeb6   :  { %v721_v51 = vpop.permute.xlu1 %720 }
 0xeb7   :  { %v723_v53 = vmul.f32 %v721_v51, %v715_v52 }
 0xeb9   :  { %725 = vrot.lane.b32.xlu0 %v723_v53, %s1990_s12 }
 0xebe   :  { %v967_v54 = vpop.permute.xlu1 %966 }
 0xebf   :  { %v969_v55 = vmul.f32 %v967_v54, %v962_v42 }
 0xf03   :  { %v977_v56 = vpop.permute.xlu2 %976 }
 0xf04   :  { %v2243_v57 = vadd.f32 %v977_v56, %v969_v55 }
 0xf06   :  { %1659 = vtanh.f32 %v2243_v57 }
 0xf0c   :  { %v1660_v58 = vpop.eup %1659 }
 0xf0d   :  { %982 = vrot.lane.b32.xlu1 %v1660_v58, %s1989_s4 }
 0xf2b   :  { %v726_v60 = vpop.permute.xlu0 %725 }
 0xf2c   :  { %v2248_v61 = vadd.f32 %v726_v60, %v718_v59 }
 0xf2e   :  { %1661 = vtanh.f32 %v2248_v61 }
 0xf34   :  { %v1662_v63 = vpop.eup %1661 }
 0xf35   :  { %731 = vrot.lane.b32.xlu0 %v1662_v63, %s1989_s4 }
 0xf7f   :  { %v983_v1 = vpop.permute.xlu1 %982 }
 0xf80   :  { %v985_v3 = vmul.f32 %v983_v1, %v962_v42 }
 0xf82   :  { %987 = vrot.lane.b32.xlu0 %v985_v3, %s1990_s12 }
 0xfa7   :  { %v732_v4 = vpop.permute.xlu0 %731 }
 0xfa8   :  { %v734_v6 = vmul.f32 %v732_v4, %v715_v52 }
 0xfaa   :  { %736 = vrot.lane.b32.xlu2 %v734_v6, %s1990_s12 }
 0xff4   :  { %v988_v62 = vpop.permute.xlu0 %987 }
 0xff5   :  { %990 = vst.msk [vmem:[#allocation18] sm:$0xff] %vm152_vm0, %v988_v62 }
0x1004   :  { %v737_v14 = vpop.permute.xlu2 %736 }
0x1005   :  { %740 = vst.msk [vmem:[#allocation5 + $0x30] sm:$0xff] %vm152_vm0, %v737_v14  ;;  %1556 = vmatmul.msk.f32.vlgmr.msrb.gmra.mxu2 %vm152_vm0, %v737_v14 }
0x1006   :  { %1140 = vmatpush.msrb.mxu2 %v2201_v8 }
0x1008   :  { %1141 = vmatpush.msrb.mxu2 %v2203_v9 }
0x100a   :  { %1142 = vmatpush.msrb.mxu2 %v2208_v11 }
0x100c   :  { %v821_v15 = vld [vmem:[#allocation5 + $0x30] sm:$0xff]  ;;  %1143 = vmatpush.msrb.mxu2 %v2212_v12 }
0x100d   :  { %1564 = vmatmul.msk.f32.gmra.mxu3 %vm152_vm0, %v821_v15  ;;  %1568 = vmatmul.msk.f32.vlgmr.msra.gmra.mxu2 %vm152_vm0, %v988_v62  ;;  %v877_v62 = vpop.f32.mrf.mxu3 }
0x100e   :  { %1274 = vmatpush.msra.mxu2 %v2201_v8  ;;  %v899_v14 = vadd.f32 %v2235_v0, %v877_v62 }
0x1010   :  { %1275 = vmatpush.msra.mxu2 %v2203_v9 }
0x1012   :  { %1276 = vmatpush.msra.mxu2 %v2208_v11 }
0x1014   :  { %1277 = vmatpush.msra.mxu2 %v2212_v12 }
0x1088   :  { %v2268_v16 = vpop.f32.mrf.mxu2 }
0x1090   :  { %v1011_v19 = vpop.f32.mrf.mxu2 }
0x1091   :  { %v1014_v20 = vadd.f32 %v1011_v19, %v897_v18 }
0x1093   :  { %1663 = vtanh.f32 %v1014_v20  ;;  %v1569_v5 = vmul.f32 -1.442695, %v1014_v20 }
0x1095   :  { %1665 = vpow2.f32 %v1569_v5 }
0x1099   :  { %v1664_v2 = vpop.eup %1663 }
0x109a   :  { %1037 = vrot.lane.b32.xlu1 %v1664_v2, %s1989_s4 }
0x109b   :  { %v1666_v21 = vpop.eup %1665 }
0x109c   :  { %v1018_v22 = vadd.f32 1.0, %v1666_v21 }
0x109e   :  { %1667 = vrcp.f32 %v1018_v22  ;;  %v1030_v26 = vand.u32 2147483648, %v1018_v22  ;;  %vm1024_vm6 = vweird.f32 %v1018_v22  ;;  %v1028_v27 = vand.u32 2147483647, %v1018_v22 }
0x10a0   :  { %v1031_v29 = vor.u32 1.1754944e-38, %v1030_v26  ;;  %vm1029_vm8 = vcmp.eq.f32.partialorder %v1028_v27, 8.507059e+37 }
0x10a4   :  { %v1668_v7 = vpop.eup %1667 }
0x10a5   :  { %v1020_v23 = vmul.f32 %v1668_v7, %v1018_v22  ;;  %vm1025_vm1 = vweird.f32 %v1668_v7 }
0x10a6   :  { %vm1026_vm7 = vmor %vm1024_vm6, %vm1025_vm1 }
0x10a7   :  { %v1021_v24 = vsub.f32 1.0, %v1020_v23 }
0x10a9   :  { %v1022_v10 = vmul.f32 %v1668_v7, %v1021_v24 }
0x10ab   :  { %v1023_v25 = vadd.f32 %v1668_v7, %v1022_v10 }
0x10ad   :  { %v1027_v28 = vsel %vm1026_vm7, %v1668_v7, %v1023_v25 }
0x10ae   :  { %v1032_v31 = vsel %vm1029_vm8, %v1031_v29, %v1027_v28 }
0x10af   :  { %v1035_v33 = vmul.f32 %v1032_v31, %v2243_v57 }
0x110c   :  { %v1038_v30 = vpop.permute.xlu1 %1037 }
0x110d   :  { %v1040_v32 = vmul.f32 %v1038_v30, %v1032_v31 }
0x110f   :  { %1042 = vrot.lane.b32.xlu2 %v1040_v32, %s1990_s12 }
0x1169   :  { %v1043_v34 = vpop.permute.xlu2 %1042 }
0x116a   :  { %v1045_v35 = vadd.f32 %v1043_v34, %v1035_v33  ;;  %v880_v33 = vpop.f32.mrf.mxu3 }
0x116b   :  { %v900_v34 = vadd.f32 %v2235_v0, %v880_v33 }
0x116c   :  { %1669 = vtanh.f32 %v1045_v35 }
0x1172   :  { %v1670_v36 = vpop.eup %1669 }
0x1173   :  { %1048 = vrot.lane.b32.xlu0 %v1670_v36, %s1989_s4 }
0x11e5   :  { %v1049_v37 = vpop.permute.xlu0 %1048 }
0x11e6   :  { %v1051_v38 = vmul.f32 %v1049_v37, %v1032_v31 }
0x11e8   :  { %1053 = vrot.lane.b32.xlu1 %v1051_v38, %s1990_s12 }
0x125a   :  { %v1054_v39 = vpop.permute.xlu1 %1053 }
0x125b   :  { %1057 = vst.msk [vmem:[#allocation18 + $0x8] sm:$0xff] %vm152_vm0, %v1054_v39  ;;  %1570 = vmatmul.msk.f32.vlgmr.msrb.gmra.mxu1 %vm152_vm0, %v1054_v39 }
0x125c   :  { %1341 = vmatpush.msrb.mxu1 %v2201_v8 }
0x125e   :  { %1342 = vmatpush.msrb.mxu1 %v2203_v9 }
0x1260   :  { %1343 = vmatpush.msrb.mxu1 %v2208_v11 }
0x1262   :  { %1344 = vmatpush.msrb.mxu1 %v2212_v12 }
0x12d8   :  { %v1078_v42 = vpop.f32.mrf.mxu1 }
0x12d9   :  { %v1081_v43 = vadd.f32 %v1078_v42, %v898_v41 }
0x12db   :  { %1671 = vtanh.f32 %v1081_v43  ;;  %v1571_v45 = vmul.f32 -1.442695, %v1081_v43 }
0x12dd   :  { %1673 = vpow2.f32 %v1571_v45 }
0x12e1   :  { %v1672_v44 = vpop.eup %1671 }
0x12e2   :  { %1104 = vrot.lane.b32.xlu2 %v1672_v44, %s1989_s4 }
0x12e3   :  { %v1674_v46 = vpop.eup %1673 }
0x12e4   :  { %v1085_v47 = vadd.f32 1.0, %v1674_v46 }
0x12e6   :  { %1675 = vrcp.f32 %v1085_v47  ;;  %v1097_v53 = vand.u32 2147483648, %v1085_v47  ;;  %vm1091_vm10 = vweird.f32 %v1085_v47  ;;  %v1095_v54 = vand.u32 2147483647, %v1085_v47 }
0x12e8   :  { %v1098_v56 = vor.u32 1.1754944e-38, %v1097_v53  ;;  %vm1096_vm12 = vcmp.eq.f32.partialorder %v1095_v54, 8.507059e+37 }
0x12ec   :  { %v1676_v48 = vpop.eup %1675 }
0x12ed   :  { %v1087_v49 = vmul.f32 %v1676_v48, %v1085_v47  ;;  %vm1092_vm9 = vweird.f32 %v1676_v48 }
0x12ee   :  { %vm1093_vm11 = vmor %vm1091_vm10, %vm1092_vm9 }
0x12ef   :  { %v1088_v50 = vsub.f32 1.0, %v1087_v49 }
0x12f1   :  { %v1089_v51 = vmul.f32 %v1676_v48, %v1088_v50 }
0x12f3   :  { %v1090_v52 = vadd.f32 %v1676_v48, %v1089_v51 }
0x12f5   :  { %v1094_v55 = vsel %vm1093_vm11, %v1676_v48, %v1090_v52 }
0x12f6   :  { %v1099_v58 = vsel %vm1096_vm12, %v1098_v56, %v1094_v55 }
0x12f7   :  { %v1102_v60 = vmul.f32 %v1099_v58, %v1045_v35 }
0x133c   :  { %v1105_v57 = vpop.permute.xlu2 %1104 }
0x133d   :  { %v1107_v59 = vmul.f32 %v1105_v57, %v1099_v58 }
0x133f   :  { %1109 = vrot.lane.b32.xlu0 %v1107_v59, %s1990_s12 }
0x13b1   :  { %v1110_v63 = vpop.permute.xlu0 %1109 }
0x13b2   :  { %v1112_v1 = vadd.f32 %v1110_v63, %v1102_v60  ;;  %v883_v60 = vpop.f32.mrf.mxu3 }
0x13b3   :  { %v901_v63 = vadd.f32 %v2235_v0, %v883_v60 }
0x13b4   :  { %1677 = vtanh.f32 %v1112_v1 }
0x13ba   :  { %v1678_v3 = vpop.eup %1677 }
0x13bb   :  { %1115 = vrot.lane.b32.xlu1 %v1678_v3, %s1989_s4 }
0x142d   :  { %v1116_v4 = vpop.permute.xlu1 %1115 }
0x142e   :  { %v1118_v6 = vmul.f32 %v1116_v4, %v1099_v58 }
0x1430   :  { %1120 = vrot.lane.b32.xlu2 %v1118_v6, %s1990_s12 }
0x148a   :  { %v1121_v13 = vpop.permute.xlu2 %1120 }
0x148b   :  { %1124 = vst.msk [vmem:[#allocation18 + $0x10] sm:$0xff] %vm152_vm0, %v1121_v13  ;;  %1572 = vmatmul.msk.f32.vlgmr.msrb.gmra.mxu2 %vm152_vm0, %v1121_v13 }
0x148c   :  { %1408 = vmatpush.msrb.mxu2 %v2201_v8 }
0x148e   :  { %1409 = vmatpush.msrb.mxu2 %v2203_v9 }
0x1490   :  { %1410 = vmatpush.msrb.mxu2 %v2208_v11 }
0x1492   :  { %1411 = vmatpush.msrb.mxu2 %v2212_v12 }
0x150e   :  { %v1145_v15 = vpop.f32.mrf.mxu2 }
0x150f   :  { %v1148_v17 = vadd.f32 %v1145_v15, %v899_v14 }
0x1511   :  { %1679 = vtanh.f32 %v1148_v17  ;;  %v1573_v19 = vmul.f32 -1.442695, %v1148_v17 }
0x1513   :  { %1681 = vpow2.f32 %v1573_v19  ;;  %v232_v19 = vpop.f32.mrf.mxu0 }
0x1517   :  { %v1680_v18 = vpop.eup %1679 }
0x1518   :  { %1171 = vrot.lane.b32.xlu0 %v1680_v18, %s1989_s4 }
0x1519   :  { %v1682_v20 = vpop.eup %1681 }
0x151a   :  { %v1152_v2 = vadd.f32 1.0, %v1682_v20 }
0x151c   :  { %1683 = vrcp.f32 %v1152_v2  ;;  %v1164_v12 = vand.u32 2147483648, %v1152_v2  ;;  %vm1158_vm14 = vweird.f32 %v1152_v2  ;;  %v1162_v22 = vand.u32 2147483647, %v1152_v2 }
0x151e   :  { %v1165_v23 = vor.u32 1.1754944e-38, %v1164_v12  ;;  %vm1163_vm2 = vcmp.eq.f32.partialorder %v1162_v22, 8.507059e+37 }
0x1522   :  { %v1684_v8 = vpop.eup %1683 }
0x1523   :  { %v1154_v9 = vmul.f32 %v1684_v8, %v1152_v2  ;;  %vm1159_vm13 = vweird.f32 %v1684_v8 }
0x1524   :  { %vm1160_vm15 = vmor %vm1158_vm14, %vm1159_vm13 }
0x1525   :  { %v1155_v5 = vsub.f32 1.0, %v1154_v9  ;;  %v1727_v9 = vld [vmem:[%s2375_s3] ss:$0 sm:$0xff]  ;;  %s1991_s3 = smov 96  }
0x1527   :  { %v1156_v11 = vmul.f32 %v1684_v8, %v1155_v5  ;;  %v246_v5 = vadd.f32 %v1727_v9, %v232_v19 }
0x1529   :  { %v1157_v21 = vadd.f32 %v1684_v8, %v1156_v11  ;;  %v765_v12 = vadd.f32 %v2268_v16, %v246_v5 }
0x152b   :  { %v1161_v7 = vsel %vm1160_vm15, %v1684_v8, %v1157_v21 }
0x152c   :  { %v1166_v10 = vsel %vm1163_vm2, %v1165_v23, %v1161_v7 }
0x152d   :  { %v1169_v26 = vmul.f32 %v1166_v10, %v1112_v1 }
0x158a   :  { %v1172_v24 = vpop.permute.xlu0 %1171 }
0x158b   :  { %v1174_v25 = vmul.f32 %v1172_v24, %v1166_v10 }
0x158d   :  { %1176 = vrot.lane.b32.xlu1 %v1174_v25, %s1990_s12 }
0x15ff   :  { %v1177_v27 = vpop.permute.xlu1 %1176 }
0x1600   :  { %v1179_v28 = vadd.f32 %v1177_v27, %v1169_v26 }
0x1602   :  { %1685 = vtanh.f32 %v1179_v28 }
0x1608   :  { %v1686_v29 = vpop.eup %1685 }
0x1609   :  { %1182 = vrot.lane.b32.xlu2 %v1686_v29, %s1989_s4 }
0x1663   :  { %v1183_v30 = vpop.permute.xlu2 %1182 }
0x1664   :  { %v1185_v31 = vmul.f32 %v1183_v30, %v1166_v10 }
0x1666   :  { %1187 = vrot.lane.b32.xlu0 %v1185_v31, %s1990_s12 }
0x16d8   :  { %v1188_v32 = vpop.permute.xlu0 %1187 }
0x16d9   :  { %1191 = vst.msk [vmem:[#allocation18 + $0x18] sm:$0xff] %vm152_vm0, %v1188_v32  ;;  %1574 = vmatmul.msk.f32.vlgmr.msra.gmra.mxu1 %vm152_vm0, %v1188_v32 }
0x1756   :  { %v1212_v35 = vpop.f32.mrf.mxu1 }
0x1757   :  { %v1215_v36 = vadd.f32 %v1212_v35, %v900_v34 }
0x1759   :  { %1687 = vtanh.f32 %v1215_v36  ;;  %v1575_v38 = vmul.f32 -1.442695, %v1215_v36 }
0x175b   :  { %1689 = vpow2.f32 %v1575_v38 }
0x175f   :  { %v1688_v37 = vpop.eup %1687 }
0x1760   :  { %1238 = vrot.lane.b32.xlu1 %v1688_v37, %s1989_s4 }
0x1761   :  { %v1690_v39 = vpop.eup %1689 }
0x1762   :  { %v1219_v40 = vadd.f32 1.0, %v1690_v39 }
0x1764   :  { %1691 = vrcp.f32 %v1219_v40  ;;  %v1231_v46 = vand.u32 2147483648, %v1219_v40  ;;  %vm1225_vm4 = vweird.f32 %v1219_v40  ;;  %v1229_v47 = vand.u32 2147483647, %v1219_v40 }
0x1766   :  { %v1232_v49 = vor.u32 1.1754944e-38, %v1231_v46  ;;  %vm1230_vm1 = vcmp.eq.f32.partialorder %v1229_v47, 8.507059e+37 }
0x176a   :  { %v1692_v41 = vpop.eup %1691 }
0x176b   :  { %v1221_v42 = vmul.f32 %v1692_v41, %v1219_v40  ;;  %vm1226_vm3 = vweird.f32 %v1692_v41 }
0x176c   :  { %vm1227_vm5 = vmor %vm1225_vm4, %vm1226_vm3 }
0x176d   :  { %v1222_v43 = vsub.f32 1.0, %v1221_v42 }
0x176f   :  { %v1223_v44 = vmul.f32 %v1692_v41, %v1222_v43 }
0x1771   :  { %v1224_v45 = vadd.f32 %v1692_v41, %v1223_v44 }
0x1773   :  { %v1228_v48 = vsel %vm1227_vm5, %v1692_v41, %v1224_v45  ;;  %v886_v45 = vpop.f32.mrf.mxu3 }
0x1774   :  { %v1233_v51 = vsel %vm1230_vm1, %v1232_v49, %v1228_v48  ;;  %v902_v46 = vadd.f32 %v2235_v0, %v886_v45 }
0x1775   :  { %v1236_v53 = vmul.f32 %v1233_v51, %v1179_v28  ;;  %v1557_v28 = vmul.f32 -1.442695, %v765_v12 }
0x17d2   :  { %v1239_v50 = vpop.permute.xlu1 %1238 }
0x17d3   :  { %v1241_v52 = vmul.f32 %v1239_v50, %v1233_v51 }
0x17d5   :  { %1243 = vrot.lane.b32.xlu2 %v1241_v52, %s1990_s12 }
0x182f   :  { %v1244_v54 = vpop.permute.xlu2 %1243 }
0x1830   :  { %v1246_v55 = vadd.f32 %v1244_v54, %v1236_v53 }
0x1832   :  { %1693 = vtanh.f32 %v1246_v55 }
0x1838   :  { %v1694_v56 = vpop.eup %1693 }
0x1839   :  { %1249 = vrot.lane.b32.xlu0 %v1694_v56, %s1989_s4 }
0x18ab   :  { %v1250_v57 = vpop.permute.xlu0 %1249 }
0x18ac   :  { %v1252_v58 = vmul.f32 %v1250_v57, %v1233_v51 }
0x18ae   :  { %1254 = vrot.lane.b32.xlu1 %v1252_v58, %s1990_s12 }
0x1920   :  { %v1255_v59 = vpop.permute.xlu1 %1254 }
0x1921   :  { %1258 = vst.msk [vmem:[#allocation18 + $0x20] sm:$0xff] %vm152_vm0, %v1255_v59  ;;  %1576 = vmatmul.msk.f32.vlgmr.msra.gmra.mxu2 %vm152_vm0, %v1255_v59 }
0x19a4   :  { %v1279_v1 = vpop.f32.mrf.mxu2 }
0x19a5   :  { %v1282_v3 = vadd.f32 %v1279_v1, %v901_v63 }
0x19a7   :  { %1695 = vtanh.f32 %v1282_v3  ;;  %v1577_v6 = vmul.f32 -1.442695, %v1282_v3 }
0x19a9   :  { %1697 = vpow2.f32 %v1577_v6 }
0x19ad   :  { %v1696_v4 = vpop.eup %1695 }
0x19ae   :  { %1305 = vrot.lane.b32.xlu2 %v1696_v4, %s1989_s4 }
0x19af   :  { %v1698_v13 = vpop.eup %1697 }
0x19b0   :  { %v1286_v62 = vadd.f32 1.0, %v1698_v13 }
0x19b2   :  { %1699 = vrcp.f32 %v1286_v62  ;;  %v1298_v2 = vand.u32 2147483648, %v1286_v62  ;;  %vm1292_vm7 = vweird.f32 %v1286_v62  ;;  %v1296_v8 = vand.u32 2147483647, %v1286_v62 }
0x19b3   :  { %1701 = vtanh.f32 %v765_v12 }
0x19b4   :  { %v1299_v21 = vor.u32 1.1754944e-38, %v1298_v2  ;;  %vm1297_vm9 = vcmp.eq.f32.partialorder %v1296_v8, 8.507059e+37 }
0x19b8   :  { %v1700_v14 = vpop.eup %1699 }
0x19b9   :  { %v1288_v15 = vmul.f32 %v1700_v14, %v1286_v62  ;;  %vm1293_vm6 = vweird.f32 %v1700_v14  ;;  %v1702_v24 = vpop.eup %1701 }
0x19ba   :  { %vm1294_vm8 = vmor %vm1292_vm7, %vm1293_vm6 }
0x19bb   :  { %v1289_v17 = vsub.f32 1.0, %v1288_v15 }
0x19bd   :  { %v1290_v18 = vmul.f32 %v1700_v14, %v1289_v17 }
0x19bf   :  { %v1291_v20 = vadd.f32 %v1700_v14, %v1290_v18 }
0x19c1   :  { %v1295_v11 = vsel %vm1294_vm8, %v1700_v14, %v1291_v20 }
0x19c2   :  { %v1300_v7 = vsel %vm1297_vm9, %v1299_v21, %v1295_v11 }
0x19c3   :  { %v1303_v10 = vmul.f32 %v1300_v7, %v1246_v55 }
0x1a08   :  { %v1306_v22 = vpop.permute.xlu2 %1305 }
0x1a09   :  { %v1308_v23 = vmul.f32 %v1306_v22, %v1300_v7 }
0x1a0b   :  { %1310 = vrot.lane.b32.xlu0 %v1308_v23, %s1990_s12 }
0x1a13   :  { %788 = vrot.lane.b32.xlu0 %v1702_v24, %s1989_s4 }
0x1a7d   :  { %v1311_v25 = vpop.permute.xlu0 %1310 }
0x1a7e   :  { %v2315_v26 = vadd.f32 %v1311_v25, %v1303_v10 }
0x1a80   :  { %1703 = vtanh.f32 %v2315_v26 }
0x1a81   :  { %1705 = vpow2.f32 %v1557_v28 }
0x1a85   :  { %v789_v41 = vpop.permute.xlu0 %788 }
0x1a86   :  { %v1704_v27 = vpop.eup %1703 }
0x1a87   :  { %1316 = vrot.lane.b32.xlu1 %v1704_v27, %s1989_s4  ;;  %v1706_v16 = vpop.eup %1705 }
0x1a88   :  { %v769_v29 = vadd.f32 1.0, %v1706_v16 }
0x1a8a   :  { %1707 = vrcp.f32 %v769_v29  ;;  %v781_v37 = vand.u32 2147483648, %v769_v29  ;;  %vm775_vm11 = vweird.f32 %v769_v29  ;;  %v779_v38 = vand.u32 2147483647, %v769_v29 }
0x1a8c   :  { %v782_v40 = vor.u32 1.1754944e-38, %v781_v37  ;;  %vm780_vm13 = vcmp.eq.f32.partialorder %v779_v38, 8.507059e+37 }
0x1a90   :  { %v1708_v30 = vpop.eup %1707 }
0x1a91   :  { %v771_v31 = vmul.f32 %v1708_v30, %v769_v29  ;;  %vm776_vm10 = vweird.f32 %v1708_v30 }
0x1a92   :  { %vm777_vm12 = vmor %vm775_vm11, %vm776_vm10 }
0x1a93   :  { %v772_v32 = vsub.f32 1.0, %v771_v31 }
0x1a95   :  { %v773_v33 = vmul.f32 %v1708_v30, %v772_v32 }
0x1a97   :  { %v774_v35 = vadd.f32 %v1708_v30, %v773_v33 }
0x1a99   :  { %v778_v39 = vsel %vm777_vm12, %v1708_v30, %v774_v35 }
0x1a9a   :  { %v783_v42 = vsel %vm780_vm13, %v782_v40, %v778_v39 }
0x1a9b   :  { %v791_v43 = vmul.f32 %v789_v41, %v783_v42  ;;  %v786_v50 = vmul.f32 %v783_v42, %v2248_v61 }
0x1af9   :  { %v1317_v34 = vpop.permute.xlu1 %1316 }
0x1afa   :  { %v1319_v36 = vmul.f32 %v1317_v34, %v1300_v7 }
0x1afc   :  { %1321 = vrot.lane.b32.xlu2 %v1319_v36, %s1990_s12 }
0x1b04   :  { %793 = vrot.lane.b32.xlu2 %v791_v43, %s1990_s12 }
0x1b56   :  { %v1322_v44 = vpop.permute.xlu2 %1321 }
0x1b57   :  { %1325 = vst.msk [vmem:[#allocation18 + $0x28] sm:$0xff] %vm152_vm0, %v1322_v44  ;;  %1578 = vmatmul.msk.f32.vlgmr.msrb.gmra.mxu1 %vm152_vm0, %v1322_v44 }
0x1b5e   :  { %v794_v49 = vpop.permute.xlu2 %793 }
0x1b5f   :  { %v2325_v51 = vadd.f32 %v794_v49, %v786_v50 }
0x1bd4   :  { %v1346_v47 = vpop.f32.mrf.mxu1 }
0x1bd5   :  { %v1349_v48 = vadd.f32 %v1346_v47, %v902_v46 }
0x1bd7   :  { %1709 = vtanh.f32 %v1349_v48  ;;  %v1579_v54 = vmul.f32 -1.442695, %v1349_v48 }
0x1bd8   :  { %1711 = vtanh.f32 %v2325_v51 }
0x1bd9   :  { %1713 = vpow2.f32 %v1579_v54 }
0x1bdd   :  { %v1710_v52 = vpop.eup %1709 }
0x1bde   :  { %1372 = vrot.lane.b32.xlu1 %v1710_v52, %s1989_s4  ;;  %v1712_v53 = vpop.eup %1711 }
0x1bdf   :  { %v1714_v55 = vpop.eup %1713 }
0x1be0   :  { %v1353_v56 = vadd.f32 1.0, %v1714_v55 }
0x1be2   :  { %1715 = vrcp.f32 %v1353_v56  ;;  %v1365_v63 = vand.u32 2147483648, %v1353_v56  ;;  %vm1359_vm15 = vweird.f32 %v1353_v56  ;;  %v1363_v1 = vand.u32 2147483647, %v1353_v56 }
0x1be4   :  { %v1366_v4 = vor.u32 1.1754944e-38, %v1365_v63  ;;  %vm1364_vm3 = vcmp.eq.f32.partialorder %v1363_v1, 8.507059e+37 }
0x1be6   :  { %799 = vrot.lane.b32.xlu1 %v1712_v53, %s1989_s4 }
0x1be8   :  { %v1716_v57 = vpop.eup %1715 }
0x1be9   :  { %v1355_v58 = vmul.f32 %v1716_v57, %v1353_v56  ;;  %vm1360_vm14 = vweird.f32 %v1716_v57 }
0x1bea   :  { %vm1361_vm2 = vmor %vm1359_vm15, %vm1360_vm14 }
0x1beb   :  { %v1356_v59 = vsub.f32 1.0, %v1355_v58 }
0x1bed   :  { %v1357_v60 = vmul.f32 %v1716_v57, %v1356_v59 }
0x1bef   :  { %v1358_v61 = vadd.f32 %v1716_v57, %v1357_v60 }
0x1bf1   :  { %v1362_v3 = vsel %vm1361_vm2, %v1716_v57, %v1358_v61 }
0x1bf2   :  { %v1367_v13 = vsel %vm1364_vm3, %v1366_v4, %v1362_v3 }
0x1bf3   :  { %v1370_v17 = vmul.f32 %v1367_v13, %v2315_v26 }
0x1c50   :  { %v1373_v6 = vpop.permute.xlu1 %1372 }
0x1c51   :  { %v1375_v62 = vmul.f32 %v1373_v6, %v1367_v13 }
0x1c53   :  { %1377 = vrot.lane.b32.xlu0 %v1375_v62, %s1990_s12 }
0x1c58   :  { %v800_v14 = vpop.permute.xlu1 %799 }
0x1c59   :  { %v802_v15 = vmul.f32 %v800_v14, %v783_v42 }
0x1c5b   :  { %804 = vrot.lane.b32.xlu0 %v802_v15, %s1990_s12 }
0x1cc5   :  { %v1378_v18 = vpop.permute.xlu0 %1377 }
0x1cc6   :  { %v1380_v19 = vadd.f32 %v1378_v18, %v1370_v17 }
0x1cc8   :  { %1717 = vtanh.f32 %v1380_v19 }
0x1ccd   :  { %v805_v20 = vpop.permute.xlu0 %804 }
0x1cce   :  { %v1718_v2 = vpop.eup %1717  ;;  %808 = vst.msk [vmem:[#allocation5 + $0x38] sm:$0xff] %vm152_vm0, %v805_v20 }
0x1ccf   :  { %809 = vst.msk [vmem:[#allocation2] sm:$0xff] %vm152_vm0, %v805_v20  ;;  %1383 = vrot.lane.b32.xlu2 %v1718_v2, %s1989_s4 }
0x1cd5   :  { %v822_v8 = vld [vmem:[#allocation5 + $0x38] sm:$0xff] }
0x1cd6   :  { %1565 = vmatmul.msk.f32.gmra.mxu3 %vm152_vm0, %v822_v8  ;;  %v1469_v9 = vld [vmem:[#allocation2] sm:$0xff] }
0x1cd7   :  { %1471 = vst.msk [vmem:[#allocation19] sm:$0xff] %vm152_vm0, %v1469_v9 }
0x1d29   :  { %v1384_v5 = vpop.permute.xlu2 %1383 }
0x1d2a   :  { %v1386_v11 = vmul.f32 %v1384_v5, %v1367_v13 }
0x1d2c   :  { %1388 = vrot.lane.b32.xlu1 %v1386_v11, %s1990_s12 }
0x1d59   :  { %v889_v12 = vpop.f32.mrf.mxu3 }
0x1d5a   :  { %v903_v22 = vadd.f32 %v2235_v0, %v889_v12 }
0x1d9e   :  { %v1389_v21 = vpop.permute.xlu1 %1388 }
0x1d9f   :  { %1392 = vst.msk [vmem:[#allocation18 + $0x30] sm:$0xff] %vm152_vm0, %v1389_v21  ;;  %1580 = vmatmul.msk.f32.vlgmr.msrb.gmra.mxu2 %vm152_vm0, %v1389_v21 }
0x1e22   :  { %v1413_v7 = vpop.f32.mrf.mxu2 }
0x1e23   :  { %v1416_v23 = vadd.f32 %v1413_v7, %v903_v22 }
0x1e25   :  { %1719 = vtanh.f32 %v1416_v23  ;;  %v1581_v10 = vmul.f32 -1.442695, %v1416_v23 }
0x1e27   :  { %1721 = vpow2.f32 %v1581_v10 }
0x1e2b   :  { %v1720_v24 = vpop.eup %1719 }
0x1e2c   :  { %1439 = vrot.lane.b32.xlu2 %v1720_v24, %s1989_s4 }
0x1e2d   :  { %v1722_v25 = vpop.eup %1721 }
0x1e2e   :  { %v1420_v26 = vadd.f32 1.0, %v1722_v25 }
0x1e30   :  { %1723 = vrcp.f32 %v1420_v26  ;;  %v1432_v31 = vand.u32 2147483648, %v1420_v26  ;;  %vm1426_vm5 = vweird.f32 %v1420_v26  ;;  %v1430_v0 = vand.u32 2147483647, %v1420_v26 }
0x1e32   :  { %v1433_v33 = vor.u32 1.1754944e-38, %v1432_v31  ;;  %vm1431_vm6 = vcmp.eq.f32.partialorder %v1430_v0, 8.507059e+37 }
0x1e36   :  { %v1724_v27 = vpop.eup %1723 }
0x1e37   :  { %v1422_v28 = vmul.f32 %v1724_v27, %v1420_v26  ;;  %vm1427_vm4 = vweird.f32 %v1724_v27 }
0x1e38   :  { %vm1428_vm1 = vmor %vm1426_vm5, %vm1427_vm4 }
0x1e39   :  { %v1423_v16 = vsub.f32 1.0, %v1422_v28 }
0x1e3b   :  { %v1424_v29 = vmul.f32 %v1724_v27, %v1423_v16 }
0x1e3d   :  { %v1425_v30 = vadd.f32 %v1724_v27, %v1424_v29 }
0x1e3f   :  { %v1429_v32 = vsel %vm1428_vm1, %v1724_v27, %v1425_v30 }
0x1e40   :  { %v1434_v35 = vsel %vm1431_vm6, %v1433_v33, %v1429_v32 }
0x1e41   :  { %v1437_v37 = vmul.f32 %v1434_v35, %v1380_v19 }
0x1e86   :  { %v1440_v34 = vpop.permute.xlu2 %1439 }
0x1e87   :  { %v1442_v36 = vmul.f32 %v1440_v34, %v1434_v35 }
0x1e89   :  { %1444 = vrot.lane.b32.xlu0 %v1442_v36, %s1990_s12 }
0x1e91   :  { %811 = vrot.lane.b32.xlu0 %v2325_v51, %s1991_s3 }
0x1efb   :  { %v1445_v38 = vpop.permute.xlu0 %1444 }
0x1efc   :  { %v1447_v39 = vadd.f32 %v1445_v38, %v1437_v37 }
0x1efe   :  { %1725 = vtanh.f32 %v1447_v39 }
0x1f03   :  { %v812_v40 = vpop.permute.xlu0 %811 }
0x1f04   :  { %v1726_v41 = vpop.eup %1725  ;;  %814 = vst.msk [vmem:[#allocation3] sm:$0xff] %vm152_vm0, %v812_v40 }
0x1f05   :  { %1450 = vrot.lane.b32.xlu1 %v1726_v41, %s1989_s4 }
0x1f0b   :  { %v1473_v42 = vld [vmem:[#allocation3] sm:$0xff] }
0x1f0c   :  { %1475 = vst.msk [vmem:[#allocation21] sm:$0xff] %vm152_vm0, %v1473_v42 }
0x1f0d   :  { %1462 = vrot.lane.b32.xlu1 %v1447_v39, %s1991_s3 }
0x1f77   :  { %v1451_v43 = vpop.permute.xlu1 %1450 }
0x1f78   :  { %v1453_v44 = vmul.f32 %v1451_v43, %v1434_v35 }
0x1f7a   :  { %1455 = vrot.lane.b32.xlu2 %v1453_v44, %s1990_s12 }
0x1f7f   :  { %v1463_v45 = vpop.permute.xlu1 %1462 }
0x1f80   :  { %1465 = vst.msk [vmem:[#allocation3 + $0x8] sm:$0xff] %vm152_vm0, %v1463_v45 }
0x1f87   :  { %v1474_v46 = vld [vmem:[#allocation3 + $0x8] sm:$0xff] }
0x1f88   :  { %1476 = vst.msk [vmem:[#allocation21 + $0x8] sm:$0xff] %vm152_vm0, %v1474_v46 }
0x1fd4   :  { %v1456_v47 = vpop.permute.xlu2 %1455 }
0x1fd5   :  { %1459 = vst.msk [vmem:[#allocation18 + $0x38] sm:$0xff] %vm152_vm0, %v1456_v47 }
0x1fd6   :  { %1460 = vst.msk [vmem:[#allocation2 + $0x8] sm:$0xff] %vm152_vm0, %v1456_v47  ;;  %1489 = dma.vmem_to_hbm [thread:$0]  %s1482_s7, 1024, %s1484_s19, [#allocation8], %s1981_s25, %s1981_s25, %s1982_s26  }
0x1fdd   :  { %v1470_v48 = vld [vmem:[#allocation2 + $0x8] sm:$0xff] }
0x1fde   :  { %1472 = vst.msk [vmem:[#allocation19 + $0x8] sm:$0xff] %vm152_vm0, %v1470_v48 }
0x1fdf   :  { %1502 = dma.vmem_to_hbm [thread:$0]  %s1495_s20, 256, %s1497_s23, [#allocation20], %s1981_s25, %s1981_s25, %s1982_s26  }
0x1fe0   :  { %1515 = dma.vmem_to_hbm [thread:$0]  %s1508_s2, 256, %s1510_s28, [#allocation20], %s1981_s25, %s1981_s25, %s1982_s26  }
0x1fe1   :  { %1976 = dma.done.wait [#allocation8], 1024  }
0x1fe2   :  { %1977 = vsyncadd [#allocation8], 4294966272 }
0x1fe3   :  { %1978 = dma.done.wait [#allocation20], 512  }
0x1fe4   :  { %1979 = vsyncadd [#allocation20], 4294966784 }
0x1fe5   :  { %1528 = vsyncpa [#allocation7], 1 }
0x1fe6   :  { %1529 = vsyncpa [#allocation10], 1 }
0x1fe7   :  { %1530 = vsyncpa [#allocation13], 1 }
0x1fe8   :  { %1531 = vsyncpa [#allocation16], 1 }
0x1fe9   :  { %1532 = vsyncpa [#allocation8], 1 }
0x1fea   :  { %1533 = vsyncpa [#allocation20], 1 }

</bundles_post_ra>
